<compile_context>
chip_gen: v6e
topology: v6e:2x2x1
jax: 0.10.0
libtpu: 0.0.40
codegen_flags: <defaults>
</compile_context>

<pallas_src>
import numpy as np
import jax
import jax.numpy as jnp
from jax.experimental import pallas as pl
from jax.experimental.pallas import tpu as pltpu

# ----- small synthetic ViT-generator config (ViT-base would be 768/12/12) -----
SIZE       = 32                 # image H = W
PATCH      = 16                 # patch size; matches decoder PixelShuffle(16)
GRID_HW    = SIZE // PATCH      # 2  patches per side
N_PATCH    = GRID_HW * GRID_HW  # 4  patches per image
N_TOK      = N_PATCH + 1        # 5  CLS + patches
HIDDEN     = 32                 # ViT hidden dim
NUM_HEADS  = 2
HEAD_DIM   = HIDDEN // NUM_HEADS
NUM_LAYERS = 2
MLP_DIM    = 4 * HIDDEN
DEC_OUT    = 2 * PATCH * PATCH  # 512 -> PixelShuffle(16) -> 2 (ab) channels
LN_EPS     = 1e-12              # HF ViT layer_norm_eps
NEG_INF    = -1e30


# ------------------------------ fused kernel ----------------------------------
def _vit_generator_kernel(
    patches_ref, pw_ref, pb_ref, base_ref, scat_ref, gath_ref, abias_ref, hm_ref,
    lng_ref, lnb_ref, wqkv_ref, bqkv_ref, wo_ref, bo_ref,
    w1_ref, b1_ref, w2_ref, b2_ref, lnfg_ref, lnfb_ref,
    shift_ref, d1w_ref, d1b_ref, d2w_ref, d2b_ref, d3w_ref, d3b_ref,
    o_ref):
    """Whole generator forward; every intermediate stays in VMEM."""

    def dot(a, b):
        return jnp.dot(a, b, preferred_element_type=jnp.float32)

    def layernorm(x, g, b):
        mu = jnp.mean(x, axis=-1, keepdims=True)
        xc = x - mu
        var = jnp.mean(xc * xc, axis=-1, keepdims=True)
        return xc * jax.lax.rsqrt(var + LN_EPS) * g + b

    def gelu(x):
        # TODO(synk): HF ViT uses exact erf-GELU; tanh approximation (EUP-safe) here.
        c = 0.7978845608028654
        return 0.5 * x * (1.0 + jnp.tanh(c * (x + 0.044715 * x * x * x)))

    # --- ViT patch embedding + CLS/pos assembly (scatter via tiny MXU dot) ---
    emb = dot(patches_ref[...], pw_ref[...]) + pb_ref[...]          # (B*hw, D)
    xt = dot(scat_ref[...], emb) + base_ref[...]                    # (B*T, D)

    abias = abias_ref[...]                                          # (B*T, B*T) 0 / -inf
    scale = 1.0 / float(HEAD_DIM) ** 0.5

    # --- pre-norm transformer encoder (unrolled; weights indexed per layer) ---
    for l in range(NUM_LAYERS):
        x2 = layernorm(xt, lng_ref[2 * l], lnb_ref[2 * l])
        q = dot(x2, wqkv_ref[3 * l + 0]) + bqkv_ref[3 * l + 0]
        k = dot(x2, wqkv_ref[3 * l + 1]) + bqkv_ref[3 * l + 1]
        v = dot(x2, wqkv_ref[3 * l + 2]) + bqkv_ref[3 * l + 2]

        ctx = jnp.zeros_like(x2)
        for h in range(NUM_HEADS):
            mh = hm_ref[h]                                          # (1, D) head-column mask
            s = jax.lax.dot_general(q * mh, k, (((1,), (1,)), ((), ())),
                                    preferred_element_type=jnp.float32)
            s = s * scale + abias                                   # block-diag batch mask
            s = s - jnp.max(s, axis=-1, keepdims=True)
            p = jnp.exp(s)
            p = p * pl.reciprocal(jnp.sum(p, axis=-1, keepdims=True), approx=True)
            ctx = ctx + dot(p, v * mh)                              # head cols stay in place
        xt = xt + dot(ctx, wo_ref[l]) + bo_ref[l]

        x2 = layernorm(xt, lng_ref[2 * l + 1], lnb_ref[2 * l + 1])
        hdn = gelu(dot(x2, w1_ref[l]) + b1_ref[l])
        xt = xt + dot(hdn, w2_ref[l]) + b2_ref[l]

    xt = layernorm(xt, lnfg_ref[...], lnfb_ref[...])
    feat = dot(gath_ref[...], xt)                                   # drop CLS -> (B*hw, D)

    # --- decoder: Conv3x3+ReLU, Conv3x3+ReLU, Conv3x3, chained in VMEM -------
    # Each conv = sum over 9 taps of (shift_k @ x) @ W_k  (shift_k is the
    # zero-padded pixel-shift matrix for tap k; padding=1 handled by zero rows).
    def conv3x3(x, w_ref, b_ref, relu):
        acc = jnp.zeros((x.shape[0], w_ref.shape[-1]), jnp.float32)
        for t in range(9):
            acc = acc + dot(dot(shift_ref[t], x), w_ref[t])
        acc = acc + b_ref[...]
        return jnp.maximum(acc, 0.0) if relu else acc

    y = conv3x3(feat, d1w_ref, d1b_ref, True)
    y = conv3x3(y, d2w_ref, d2b_ref, True)
    y = conv3x3(y, d3w_ref, d3b_ref, False)                         # (B*hw, 512) lane-dense
    o_ref[...] = y.astype(o_ref.dtype)


# ------------------------------- parameters -----------------------------------
def init_params(key):
    keys = iter(jax.random.split(key, 64))
    std = 0.02  # matches init_weights(..., init='norm', gain=0.02)

    def nrm(shape):
        return std * jax.random.normal(next(keys), shape, dtype=jnp.float32)

    params = {
        "patch_w": nrm((3 * PATCH * PATCH, HIDDEN)),
        "patch_b": jnp.zeros((HIDDEN,), jnp.float32),
        "cls_token": nrm((1, 1, HIDDEN)),
        "pos_emb": nrm((1, N_TOK, HIDDEN)),
        "lnf_g": jnp.ones((HIDDEN,), jnp.float32),
        "lnf_b": jnp.zeros((HIDDEN,), jnp.float32),
        "layers": [],
        # decoder convs in PyTorch layout (Cout, Cin, 3, 3)
        "dec1_w": nrm((HIDDEN, HIDDEN, 3, 3)),
        "dec1_b": jnp.zeros((HIDDEN,), jnp.float32),
        "dec2_w": nrm((HIDDEN, HIDDEN, 3, 3)),
        "dec2_b": jnp.zeros((HIDDEN,), jnp.float32),
        "dec3_w": nrm((DEC_OUT, HIDDEN, 3, 3)),
        "dec3_b": jnp.zeros((DEC_OUT,), jnp.float32),
    }
    for _ in range(NUM_LAYERS):
        params["layers"].append({
            "ln1_g": jnp.ones((HIDDEN,), jnp.float32),
            "ln1_b": jnp.zeros((HIDDEN,), jnp.float32),
            "wq": nrm((HIDDEN, HIDDEN)), "bq": jnp.zeros((HIDDEN,), jnp.float32),
            "wk": nrm((HIDDEN, HIDDEN)), "bk": jnp.zeros((HIDDEN,), jnp.float32),
            "wv": nrm((HIDDEN, HIDDEN)), "bv": jnp.zeros((HIDDEN,), jnp.float32),
            "wo": nrm((HIDDEN, HIDDEN)), "bo": jnp.zeros((HIDDEN,), jnp.float32),
            "ln2_g": jnp.ones((HIDDEN,), jnp.float32),
            "ln2_b": jnp.zeros((HIDDEN,), jnp.float32),
            "w1": nrm((HIDDEN, MLP_DIM)), "b1": jnp.zeros((MLP_DIM,), jnp.float32),
            "w2": nrm((MLP_DIM, HIDDEN)), "b2": jnp.zeros((HIDDEN,), jnp.float32),
        })
    return params


def pack_params(params, batch):
    """Pack PyTorch-style params + constant index/mask matrices into kernel operands."""
    D, T, hw, L = HIDDEN, N_TOK, N_PATCH, NUM_LAYERS
    BT, BHW = batch * T, batch * hw

    # constant scatter/gather/mask matrices (built once on host; tiny)
    scat = np.zeros((BT, BHW), np.float32)      # token row <- patch row (CLS rows zero)
    gath = np.zeros((BHW, BT), np.float32)      # patch row <- token row (drops CLS)
    for b in range(batch):
        for p in range(hw):
            scat[b * T + p + 1, b * hw + p] = 1.0
            gath[b * hw + p, b * T + p + 1] = 1.0
    abias = np.full((BT, BT), NEG_INF, np.float32)  # additive attention batch mask
    for b in range(batch):
        abias[b * T:(b + 1) * T, b * T:(b + 1) * T] = 0.0
    hm = np.zeros((NUM_HEADS, 1, D), np.float32)    # per-head column masks
    for h in range(NUM_HEADS):
        hm[h, 0, h * HEAD_DIM:(h + 1) * HEAD_DIM] = 1.0
    g = GRID_HW
    shift = np.zeros((9, BHW, BHW), np.float32)     # 3x3 taps, padding=1, per batch
    for kh in range(3):
        for kw in range(3):
            t = kh * 3 + kw
            for b in range(batch):
                for i in range(g):
                    for j in range(g):
                        si, sj = i + kh - 1, j + kw - 1
                        if 0 <= si < g and 0 <= sj < g:
                            shift[t, b * hw + i * g + j, b * hw + si * g + sj] = 1.0

    # base = positional embedding, with CLS token folded into token-0 rows
    pos = params["pos_emb"].reshape(T, D)
    cls = params["cls_token"].reshape(1, D)
    base = jnp.tile(pos.at[0, :].add(cls[0]), (batch, 1))          # (B*T, D)

    lyr = params["layers"]
    lng = jnp.stack([l[k] for l in lyr for k in ("ln1_g", "ln2_g")]).reshape(2 * L, 1, D)
    lnb = jnp.stack([l[k] for l in lyr for k in ("ln1_b", "ln2_b")]).reshape(2 * L, 1, D)
    wqkv = jnp.stack([l[k] for l in lyr for k in ("wq", "wk", "wv")])          # (3L, D, D)
    bqkv = jnp.stack([l[k] for l in lyr for k in ("bq", "bk", "bv")]).reshape(3 * L, 1, D)
    wo = jnp.stack([l["wo"] for l in lyr])                                     # (L, D, D)
    bo = jnp.stack([l["bo"] for l in lyr]).reshape(L, 1, D)
    w1 = jnp.stack([l["w1"] for l in lyr])                                     # (L, D, MLP)
    b1 = jnp.stack([l["b1"] for l in lyr]).reshape(L, 1, MLP_DIM)
    w2 = jnp.stack([l["w2"] for l in lyr])                                     # (L, MLP, D)
    b2 = jnp.stack([l["b2"] for l in lyr]).reshape(L, 1, D)

    def conv_w(w):  # (Cout, Cin, 3, 3) -> (9, Cin, Cout), tap index = kh*3+kw
        return jnp.transpose(w, (2, 3, 1, 0)).reshape(9, w.shape[1], w.shape[0])

    return (
        params["patch_w"], params["patch_b"].reshape(1, D), base,
        jnp.asarray(scat), jnp.asarray(gath), jnp.asarray(abias), jnp.asarray(hm),
        lng, lnb, wqkv, bqkv, wo, bo, w1, b1, w2, b2,
        params["lnf_g"].reshape(1, D), params["lnf_b"].reshape(1, D),
        jnp.asarray(shift),
        conv_w(params["dec1_w"]), params["dec1_b"].reshape(1, D),
        conv_w(params["dec2_w"]), params["dec2_b"].reshape(1, D),
        conv_w(params["dec3_w"]), params["dec3_b"].reshape(1, DEC_OUT),
    )


# ------------------------------ forward pass -----------------------------------
def main_model_forward(packed, L_img):
    """MainModel.forward(): fake_color = net_G(L.repeat(1,3,1,1)).logits"""
    B, _, H, W = L_img.shape
    g = H // PATCH
    BHW = B * g * g

    # L.repeat(1,3,1,1) + Conv2d(3,D,k=16,s=16)-style patch extraction -> (B*hw, 768)
    x = jnp.repeat(L_img, 3, axis=1)
    patches = (x.reshape(B, 3, g, PATCH, g, PATCH)
                 .transpose(0, 2, 4, 1, 3, 5)
                 .reshape(BHW, 3 * PATCH * PATCH))

    operands = (patches,) + packed
    in_specs = [pl.BlockSpec(a.shape, lambda *_, nd=a.ndim: (0,) * nd) for a in operands]
    out_spec = pl.BlockSpec((BHW, DEC_OUT), lambda *_: (0, 0))

    y = pl.pallas_call(
        _vit_generator_kernel,
        out_shape=jax.ShapeDtypeStruct((BHW, DEC_OUT), jnp.float32),
        grid=(1,),
        in_specs=in_specs,
        out_specs=out_spec,
        compiler_params=pltpu.CompilerParams(dimension_semantics=("arbitrary",)),
    )(*operands)

    # PixelShuffle(16): NHWC (B, h, w, 2*16*16) slab -> (B, 2, H, W) == .logits
    r = PATCH
    fake_color = (y.reshape(B, g, g, 2, r, r)
                    .transpose(0, 3, 1, 4, 2, 5)
                    .reshape(B, 2, g * r, g * r))
    return fake_color


# ---------------------------------- main ---------------------------------------
if __name__ == "__main__":
    key = jax.random.PRNGKey(0)
    kp, kx = jax.random.split(key)
    params = init_params(kp)

    B = 2
    packed = pack_params(params, B)
    # L channel (as produced by ColorizationDataset: values in [-1, 1]), NCHW
    L_img = jax.random.uniform(kx, (B, 1, SIZE, SIZE), jnp.float32, minval=-1.0, maxval=1.0)

    fwd = jax.jit(main_model_forward)
    fake_color = fwd(packed, L_img)
    fake_color = jax.block_until_ready(fake_color)

    assert fake_color.shape == (B, 2, SIZE, SIZE), fake_color.shape
    assert fake_color.dtype == jnp.float32
    assert bool(jnp.all(jnp.isfinite(fake_color)))
    print("KERNEL_OK")
</pallas_src>

<mosaic_0001>
module attributes {stable_mosaic.version = 11 : i64} {
  func.func @_vit_generator_kernel(%arg0: i32, %arg1: memref<8x768xf32, #tpu.memory_space<vmem>>, %arg2: memref<768x32xf32, #tpu.memory_space<vmem>>, %arg3: memref<1x32xf32, #tpu.memory_space<vmem>>, %arg4: memref<10x32xf32, #tpu.memory_space<vmem>>, %arg5: memref<10x8xf32, #tpu.memory_space<vmem>>, %arg6: memref<8x10xf32, #tpu.memory_space<vmem>>, %arg7: memref<10x10xf32, #tpu.memory_space<vmem>>, %arg8: memref<2x1x32xf32, #tpu.memory_space<vmem>>, %arg9: memref<4x1x32xf32, #tpu.memory_space<vmem>>, %arg10: memref<4x1x32xf32, #tpu.memory_space<vmem>>, %arg11: memref<6x32x32xf32, #tpu.memory_space<vmem>>, %arg12: memref<6x1x32xf32, #tpu.memory_space<vmem>>, %arg13: memref<2x32x32xf32, #tpu.memory_space<vmem>>, %arg14: memref<2x1x32xf32, #tpu.memory_space<vmem>>, %arg15: memref<2x32x128xf32, #tpu.memory_space<vmem>>, %arg16: memref<2x1x128xf32, #tpu.memory_space<vmem>>, %arg17: memref<2x128x32xf32, #tpu.memory_space<vmem>>, %arg18: memref<2x1x32xf32, #tpu.memory_space<vmem>>, %arg19: memref<1x32xf32, #tpu.memory_space<vmem>>, %arg20: memref<1x32xf32, #tpu.memory_space<vmem>>, %arg21: memref<9x8x8xf32, #tpu.memory_space<vmem>>, %arg22: memref<9x32x32xf32, #tpu.memory_space<vmem>>, %arg23: memref<1x32xf32, #tpu.memory_space<vmem>>, %arg24: memref<9x32x32xf32, #tpu.memory_space<vmem>>, %arg25: memref<1x32xf32, #tpu.memory_space<vmem>>, %arg26: memref<9x32x512xf32, #tpu.memory_space<vmem>>, %arg27: memref<1x512xf32, #tpu.memory_space<vmem>>, %arg28: memref<8x512xf32, #tpu.memory_space<vmem>>) attributes {dimension_semantics = [#tpu.dimension_semantics<arbitrary>], iteration_bounds = array<i64: 1>, scalar_prefetch = 0 : i64, scratch_operands = 0 : i64, tpu.core_type = #tpu.core_type<tc>, window_params = [{pipeline_mode = #tpu.pipeline_mode<synchronous>, transform_indices = @transform_0, window_bounds = array<i64: 8, 768>}, {pipeline_mode = #tpu.pipeline_mode<synchronous>, transform_indices = @transform_1, window_bounds = array<i64: 768, 32>}, {pipeline_mode = #tpu.pipeline_mode<synchronous>, transform_indices = @transform_2, window_bounds = array<i64: 1, 32>}, {pipeline_mode = #tpu.pipeline_mode<synchronous>, transform_indices = @transform_3, window_bounds = array<i64: 10, 32>}, {pipeline_mode = #tpu.pipeline_mode<synchronous>, transform_indices = @transform_4, window_bounds = array<i64: 10, 8>}, {pipeline_mode = #tpu.pipeline_mode<synchronous>, transform_indices = @transform_5, window_bounds = array<i64: 8, 10>}, {pipeline_mode = #tpu.pipeline_mode<synchronous>, transform_indices = @transform_6, window_bounds = array<i64: 10, 10>}, {pipeline_mode = #tpu.pipeline_mode<synchronous>, transform_indices = @transform_7, window_bounds = array<i64: 2, 1, 32>}, {pipeline_mode = #tpu.pipeline_mode<synchronous>, transform_indices = @transform_8, window_bounds = array<i64: 4, 1, 32>}, {pipeline_mode = #tpu.pipeline_mode<synchronous>, transform_indices = @transform_9, window_bounds = array<i64: 4, 1, 32>}, {pipeline_mode = #tpu.pipeline_mode<synchronous>, transform_indices = @transform_10, window_bounds = array<i64: 6, 32, 32>}, {pipeline_mode = #tpu.pipeline_mode<synchronous>, transform_indices = @transform_11, window_bounds = array<i64: 6, 1, 32>}, {pipeline_mode = #tpu.pipeline_mode<synchronous>, transform_indices = @transform_12, window_bounds = array<i64: 2, 32, 32>}, {pipeline_mode = #tpu.pipeline_mode<synchronous>, transform_indices = @transform_13, window_bounds = array<i64: 2, 1, 32>}, {pipeline_mode = #tpu.pipeline_mode<synchronous>, transform_indices = @transform_14, window_bounds = array<i64: 2, 32, 128>}, {pipeline_mode = #tpu.pipeline_mode<synchronous>, transform_indices = @transform_15, window_bounds = array<i64: 2, 1, 128>}, {pipeline_mode = #tpu.pipeline_mode<synchronous>, transform_indices = @transform_16, window_bounds = array<i64: 2, 128, 32>}, {pipeline_mode = #tpu.pipeline_mode<synchronous>, transform_indices = @transform_17, window_bounds = array<i64: 2, 1, 32>}, {pipeline_mode = #tpu.pipeline_mode<synchronous>, transform_indices = @transform_18, window_bounds = array<i64: 1, 32>}, {pipeline_mode = #tpu.pipeline_mode<synchronous>, transform_indices = @transform_19, window_bounds = array<i64: 1, 32>}, {pipeline_mode = #tpu.pipeline_mode<synchronous>, transform_indices = @transform_20, window_bounds = array<i64: 9, 8, 8>}, {pipeline_mode = #tpu.pipeline_mode<synchronous>, transform_indices = @transform_21, window_bounds = array<i64: 9, 32, 32>}, {pipeline_mode = #tpu.pipeline_mode<synchronous>, transform_indices = @transform_22, window_bounds = array<i64: 1, 32>}, {pipeline_mode = #tpu.pipeline_mode<synchronous>, transform_indices = @transform_23, window_bounds = array<i64: 9, 32, 32>}, {pipeline_mode = #tpu.pipeline_mode<synchronous>, transform_indices = @transform_24, window_bounds = array<i64: 1, 32>}, {pipeline_mode = #tpu.pipeline_mode<synchronous>, transform_indices = @transform_25, window_bounds = array<i64: 9, 32, 512>}, {pipeline_mode = #tpu.pipeline_mode<synchronous>, transform_indices = @transform_26, window_bounds = array<i64: 1, 512>}, {pipeline_mode = #tpu.pipeline_mode<synchronous>, transform_indices = @transform_27, window_bounds = array<i64: 8, 512>}]} {
    %c0 = arith.constant 0 : index
    %c0_0 = arith.constant 0 : index
    %0 = vector.load %arg1[%c0, %c0_0] : memref<8x768xf32, #tpu.memory_space<vmem>>, vector<8x768xf32>
    %c0_1 = arith.constant 0 : index
    %c0_2 = arith.constant 0 : index
    %1 = vector.load %arg2[%c0_1, %c0_2] : memref<768x32xf32, #tpu.memory_space<vmem>>, vector<768x32xf32>
    %cst = arith.constant dense<0.000000e+00> : vector<8x32xf32>
    %2 = tpu.matmul %0, %1, %cst {dimension_numbers = #tpu.dot_dimension_numbers<[1], [0], [0], [1], [0, 0, 1, 1], [], []>} : vector<8x768xf32>, vector<768x32xf32>, vector<8x32xf32> -> vector<8x32xf32>
    %c0_3 = arith.constant 0 : index
    %c0_4 = arith.constant 0 : index
    %3 = vector.load %arg3[%c0_3, %c0_4] : memref<1x32xf32, #tpu.memory_space<vmem>>, vector<1x32xf32>
    %4 = vector.broadcast %3 : vector<1x32xf32> to vector<8x32xf32>
    %5 = arith.addf %2, %4 : vector<8x32xf32>
    %c0_5 = arith.constant 0 : index
    %c0_6 = arith.constant 0 : index
    %6 = vector.load %arg5[%c0_5, %c0_6] : memref<10x8xf32, #tpu.memory_space<vmem>>, vector<10x8xf32>
    %cst_7 = arith.constant dense<0.000000e+00> : vector<10x32xf32>
    %7 = tpu.matmul %6, %5, %cst_7 {dimension_numbers = #tpu.dot_dimension_numbers<[1], [0], [0], [1], [0, 0, 1, 1], [], []>} : vector<10x8xf32>, vector<8x32xf32>, vector<10x32xf32> -> vector<10x32xf32>
    %c0_8 = arith.constant 0 : index
    %c0_9 = arith.constant 0 : index
    %8 = vector.load %arg4[%c0_8, %c0_9] : memref<10x32xf32, #tpu.memory_space<vmem>>, vector<10x32xf32>
    %9 = arith.addf %7, %8 : vector<10x32xf32>
    %c0_10 = arith.constant 0 : index
    %c0_11 = arith.constant 0 : index
    %10 = vector.load %arg7[%c0_10, %c0_11] : memref<10x10xf32, #tpu.memory_space<vmem>>, vector<10x10xf32>
    %c0_12 = arith.constant 0 : index
    %c0_13 = arith.constant 0 : index
    %c0_14 = arith.constant 0 : index
    %11 = vector.load %arg9[%c0_12, %c0_13, %c0_14] : memref<4x1x32xf32, #tpu.memory_space<vmem>>, vector<1x1x32xf32>
    %12 = vector.shape_cast %11 : vector<1x1x32xf32> to vector<1x32xf32>
    %c0_15 = arith.constant 0 : index
    %c0_16 = arith.constant 0 : index
    %c0_17 = arith.constant 0 : index
    %13 = vector.load %arg10[%c0_15, %c0_16, %c0_17] : memref<4x1x32xf32, #tpu.memory_space<vmem>>, vector<1x1x32xf32>
    %14 = vector.shape_cast %13 : vector<1x1x32xf32> to vector<1x32xf32>
    %cst_18 = arith.constant dense<0.000000e+00> : vector<10xf32>
    %15 = vector.multi_reduction <add>, %9, %cst_18 [1] : vector<10x32xf32> to vector<10xf32>
    %16 = vector.shape_cast %15 : vector<10xf32> to vector<10x1xf32>
    %cst_19 = arith.constant 3.200000e+01 : f32
    %17 = vector.broadcast %cst_19 : f32 to vector<10x1xf32>
    %18 = arith.divf %16, %17 : vector<10x1xf32>
    %19 = vector.broadcast %18 : vector<10x1xf32> to vector<10x32xf32>
    %20 = arith.subf %9, %19 : vector<10x32xf32>
    %21 = arith.mulf %20, %20 : vector<10x32xf32>
    %cst_20 = arith.constant dense<0.000000e+00> : vector<10xf32>
    %22 = vector.multi_reduction <add>, %21, %cst_20 [1] : vector<10x32xf32> to vector<10xf32>
    %23 = vector.shape_cast %22 : vector<10xf32> to vector<10x1xf32>
    %cst_21 = arith.constant 3.200000e+01 : f32
    %24 = vector.broadcast %cst_21 : f32 to vector<10x1xf32>
    %25 = arith.divf %23, %24 : vector<10x1xf32>
    %cst_22 = arith.constant 9.99999996E-13 : f32
    %26 = vector.broadcast %cst_22 : f32 to vector<10x1xf32>
    %27 = arith.addf %25, %26 : vector<10x1xf32>
    %28 = math.rsqrt %27 : vector<10x1xf32>
    %29 = vector.broadcast %28 : vector<10x1xf32> to vector<10x32xf32>
    %30 = arith.mulf %20, %29 : vector<10x32xf32>
    %31 = vector.broadcast %12 : vector<1x32xf32> to vector<10x32xf32>
    %32 = arith.mulf %30, %31 : vector<10x32xf32>
    %33 = vector.broadcast %14 : vector<1x32xf32> to vector<10x32xf32>
    %34 = arith.addf %32, %33 : vector<10x32xf32>
    %c0_23 = arith.constant 0 : index
    %c0_24 = arith.constant 0 : index
    %c0_25 = arith.constant 0 : index
    %35 = vector.load %arg11[%c0_23, %c0_24, %c0_25] : memref<6x32x32xf32, #tpu.memory_space<vmem>>, vector<1x32x32xf32>
    %36 = vector.shape_cast %35 : vector<1x32x32xf32> to vector<32x32xf32>
    %cst_26 = arith.constant dense<0.000000e+00> : vector<10x32xf32>
    %37 = tpu.matmul %34, %36, %cst_26 {dimension_numbers = #tpu.dot_dimension_numbers<[1], [0], [0], [1], [0, 0, 1, 1], [], []>} : vector<10x32xf32>, vector<32x32xf32>, vector<10x32xf32> -> vector<10x32xf32>
    %c0_27 = arith.constant 0 : index
    %c0_28 = arith.constant 0 : index
    %c0_29 = arith.constant 0 : index
    %38 = vector.load %arg12[%c0_27, %c0_28, %c0_29] : memref<6x1x32xf32, #tpu.memory_space<vmem>>, vector<1x1x32xf32>
    %39 = vector.shape_cast %38 : vector<1x1x32xf32> to vector<1x32xf32>
    %40 = vector.broadcast %39 : vector<1x32xf32> to vector<10x32xf32>
    %41 = arith.addf %37, %40 : vector<10x32xf32>
    %c1 = arith.constant 1 : index
    %c0_30 = arith.constant 0 : index
    %c0_31 = arith.constant 0 : index
    %42 = vector.load %arg11[%c1, %c0_30, %c0_31] : memref<6x32x32xf32, #tpu.memory_space<vmem>>, vector<1x32x32xf32>
    %43 = vector.shape_cast %42 : vector<1x32x32xf32> to vector<32x32xf32>
    %cst_32 = arith.constant dense<0.000000e+00> : vector<10x32xf32>
    %44 = tpu.matmul %34, %43, %cst_32 {dimension_numbers = #tpu.dot_dimension_numbers<[1], [0], [0], [1], [0, 0, 1, 1], [], []>} : vector<10x32xf32>, vector<32x32xf32>, vector<10x32xf32> -> vector<10x32xf32>
    %c1_33 = arith.constant 1 : index
    %c0_34 = arith.constant 0 : index
    %c0_35 = arith.constant 0 : index
    %45 = vector.load %arg12[%c1_33, %c0_34, %c0_35] : memref<6x1x32xf32, #tpu.memory_space<vmem>>, vector<1x1x32xf32>
    %46 = vector.shape_cast %45 : vector<1x1x32xf32> to vector<1x32xf32>
    %47 = vector.broadcast %46 : vector<1x32xf32> to vector<10x32xf32>
    %48 = arith.addf %44, %47 : vector<10x32xf32>
    %c2 = arith.constant 2 : index
    %c0_36 = arith.constant 0 : index
    %c0_37 = arith.constant 0 : index
    %49 = vector.load %arg11[%c2, %c0_36, %c0_37] : memref<6x32x32xf32, #tpu.memory_space<vmem>>, vector<1x32x32xf32>
    %50 = vector.shape_cast %49 : vector<1x32x32xf32> to vector<32x32xf32>
    %cst_38 = arith.constant dense<0.000000e+00> : vector<10x32xf32>
    %51 = tpu.matmul %34, %50, %cst_38 {dimension_numbers = #tpu.dot_dimension_numbers<[1], [0], [0], [1], [0, 0, 1, 1], [], []>} : vector<10x32xf32>, vector<32x32xf32>, vector<10x32xf32> -> vector<10x32xf32>
    %c2_39 = arith.constant 2 : index
    %c0_40 = arith.constant 0 : index
    %c0_41 = arith.constant 0 : index
    %52 = vector.load %arg12[%c2_39, %c0_40, %c0_41] : memref<6x1x32xf32, #tpu.memory_space<vmem>>, vector<1x1x32xf32>
    %53 = vector.shape_cast %52 : vector<1x1x32xf32> to vector<1x32xf32>
    %54 = vector.broadcast %53 : vector<1x32xf32> to vector<10x32xf32>
    %55 = arith.addf %51, %54 : vector<10x32xf32>
    %cst_42 = arith.constant 0.000000e+00 : f32
    %56 = vector.broadcast %cst_42 : f32 to vector<10x32xf32>
    %c0_43 = arith.constant 0 : index
    %c0_44 = arith.constant 0 : index
    %c0_45 = arith.constant 0 : index
    %57 = vector.load %arg8[%c0_43, %c0_44, %c0_45] : memref<2x1x32xf32, #tpu.memory_space<vmem>>, vector<1x1x32xf32>
    %58 = vector.shape_cast %57 : vector<1x1x32xf32> to vector<1x32xf32>
    %59 = vector.broadcast %58 : vector<1x32xf32> to vector<10x32xf32>
    %60 = arith.mulf %41, %59 : vector<10x32xf32>
    %cst_46 = arith.constant dense<0.000000e+00> : vector<10x10xf32>
    %61 = tpu.matmul %60, %48, %cst_46 {dimension_numbers = #tpu.dot_dimension_numbers<[1], [1], [0], [0], [0, 0, 1, 0], [], []>} : vector<10x32xf32>, vector<10x32xf32>, vector<10x10xf32> -> vector<10x10xf32>
    %cst_47 = arith.constant 2.500000e-01 : f32
    %62 = vector.broadcast %cst_47 : f32 to vector<10x10xf32>
    %63 = arith.mulf %61, %62 : vector<10x10xf32>
    %64 = arith.addf %63, %10 : vector<10x10xf32>
    %cst_48 = arith.constant dense<0xFF800000> : vector<10xf32>
    %65 = vector.multi_reduction <maximumf>, %64, %cst_48 [1] : vector<10x10xf32> to vector<10xf32>
    %66 = vector.shape_cast %65 : vector<10xf32> to vector<10x1xf32>
    %67 = vector.broadcast %66 : vector<10x1xf32> to vector<10x10xf32>
    %68 = arith.subf %64, %67 : vector<10x10xf32>
    %69 = math.exp %68 : vector<10x10xf32>
    %cst_49 = arith.constant dense<0.000000e+00> : vector<10xf32>
    %70 = vector.multi_reduction <add>, %69, %cst_49 [1] : vector<10x10xf32> to vector<10xf32>
    %71 = vector.shape_cast %70 : vector<10xf32> to vector<10x1xf32>
    %72 = tpu.reciprocal %71 {approx = true} : vector<10x1xf32> -> vector<10x1xf32>
    %73 = vector.broadcast %72 : vector<10x1xf32> to vector<10x10xf32>
    %74 = arith.mulf %69, %73 : vector<10x10xf32>
    %75 = vector.broadcast %58 : vector<1x32xf32> to vector<10x32xf32>
    %76 = arith.mulf %55, %75 : vector<10x32xf32>
    %cst_50 = arith.constant dense<0.000000e+00> : vector<10x32xf32>
    %77 = tpu.matmul %74, %76, %cst_50 {dimension_numbers = #tpu.dot_dimension_numbers<[1], [0], [0], [1], [0, 0, 1, 1], [], []>} : vector<10x10xf32>, vector<10x32xf32>, vector<10x32xf32> -> vector<10x32xf32>
    %78 = arith.addf %56, %77 : vector<10x32xf32>
    %c1_51 = arith.constant 1 : index
    %c0_52 = arith.constant 0 : index
    %c0_53 = arith.constant 0 : index
    %79 = vector.load %arg8[%c1_51, %c0_52, %c0_53] : memref<2x1x32xf32, #tpu.memory_space<vmem>>, vector<1x1x32xf32>
    %80 = vector.shape_cast %79 : vector<1x1x32xf32> to vector<1x32xf32>
    %81 = vector.broadcast %80 : vector<1x32xf32> to vector<10x32xf32>
    %82 = arith.mulf %41, %81 : vector<10x32xf32>
    %cst_54 = arith.constant dense<0.000000e+00> : vector<10x10xf32>
    %83 = tpu.matmul %82, %48, %cst_54 {dimension_numbers = #tpu.dot_dimension_numbers<[1], [1], [0], [0], [0, 0, 1, 0], [], []>} : vector<10x32xf32>, vector<10x32xf32>, vector<10x10xf32> -> vector<10x10xf32>
    %cst_55 = arith.constant 2.500000e-01 : f32
    %84 = vector.broadcast %cst_55 : f32 to vector<10x10xf32>
    %85 = arith.mulf %83, %84 : vector<10x10xf32>
    %86 = arith.addf %85, %10 : vector<10x10xf32>
    %cst_56 = arith.constant dense<0xFF800000> : vector<10xf32>
    %87 = vector.multi_reduction <maximumf>, %86, %cst_56 [1] : vector<10x10xf32> to vector<10xf32>
    %88 = vector.shape_cast %87 : vector<10xf32> to vector<10x1xf32>
    %89 = vector.broadcast %88 : vector<10x1xf32> to vector<10x10xf32>
    %90 = arith.subf %86, %89 : vector<10x10xf32>
    %91 = math.exp %90 : vector<10x10xf32>
    %cst_57 = arith.constant dense<0.000000e+00> : vector<10xf32>
    %92 = vector.multi_reduction <add>, %91, %cst_57 [1] : vector<10x10xf32> to vector<10xf32>
    %93 = vector.shape_cast %92 : vector<10xf32> to vector<10x1xf32>
    %94 = tpu.reciprocal %93 {approx = true} : vector<10x1xf32> -> vector<10x1xf32>
    %95 = vector.broadcast %94 : vector<10x1xf32> to vector<10x10xf32>
    %96 = arith.mulf %91, %95 : vector<10x10xf32>
    %97 = vector.broadcast %80 : vector<1x32xf32> to vector<10x32xf32>
    %98 = arith.mulf %55, %97 : vector<10x32xf32>
    %cst_58 = arith.constant dense<0.000000e+00> : vector<10x32xf32>
    %99 = tpu.matmul %96, %98, %cst_58 {dimension_numbers = #tpu.dot_dimension_numbers<[1], [0], [0], [1], [0, 0, 1, 1], [], []>} : vector<10x10xf32>, vector<10x32xf32>, vector<10x32xf32> -> vector<10x32xf32>
    %100 = arith.addf %78, %99 : vector<10x32xf32>
    %c0_59 = arith.constant 0 : index
    %c0_60 = arith.constant 0 : index
    %c0_61 = arith.constant 0 : index
    %101 = vector.load %arg13[%c0_59, %c0_60, %c0_61] : memref<2x32x32xf32, #tpu.memory_space<vmem>>, vector<1x32x32xf32>
    %102 = vector.shape_cast %101 : vector<1x32x32xf32> to vector<32x32xf32>
    %cst_62 = arith.constant dense<0.000000e+00> : vector<10x32xf32>
    %103 = tpu.matmul %100, %102, %cst_62 {dimension_numbers = #tpu.dot_dimension_numbers<[1], [0], [0], [1], [0, 0, 1, 1], [], []>} : vector<10x32xf32>, vector<32x32xf32>, vector<10x32xf32> -> vector<10x32xf32>
    %104 = arith.addf %9, %103 : vector<10x32xf32>
    %c0_63 = arith.constant 0 : index
    %c0_64 = arith.constant 0 : index
    %c0_65 = arith.constant 0 : index
    %105 = vector.load %arg14[%c0_63, %c0_64, %c0_65] : memref<2x1x32xf32, #tpu.memory_space<vmem>>, vector<1x1x32xf32>
    %106 = vector.shape_cast %105 : vector<1x1x32xf32> to vector<1x32xf32>
    %107 = vector.broadcast %106 : vector<1x32xf32> to vector<10x32xf32>
    %108 = arith.addf %104, %107 : vector<10x32xf32>
    %c1_66 = arith.constant 1 : index
    %c0_67 = arith.constant 0 : index
    %c0_68 = arith.constant 0 : index
    %109 = vector.load %arg9[%c1_66, %c0_67, %c0_68] : memref<4x1x32xf32, #tpu.memory_space<vmem>>, vector<1x1x32xf32>
    %110 = vector.shape_cast %109 : vector<1x1x32xf32> to vector<1x32xf32>
    %c1_69 = arith.constant 1 : index
    %c0_70 = arith.constant 0 : index
    %c0_71 = arith.constant 0 : index
    %111 = vector.load %arg10[%c1_69, %c0_70, %c0_71] : memref<4x1x32xf32, #tpu.memory_space<vmem>>, vector<1x1x32xf32>
    %112 = vector.shape_cast %111 : vector<1x1x32xf32> to vector<1x32xf32>
    %cst_72 = arith.constant dense<0.000000e+00> : vector<10xf32>
    %113 = vector.multi_reduction <add>, %108, %cst_72 [1] : vector<10x32xf32> to vector<10xf32>
    %114 = vector.shape_cast %113 : vector<10xf32> to vector<10x1xf32>
    %cst_73 = arith.constant 3.200000e+01 : f32
    %115 = vector.broadcast %cst_73 : f32 to vector<10x1xf32>
    %116 = arith.divf %114, %115 : vector<10x1xf32>
    %117 = vector.broadcast %116 : vector<10x1xf32> to vector<10x32xf32>
    %118 = arith.subf %108, %117 : vector<10x32xf32>
    %119 = arith.mulf %118, %118 : vector<10x32xf32>
    %cst_74 = arith.constant dense<0.000000e+00> : vector<10xf32>
    %120 = vector.multi_reduction <add>, %119, %cst_74 [1] : vector<10x32xf32> to vector<10xf32>
    %121 = vector.shape_cast %120 : vector<10xf32> to vector<10x1xf32>
    %cst_75 = arith.constant 3.200000e+01 : f32
    %122 = vector.broadcast %cst_75 : f32 to vector<10x1xf32>
    %123 = arith.divf %121, %122 : vector<10x1xf32>
    %cst_76 = arith.constant 9.99999996E-13 : f32
    %124 = vector.broadcast %cst_76 : f32 to vector<10x1xf32>
    %125 = arith.addf %123, %124 : vector<10x1xf32>
    %126 = math.rsqrt %125 : vector<10x1xf32>
    %127 = vector.broadcast %126 : vector<10x1xf32> to vector<10x32xf32>
    %128 = arith.mulf %118, %127 : vector<10x32xf32>
    %129 = vector.broadcast %110 : vector<1x32xf32> to vector<10x32xf32>
    %130 = arith.mulf %128, %129 : vector<10x32xf32>
    %131 = vector.broadcast %112 : vector<1x32xf32> to vector<10x32xf32>
    %132 = arith.addf %130, %131 : vector<10x32xf32>
    %c0_77 = arith.constant 0 : index
    %c0_78 = arith.constant 0 : index
    %c0_79 = arith.constant 0 : index
    %133 = vector.load %arg15[%c0_77, %c0_78, %c0_79] : memref<2x32x128xf32, #tpu.memory_space<vmem>>, vector<1x32x128xf32>
    %134 = vector.shape_cast %133 : vector<1x32x128xf32> to vector<32x128xf32>
    %cst_80 = arith.constant dense<0.000000e+00> : vector<10x128xf32>
    %135 = tpu.matmul %132, %134, %cst_80 {dimension_numbers = #tpu.dot_dimension_numbers<[1], [0], [0], [1], [0, 0, 1, 1], [], []>} : vector<10x32xf32>, vector<32x128xf32>, vector<10x128xf32> -> vector<10x128xf32>
    %c0_81 = arith.constant 0 : index
    %c0_82 = arith.constant 0 : index
    %c0_83 = arith.constant 0 : index
    %136 = vector.load %arg16[%c0_81, %c0_82, %c0_83] : memref<2x1x128xf32, #tpu.memory_space<vmem>>, vector<1x1x128xf32>
    %137 = vector.shape_cast %136 : vector<1x1x128xf32> to vector<1x128xf32>
    %138 = vector.broadcast %137 : vector<1x128xf32> to vector<10x128xf32>
    %139 = arith.addf %135, %138 : vector<10x128xf32>
    %cst_84 = arith.constant 5.000000e-01 : f32
    %140 = vector.broadcast %cst_84 : f32 to vector<10x128xf32>
    %141 = arith.mulf %140, %139 : vector<10x128xf32>
    %cst_85 = arith.constant 4.471500e-02 : f32
    %142 = vector.broadcast %cst_85 : f32 to vector<10x128xf32>
    %143 = arith.mulf %142, %139 : vector<10x128xf32>
    %144 = arith.mulf %143, %139 : vector<10x128xf32>
    %145 = arith.mulf %144, %139 : vector<10x128xf32>
    %146 = arith.addf %139, %145 : vector<10x128xf32>
    %cst_86 = arith.constant 0.797884583 : f32
    %147 = vector.broadcast %cst_86 : f32 to vector<10x128xf32>
    %148 = arith.mulf %147, %146 : vector<10x128xf32>
    %149 = math.tanh %148 : vector<10x128xf32>
    %cst_87 = arith.constant 1.000000e+00 : f32
    %150 = vector.broadcast %cst_87 : f32 to vector<10x128xf32>
    %151 = arith.addf %150, %149 : vector<10x128xf32>
    %152 = arith.mulf %141, %151 : vector<10x128xf32>
    %c0_88 = arith.constant 0 : index
    %c0_89 = arith.constant 0 : index
    %c0_90 = arith.constant 0 : index
    %153 = vector.load %arg17[%c0_88, %c0_89, %c0_90] : memref<2x128x32xf32, #tpu.memory_space<vmem>>, vector<1x128x32xf32>
    %154 = vector.shape_cast %153 : vector<1x128x32xf32> to vector<128x32xf32>
    %cst_91 = arith.constant dense<0.000000e+00> : vector<10x32xf32>
    %155 = tpu.matmul %152, %154, %cst_91 {dimension_numbers = #tpu.dot_dimension_numbers<[1], [0], [0], [1], [0, 0, 1, 1], [], []>} : vector<10x128xf32>, vector<128x32xf32>, vector<10x32xf32> -> vector<10x32xf32>
    %156 = arith.addf %108, %155 : vector<10x32xf32>
    %c0_92 = arith.constant 0 : index
    %c0_93 = arith.constant 0 : index
    %c0_94 = arith.constant 0 : index
    %157 = vector.load %arg18[%c0_92, %c0_93, %c0_94] : memref<2x1x32xf32, #tpu.memory_space<vmem>>, vector<1x1x32xf32>
    %158 = vector.shape_cast %157 : vector<1x1x32xf32> to vector<1x32xf32>
    %159 = vector.broadcast %158 : vector<1x32xf32> to vector<10x32xf32>
    %160 = arith.addf %156, %159 : vector<10x32xf32>
    %c2_95 = arith.constant 2 : index
    %c0_96 = arith.constant 0 : index
    %c0_97 = arith.constant 0 : index
    %161 = vector.load %arg9[%c2_95, %c0_96, %c0_97] : memref<4x1x32xf32, #tpu.memory_space<vmem>>, vector<1x1x32xf32>
    %162 = vector.shape_cast %161 : vector<1x1x32xf32> to vector<1x32xf32>
    %c2_98 = arith.constant 2 : index
    %c0_99 = arith.constant 0 : index
    %c0_100 = arith.constant 0 : index
    %163 = vector.load %arg10[%c2_98, %c0_99, %c0_100] : memref<4x1x32xf32, #tpu.memory_space<vmem>>, vector<1x1x32xf32>
    %164 = vector.shape_cast %163 : vector<1x1x32xf32> to vector<1x32xf32>
    %cst_101 = arith.constant dense<0.000000e+00> : vector<10xf32>
    %165 = vector.multi_reduction <add>, %160, %cst_101 [1] : vector<10x32xf32> to vector<10xf32>
    %166 = vector.shape_cast %165 : vector<10xf32> to vector<10x1xf32>
    %cst_102 = arith.constant 3.200000e+01 : f32
    %167 = vector.broadcast %cst_102 : f32 to vector<10x1xf32>
    %168 = arith.divf %166, %167 : vector<10x1xf32>
    %169 = vector.broadcast %168 : vector<10x1xf32> to vector<10x32xf32>
    %170 = arith.subf %160, %169 : vector<10x32xf32>
    %171 = arith.mulf %170, %170 : vector<10x32xf32>
    %cst_103 = arith.constant dense<0.000000e+00> : vector<10xf32>
    %172 = vector.multi_reduction <add>, %171, %cst_103 [1] : vector<10x32xf32> to vector<10xf32>
    %173 = vector.shape_cast %172 : vector<10xf32> to vector<10x1xf32>
    %cst_104 = arith.constant 3.200000e+01 : f32
    %174 = vector.broadcast %cst_104 : f32 to vector<10x1xf32>
    %175 = arith.divf %173, %174 : vector<10x1xf32>
    %cst_105 = arith.constant 9.99999996E-13 : f32
    %176 = vector.broadcast %cst_105 : f32 to vector<10x1xf32>
    %177 = arith.addf %175, %176 : vector<10x1xf32>
    %178 = math.rsqrt %177 : vector<10x1xf32>
    %179 = vector.broadcast %178 : vector<10x1xf32> to vector<10x32xf32>
    %180 = arith.mulf %170, %179 : vector<10x32xf32>
    %181 = vector.broadcast %162 : vector<1x32xf32> to vector<10x32xf32>
    %182 = arith.mulf %180, %181 : vector<10x32xf32>
    %183 = vector.broadcast %164 : vector<1x32xf32> to vector<10x32xf32>
    %184 = arith.addf %182, %183 : vector<10x32xf32>
    %c3 = arith.constant 3 : index
    %c0_106 = arith.constant 0 : index
    %c0_107 = arith.constant 0 : index
    %185 = vector.load %arg11[%c3, %c0_106, %c0_107] : memref<6x32x32xf32, #tpu.memory_space<vmem>>, vector<1x32x32xf32>
    %186 = vector.shape_cast %185 : vector<1x32x32xf32> to vector<32x32xf32>
    %cst_108 = arith.constant dense<0.000000e+00> : vector<10x32xf32>
    %187 = tpu.matmul %184, %186, %cst_108 {dimension_numbers = #tpu.dot_dimension_numbers<[1], [0], [0], [1], [0, 0, 1, 1], [], []>} : vector<10x32xf32>, vector<32x32xf32>, vector<10x32xf32> -> vector<10x32xf32>
    %c3_109 = arith.constant 3 : index
    %c0_110 = arith.constant 0 : index
    %c0_111 = arith.constant 0 : index
    %188 = vector.load %arg12[%c3_109, %c0_110, %c0_111] : memref<6x1x32xf32, #tpu.memory_space<vmem>>, vector<1x1x32xf32>
    %189 = vector.shape_cast %188 : vector<1x1x32xf32> to vector<1x32xf32>
    %190 = vector.broadcast %189 : vector<1x32xf32> to vector<10x32xf32>
    %191 = arith.addf %187, %190 : vector<10x32xf32>
    %c4 = arith.constant 4 : index
    %c0_112 = arith.constant 0 : index
    %c0_113 = arith.constant 0 : index
    %192 = vector.load %arg11[%c4, %c0_112, %c0_113] : memref<6x32x32xf32, #tpu.memory_space<vmem>>, vector<1x32x32xf32>
    %193 = vector.shape_cast %192 : vector<1x32x32xf32> to vector<32x32xf32>
    %cst_114 = arith.constant dense<0.000000e+00> : vector<10x32xf32>
    %194 = tpu.matmul %184, %193, %cst_114 {dimension_numbers = #tpu.dot_dimension_numbers<[1], [0], [0], [1], [0, 0, 1, 1], [], []>} : vector<10x32xf32>, vector<32x32xf32>, vector<10x32xf32> -> vector<10x32xf32>
    %c4_115 = arith.constant 4 : index
    %c0_116 = arith.constant 0 : index
    %c0_117 = arith.constant 0 : index
    %195 = vector.load %arg12[%c4_115, %c0_116, %c0_117] : memref<6x1x32xf32, #tpu.memory_space<vmem>>, vector<1x1x32xf32>
    %196 = vector.shape_cast %195 : vector<1x1x32xf32> to vector<1x32xf32>
    %197 = vector.broadcast %196 : vector<1x32xf32> to vector<10x32xf32>
    %198 = arith.addf %194, %197 : vector<10x32xf32>
    %c5 = arith.constant 5 : index
    %c0_118 = arith.constant 0 : index
    %c0_119 = arith.constant 0 : index
    %199 = vector.load %arg11[%c5, %c0_118, %c0_119] : memref<6x32x32xf32, #tpu.memory_space<vmem>>, vector<1x32x32xf32>
    %200 = vector.shape_cast %199 : vector<1x32x32xf32> to vector<32x32xf32>
    %cst_120 = arith.constant dense<0.000000e+00> : vector<10x32xf32>
    %201 = tpu.matmul %184, %200, %cst_120 {dimension_numbers = #tpu.dot_dimension_numbers<[1], [0], [0], [1], [0, 0, 1, 1], [], []>} : vector<10x32xf32>, vector<32x32xf32>, vector<10x32xf32> -> vector<10x32xf32>
    %c5_121 = arith.constant 5 : index
    %c0_122 = arith.constant 0 : index
    %c0_123 = arith.constant 0 : index
    %202 = vector.load %arg12[%c5_121, %c0_122, %c0_123] : memref<6x1x32xf32, #tpu.memory_space<vmem>>, vector<1x1x32xf32>
    %203 = vector.shape_cast %202 : vector<1x1x32xf32> to vector<1x32xf32>
    %204 = vector.broadcast %203 : vector<1x32xf32> to vector<10x32xf32>
    %205 = arith.addf %201, %204 : vector<10x32xf32>
    %cst_124 = arith.constant 0.000000e+00 : f32
    %206 = vector.broadcast %cst_124 : f32 to vector<10x32xf32>
    %c0_125 = arith.constant 0 : index
    %c0_126 = arith.constant 0 : index
    %c0_127 = arith.constant 0 : index
    %207 = vector.load %arg8[%c0_125, %c0_126, %c0_127] : memref<2x1x32xf32, #tpu.memory_space<vmem>>, vector<1x1x32xf32>
    %208 = vector.shape_cast %207 : vector<1x1x32xf32> to vector<1x32xf32>
    %209 = vector.broadcast %208 : vector<1x32xf32> to vector<10x32xf32>
    %210 = arith.mulf %191, %209 : vector<10x32xf32>
    %cst_128 = arith.constant dense<0.000000e+00> : vector<10x10xf32>
    %211 = tpu.matmul %210, %198, %cst_128 {dimension_numbers = #tpu.dot_dimension_numbers<[1], [1], [0], [0], [0, 0, 1, 0], [], []>} : vector<10x32xf32>, vector<10x32xf32>, vector<10x10xf32> -> vector<10x10xf32>
    %cst_129 = arith.constant 2.500000e-01 : f32
    %212 = vector.broadcast %cst_129 : f32 to vector<10x10xf32>
    %213 = arith.mulf %211, %212 : vector<10x10xf32>
    %214 = arith.addf %213, %10 : vector<10x10xf32>
    %cst_130 = arith.constant dense<0xFF800000> : vector<10xf32>
    %215 = vector.multi_reduction <maximumf>, %214, %cst_130 [1] : vector<10x10xf32> to vector<10xf32>
    %216 = vector.shape_cast %215 : vector<10xf32> to vector<10x1xf32>
    %217 = vector.broadcast %216 : vector<10x1xf32> to vector<10x10xf32>
    %218 = arith.subf %214, %217 : vector<10x10xf32>
    %219 = math.exp %218 : vector<10x10xf32>
    %cst_131 = arith.constant dense<0.000000e+00> : vector<10xf32>
    %220 = vector.multi_reduction <add>, %219, %cst_131 [1] : vector<10x10xf32> to vector<10xf32>
    %221 = vector.shape_cast %220 : vector<10xf32> to vector<10x1xf32>
    %222 = tpu.reciprocal %221 {approx = true} : vector<10x1xf32> -> vector<10x1xf32>
    %223 = vector.broadcast %222 : vector<10x1xf32> to vector<10x10xf32>
    %224 = arith.mulf %219, %223 : vector<10x10xf32>
    %225 = vector.broadcast %208 : vector<1x32xf32> to vector<10x32xf32>
    %226 = arith.mulf %205, %225 : vector<10x32xf32>
    %cst_132 = arith.constant dense<0.000000e+00> : vector<10x32xf32>
    %227 = tpu.matmul %224, %226, %cst_132 {dimension_numbers = #tpu.dot_dimension_numbers<[1], [0], [0], [1], [0, 0, 1, 1], [], []>} : vector<10x10xf32>, vector<10x32xf32>, vector<10x32xf32> -> vector<10x32xf32>
    %228 = arith.addf %206, %227 : vector<10x32xf32>
    %c1_133 = arith.constant 1 : index
    %c0_134 = arith.constant 0 : index
    %c0_135 = arith.constant 0 : index
    %229 = vector.load %arg8[%c1_133, %c0_134, %c0_135] : memref<2x1x32xf32, #tpu.memory_space<vmem>>, vector<1x1x32xf32>
    %230 = vector.shape_cast %229 : vector<1x1x32xf32> to vector<1x32xf32>
    %231 = vector.broadcast %230 : vector<1x32xf32> to vector<10x32xf32>
    %232 = arith.mulf %191, %231 : vector<10x32xf32>
    %cst_136 = arith.constant dense<0.000000e+00> : vector<10x10xf32>
    %233 = tpu.matmul %232, %198, %cst_136 {dimension_numbers = #tpu.dot_dimension_numbers<[1], [1], [0], [0], [0, 0, 1, 0], [], []>} : vector<10x32xf32>, vector<10x32xf32>, vector<10x10xf32> -> vector<10x10xf32>
    %cst_137 = arith.constant 2.500000e-01 : f32
    %234 = vector.broadcast %cst_137 : f32 to vector<10x10xf32>
    %235 = arith.mulf %233, %234 : vector<10x10xf32>
    %236 = arith.addf %235, %10 : vector<10x10xf32>
    %cst_138 = arith.constant dense<0xFF800000> : vector<10xf32>
    %237 = vector.multi_reduction <maximumf>, %236, %cst_138 [1] : vector<10x10xf32> to vector<10xf32>
    %238 = vector.shape_cast %237 : vector<10xf32> to vector<10x1xf32>
    %239 = vector.broadcast %238 : vector<10x1xf32> to vector<10x10xf32>
    %240 = arith.subf %236, %239 : vector<10x10xf32>
    %241 = math.exp %240 : vector<10x10xf32>
    %cst_139 = arith.constant dense<0.000000e+00> : vector<10xf32>
    %242 = vector.multi_reduction <add>, %241, %cst_139 [1] : vector<10x10xf32> to vector<10xf32>
    %243 = vector.shape_cast %242 : vector<10xf32> to vector<10x1xf32>
    %244 = tpu.reciprocal %243 {approx = true} : vector<10x1xf32> -> vector<10x1xf32>
    %245 = vector.broadcast %244 : vector<10x1xf32> to vector<10x10xf32>
    %246 = arith.mulf %241, %245 : vector<10x10xf32>
    %247 = vector.broadcast %230 : vector<1x32xf32> to vector<10x32xf32>
    %248 = arith.mulf %205, %247 : vector<10x32xf32>
    %cst_140 = arith.constant dense<0.000000e+00> : vector<10x32xf32>
    %249 = tpu.matmul %246, %248, %cst_140 {dimension_numbers = #tpu.dot_dimension_numbers<[1], [0], [0], [1], [0, 0, 1, 1], [], []>} : vector<10x10xf32>, vector<10x32xf32>, vector<10x32xf32> -> vector<10x32xf32>
    %250 = arith.addf %228, %249 : vector<10x32xf32>
    %c1_141 = arith.constant 1 : index
    %c0_142 = arith.constant 0 : index
    %c0_143 = arith.constant 0 : index
    %251 = vector.load %arg13[%c1_141, %c0_142, %c0_143] : memref<2x32x32xf32, #tpu.memory_space<vmem>>, vector<1x32x32xf32>
    %252 = vector.shape_cast %251 : vector<1x32x32xf32> to vector<32x32xf32>
    %cst_144 = arith.constant dense<0.000000e+00> : vector<10x32xf32>
    %253 = tpu.matmul %250, %252, %cst_144 {dimension_numbers = #tpu.dot_dimension_numbers<[1], [0], [0], [1], [0, 0, 1, 1], [], []>} : vector<10x32xf32>, vector<32x32xf32>, vector<10x32xf32> -> vector<10x32xf32>
    %254 = arith.addf %160, %253 : vector<10x32xf32>
    %c1_145 = arith.constant 1 : index
    %c0_146 = arith.constant 0 : index
    %c0_147 = arith.constant 0 : index
    %255 = vector.load %arg14[%c1_145, %c0_146, %c0_147] : memref<2x1x32xf32, #tpu.memory_space<vmem>>, vector<1x1x32xf32>
    %256 = vector.shape_cast %255 : vector<1x1x32xf32> to vector<1x32xf32>
    %257 = vector.broadcast %256 : vector<1x32xf32> to vector<10x32xf32>
    %258 = arith.addf %254, %257 : vector<10x32xf32>
    %c3_148 = arith.constant 3 : index
    %c0_149 = arith.constant 0 : index
    %c0_150 = arith.constant 0 : index
    %259 = vector.load %arg9[%c3_148, %c0_149, %c0_150] : memref<4x1x32xf32, #tpu.memory_space<vmem>>, vector<1x1x32xf32>
    %260 = vector.shape_cast %259 : vector<1x1x32xf32> to vector<1x32xf32>
    %c3_151 = arith.constant 3 : index
    %c0_152 = arith.constant 0 : index
    %c0_153 = arith.constant 0 : index
    %261 = vector.load %arg10[%c3_151, %c0_152, %c0_153] : memref<4x1x32xf32, #tpu.memory_space<vmem>>, vector<1x1x32xf32>
    %262 = vector.shape_cast %261 : vector<1x1x32xf32> to vector<1x32xf32>
    %cst_154 = arith.constant dense<0.000000e+00> : vector<10xf32>
    %263 = vector.multi_reduction <add>, %258, %cst_154 [1] : vector<10x32xf32> to vector<10xf32>
    %264 = vector.shape_cast %263 : vector<10xf32> to vector<10x1xf32>
    %cst_155 = arith.constant 3.200000e+01 : f32
    %265 = vector.broadcast %cst_155 : f32 to vector<10x1xf32>
    %266 = arith.divf %264, %265 : vector<10x1xf32>
    %267 = vector.broadcast %266 : vector<10x1xf32> to vector<10x32xf32>
    %268 = arith.subf %258, %267 : vector<10x32xf32>
    %269 = arith.mulf %268, %268 : vector<10x32xf32>
    %cst_156 = arith.constant dense<0.000000e+00> : vector<10xf32>
    %270 = vector.multi_reduction <add>, %269, %cst_156 [1] : vector<10x32xf32> to vector<10xf32>
    %271 = vector.shape_cast %270 : vector<10xf32> to vector<10x1xf32>
    %cst_157 = arith.constant 3.200000e+01 : f32
    %272 = vector.broadcast %cst_157 : f32 to vector<10x1xf32>
    %273 = arith.divf %271, %272 : vector<10x1xf32>
    %cst_158 = arith.constant 9.99999996E-13 : f32
    %274 = vector.broadcast %cst_158 : f32 to vector<10x1xf32>
    %275 = arith.addf %273, %274 : vector<10x1xf32>
    %276 = math.rsqrt %275 : vector<10x1xf32>
    %277 = vector.broadcast %276 : vector<10x1xf32> to vector<10x32xf32>
    %278 = arith.mulf %268, %277 : vector<10x32xf32>
    %279 = vector.broadcast %260 : vector<1x32xf32> to vector<10x32xf32>
    %280 = arith.mulf %278, %279 : vector<10x32xf32>
    %281 = vector.broadcast %262 : vector<1x32xf32> to vector<10x32xf32>
    %282 = arith.addf %280, %281 : vector<10x32xf32>
    %c1_159 = arith.constant 1 : index
    %c0_160 = arith.constant 0 : index
    %c0_161 = arith.constant 0 : index
    %283 = vector.load %arg15[%c1_159, %c0_160, %c0_161] : memref<2x32x128xf32, #tpu.memory_space<vmem>>, vector<1x32x128xf32>
    %284 = vector.shape_cast %283 : vector<1x32x128xf32> to vector<32x128xf32>
    %cst_162 = arith.constant dense<0.000000e+00> : vector<10x128xf32>
    %285 = tpu.matmul %282, %284, %cst_162 {dimension_numbers = #tpu.dot_dimension_numbers<[1], [0], [0], [1], [0, 0, 1, 1], [], []>} : vector<10x32xf32>, vector<32x128xf32>, vector<10x128xf32> -> vector<10x128xf32>
    %c1_163 = arith.constant 1 : index
    %c0_164 = arith.constant 0 : index
    %c0_165 = arith.constant 0 : index
    %286 = vector.load %arg16[%c1_163, %c0_164, %c0_165] : memref<2x1x128xf32, #tpu.memory_space<vmem>>, vector<1x1x128xf32>
    %287 = vector.shape_cast %286 : vector<1x1x128xf32> to vector<1x128xf32>
    %288 = vector.broadcast %287 : vector<1x128xf32> to vector<10x128xf32>
    %289 = arith.addf %285, %288 : vector<10x128xf32>
    %cst_166 = arith.constant 5.000000e-01 : f32
    %290 = vector.broadcast %cst_166 : f32 to vector<10x128xf32>
    %291 = arith.mulf %290, %289 : vector<10x128xf32>
    %cst_167 = arith.constant 4.471500e-02 : f32
    %292 = vector.broadcast %cst_167 : f32 to vector<10x128xf32>
    %293 = arith.mulf %292, %289 : vector<10x128xf32>
    %294 = arith.mulf %293, %289 : vector<10x128xf32>
    %295 = arith.mulf %294, %289 : vector<10x128xf32>
    %296 = arith.addf %289, %295 : vector<10x128xf32>
    %cst_168 = arith.constant 0.797884583 : f32
    %297 = vector.broadcast %cst_168 : f32 to vector<10x128xf32>
    %298 = arith.mulf %297, %296 : vector<10x128xf32>
    %299 = math.tanh %298 : vector<10x128xf32>
    %cst_169 = arith.constant 1.000000e+00 : f32
    %300 = vector.broadcast %cst_169 : f32 to vector<10x128xf32>
    %301 = arith.addf %300, %299 : vector<10x128xf32>
    %302 = arith.mulf %291, %301 : vector<10x128xf32>
    %c1_170 = arith.constant 1 : index
    %c0_171 = arith.constant 0 : index
    %c0_172 = arith.constant 0 : index
    %303 = vector.load %arg17[%c1_170, %c0_171, %c0_172] : memref<2x128x32xf32, #tpu.memory_space<vmem>>, vector<1x128x32xf32>
    %304 = vector.shape_cast %303 : vector<1x128x32xf32> to vector<128x32xf32>
    %cst_173 = arith.constant dense<0.000000e+00> : vector<10x32xf32>
    %305 = tpu.matmul %302, %304, %cst_173 {dimension_numbers = #tpu.dot_dimension_numbers<[1], [0], [0], [1], [0, 0, 1, 1], [], []>} : vector<10x128xf32>, vector<128x32xf32>, vector<10x32xf32> -> vector<10x32xf32>
    %306 = arith.addf %258, %305 : vector<10x32xf32>
    %c1_174 = arith.constant 1 : index
    %c0_175 = arith.constant 0 : index
    %c0_176 = arith.constant 0 : index
    %307 = vector.load %arg18[%c1_174, %c0_175, %c0_176] : memref<2x1x32xf32, #tpu.memory_space<vmem>>, vector<1x1x32xf32>
    %308 = vector.shape_cast %307 : vector<1x1x32xf32> to vector<1x32xf32>
    %309 = vector.broadcast %308 : vector<1x32xf32> to vector<10x32xf32>
    %310 = arith.addf %306, %309 : vector<10x32xf32>
    %c0_177 = arith.constant 0 : index
    %c0_178 = arith.constant 0 : index
    %311 = vector.load %arg19[%c0_177, %c0_178] : memref<1x32xf32, #tpu.memory_space<vmem>>, vector<1x32xf32>
    %c0_179 = arith.constant 0 : index
    %c0_180 = arith.constant 0 : index
    %312 = vector.load %arg20[%c0_179, %c0_180] : memref<1x32xf32, #tpu.memory_space<vmem>>, vector<1x32xf32>
    %cst_181 = arith.constant dense<0.000000e+00> : vector<10xf32>
    %313 = vector.multi_reduction <add>, %310, %cst_181 [1] : vector<10x32xf32> to vector<10xf32>
    %314 = vector.shape_cast %313 : vector<10xf32> to vector<10x1xf32>
    %cst_182 = arith.constant 3.200000e+01 : f32
    %315 = vector.broadcast %cst_182 : f32 to vector<10x1xf32>
    %316 = arith.divf %314, %315 : vector<10x1xf32>
    %317 = vector.broadcast %316 : vector<10x1xf32> to vector<10x32xf32>
    %318 = arith.subf %310, %317 : vector<10x32xf32>
    %319 = arith.mulf %318, %318 : vector<10x32xf32>
    %cst_183 = arith.constant dense<0.000000e+00> : vector<10xf32>
    %320 = vector.multi_reduction <add>, %319, %cst_183 [1] : vector<10x32xf32> to vector<10xf32>
    %321 = vector.shape_cast %320 : vector<10xf32> to vector<10x1xf32>
    %cst_184 = arith.constant 3.200000e+01 : f32
    %322 = vector.broadcast %cst_184 : f32 to vector<10x1xf32>
    %323 = arith.divf %321, %322 : vector<10x1xf32>
    %cst_185 = arith.constant 9.99999996E-13 : f32
    %324 = vector.broadcast %cst_185 : f32 to vector<10x1xf32>
    %325 = arith.addf %323, %324 : vector<10x1xf32>
    %326 = math.rsqrt %325 : vector<10x1xf32>
    %327 = vector.broadcast %326 : vector<10x1xf32> to vector<10x32xf32>
    %328 = arith.mulf %318, %327 : vector<10x32xf32>
    %329 = vector.broadcast %311 : vector<1x32xf32> to vector<10x32xf32>
    %330 = arith.mulf %328, %329 : vector<10x32xf32>
    %331 = vector.broadcast %312 : vector<1x32xf32> to vector<10x32xf32>
    %332 = arith.addf %330, %331 : vector<10x32xf32>
    %c0_186 = arith.constant 0 : index
    %c0_187 = arith.constant 0 : index
    %333 = vector.load %arg6[%c0_186, %c0_187] : memref<8x10xf32, #tpu.memory_space<vmem>>, vector<8x10xf32>
    %cst_188 = arith.constant dense<0.000000e+00> : vector<8x32xf32>
    %334 = tpu.matmul %333, %332, %cst_188 {dimension_numbers = #tpu.dot_dimension_numbers<[1], [0], [0], [1], [0, 0, 1, 1], [], []>} : vector<8x10xf32>, vector<10x32xf32>, vector<8x32xf32> -> vector<8x32xf32>
    %cst_189 = arith.constant 0.000000e+00 : f32
    %335 = vector.broadcast %cst_189 : f32 to vector<8x32xf32>
    %c0_190 = arith.constant 0 : index
    %c0_191 = arith.constant 0 : index
    %c0_192 = arith.constant 0 : index
    %336 = vector.load %arg21[%c0_190, %c0_191, %c0_192] : memref<9x8x8xf32, #tpu.memory_space<vmem>>, vector<1x8x8xf32>
    %337 = vector.shape_cast %336 : vector<1x8x8xf32> to vector<8x8xf32>
    %cst_193 = arith.constant dense<0.000000e+00> : vector<8x32xf32>
    %338 = tpu.matmul %337, %334, %cst_193 {dimension_numbers = #tpu.dot_dimension_numbers<[1], [0], [0], [1], [0, 0, 1, 1], [], []>} : vector<8x8xf32>, vector<8x32xf32>, vector<8x32xf32> -> vector<8x32xf32>
    %c0_194 = arith.constant 0 : index
    %c0_195 = arith.constant 0 : index
    %c0_196 = arith.constant 0 : index
    %339 = vector.load %arg22[%c0_194, %c0_195, %c0_196] : memref<9x32x32xf32, #tpu.memory_space<vmem>>, vector<1x32x32xf32>
    %340 = vector.shape_cast %339 : vector<1x32x32xf32> to vector<32x32xf32>
    %cst_197 = arith.constant dense<0.000000e+00> : vector<8x32xf32>
    %341 = tpu.matmul %338, %340, %cst_197 {dimension_numbers = #tpu.dot_dimension_numbers<[1], [0], [0], [1], [0, 0, 1, 1], [], []>} : vector<8x32xf32>, vector<32x32xf32>, vector<8x32xf32> -> vector<8x32xf32>
    %342 = arith.addf %335, %341 : vector<8x32xf32>
    %c1_198 = arith.constant 1 : index
    %c0_199 = arith.constant 0 : index
    %c0_200 = arith.constant 0 : index
    %343 = vector.load %arg21[%c1_198, %c0_199, %c0_200] : memref<9x8x8xf32, #tpu.memory_space<vmem>>, vector<1x8x8xf32>
    %344 = vector.shape_cast %343 : vector<1x8x8xf32> to vector<8x8xf32>
    %cst_201 = arith.constant dense<0.000000e+00> : vector<8x32xf32>
    %345 = tpu.matmul %344, %334, %cst_201 {dimension_numbers = #tpu.dot_dimension_numbers<[1], [0], [0], [1], [0, 0, 1, 1], [], []>} : vector<8x8xf32>, vector<8x32xf32>, vector<8x32xf32> -> vector<8x32xf32>
    %c1_202 = arith.constant 1 : index
    %c0_203 = arith.constant 0 : index
    %c0_204 = arith.constant 0 : index
    %346 = vector.load %arg22[%c1_202, %c0_203, %c0_204] : memref<9x32x32xf32, #tpu.memory_space<vmem>>, vector<1x32x32xf32>
    %347 = vector.shape_cast %346 : vector<1x32x32xf32> to vector<32x32xf32>
    %cst_205 = arith.constant dense<0.000000e+00> : vector<8x32xf32>
    %348 = tpu.matmul %345, %347, %cst_205 {dimension_numbers = #tpu.dot_dimension_numbers<[1], [0], [0], [1], [0, 0, 1, 1], [], []>} : vector<8x32xf32>, vector<32x32xf32>, vector<8x32xf32> -> vector<8x32xf32>
    %349 = arith.addf %342, %348 : vector<8x32xf32>
    %c2_206 = arith.constant 2 : index
    %c0_207 = arith.constant 0 : index
    %c0_208 = arith.constant 0 : index
    %350 = vector.load %arg21[%c2_206, %c0_207, %c0_208] : memref<9x8x8xf32, #tpu.memory_space<vmem>>, vector<1x8x8xf32>
    %351 = vector.shape_cast %350 : vector<1x8x8xf32> to vector<8x8xf32>
    %cst_209 = arith.constant dense<0.000000e+00> : vector<8x32xf32>
    %352 = tpu.matmul %351, %334, %cst_209 {dimension_numbers = #tpu.dot_dimension_numbers<[1], [0], [0], [1], [0, 0, 1, 1], [], []>} : vector<8x8xf32>, vector<8x32xf32>, vector<8x32xf32> -> vector<8x32xf32>
    %c2_210 = arith.constant 2 : index
    %c0_211 = arith.constant 0 : index
    %c0_212 = arith.constant 0 : index
    %353 = vector.load %arg22[%c2_210, %c0_211, %c0_212] : memref<9x32x32xf32, #tpu.memory_space<vmem>>, vector<1x32x32xf32>
    %354 = vector.shape_cast %353 : vector<1x32x32xf32> to vector<32x32xf32>
    %cst_213 = arith.constant dense<0.000000e+00> : vector<8x32xf32>
    %355 = tpu.matmul %352, %354, %cst_213 {dimension_numbers = #tpu.dot_dimension_numbers<[1], [0], [0], [1], [0, 0, 1, 1], [], []>} : vector<8x32xf32>, vector<32x32xf32>, vector<8x32xf32> -> vector<8x32xf32>
    %356 = arith.addf %349, %355 : vector<8x32xf32>
    %c3_214 = arith.constant 3 : index
    %c0_215 = arith.constant 0 : index
    %c0_216 = arith.constant 0 : index
    %357 = vector.load %arg21[%c3_214, %c0_215, %c0_216] : memref<9x8x8xf32, #tpu.memory_space<vmem>>, vector<1x8x8xf32>
    %358 = vector.shape_cast %357 : vector<1x8x8xf32> to vector<8x8xf32>
    %cst_217 = arith.constant dense<0.000000e+00> : vector<8x32xf32>
    %359 = tpu.matmul %358, %334, %cst_217 {dimension_numbers = #tpu.dot_dimension_numbers<[1], [0], [0], [1], [0, 0, 1, 1], [], []>} : vector<8x8xf32>, vector<8x32xf32>, vector<8x32xf32> -> vector<8x32xf32>
    %c3_218 = arith.constant 3 : index
    %c0_219 = arith.constant 0 : index
    %c0_220 = arith.constant 0 : index
    %360 = vector.load %arg22[%c3_218, %c0_219, %c0_220] : memref<9x32x32xf32, #tpu.memory_space<vmem>>, vector<1x32x32xf32>
    %361 = vector.shape_cast %360 : vector<1x32x32xf32> to vector<32x32xf32>
    %cst_221 = arith.constant dense<0.000000e+00> : vector<8x32xf32>
    %362 = tpu.matmul %359, %361, %cst_221 {dimension_numbers = #tpu.dot_dimension_numbers<[1], [0], [0], [1], [0, 0, 1, 1], [], []>} : vector<8x32xf32>, vector<32x32xf32>, vector<8x32xf32> -> vector<8x32xf32>
    %363 = arith.addf %356, %362 : vector<8x32xf32>
    %c4_222 = arith.constant 4 : index
    %c0_223 = arith.constant 0 : index
    %c0_224 = arith.constant 0 : index
    %364 = vector.load %arg21[%c4_222, %c0_223, %c0_224] : memref<9x8x8xf32, #tpu.memory_space<vmem>>, vector<1x8x8xf32>
    %365 = vector.shape_cast %364 : vector<1x8x8xf32> to vector<8x8xf32>
    %cst_225 = arith.constant dense<0.000000e+00> : vector<8x32xf32>
    %366 = tpu.matmul %365, %334, %cst_225 {dimension_numbers = #tpu.dot_dimension_numbers<[1], [0], [0], [1], [0, 0, 1, 1], [], []>} : vector<8x8xf32>, vector<8x32xf32>, vector<8x32xf32> -> vector<8x32xf32>
    %c4_226 = arith.constant 4 : index
    %c0_227 = arith.constant 0 : index
    %c0_228 = arith.constant 0 : index
    %367 = vector.load %arg22[%c4_226, %c0_227, %c0_228] : memref<9x32x32xf32, #tpu.memory_space<vmem>>, vector<1x32x32xf32>
    %368 = vector.shape_cast %367 : vector<1x32x32xf32> to vector<32x32xf32>
    %cst_229 = arith.constant dense<0.000000e+00> : vector<8x32xf32>
    %369 = tpu.matmul %366, %368, %cst_229 {dimension_numbers = #tpu.dot_dimension_numbers<[1], [0], [0], [1], [0, 0, 1, 1], [], []>} : vector<8x32xf32>, vector<32x32xf32>, vector<8x32xf32> -> vector<8x32xf32>
    %370 = arith.addf %363, %369 : vector<8x32xf32>
    %c5_230 = arith.constant 5 : index
    %c0_231 = arith.constant 0 : index
    %c0_232 = arith.constant 0 : index
    %371 = vector.load %arg21[%c5_230, %c0_231, %c0_232] : memref<9x8x8xf32, #tpu.memory_space<vmem>>, vector<1x8x8xf32>
    %372 = vector.shape_cast %371 : vector<1x8x8xf32> to vector<8x8xf32>
    %cst_233 = arith.constant dense<0.000000e+00> : vector<8x32xf32>
    %373 = tpu.matmul %372, %334, %cst_233 {dimension_numbers = #tpu.dot_dimension_numbers<[1], [0], [0], [1], [0, 0, 1, 1], [], []>} : vector<8x8xf32>, vector<8x32xf32>, vector<8x32xf32> -> vector<8x32xf32>
    %c5_234 = arith.constant 5 : index
    %c0_235 = arith.constant 0 : index
    %c0_236 = arith.constant 0 : index
    %374 = vector.load %arg22[%c5_234, %c0_235, %c0_236] : memref<9x32x32xf32, #tpu.memory_space<vmem>>, vector<1x32x32xf32>
    %375 = vector.shape_cast %374 : vector<1x32x32xf32> to vector<32x32xf32>
    %cst_237 = arith.constant dense<0.000000e+00> : vector<8x32xf32>
    %376 = tpu.matmul %373, %375, %cst_237 {dimension_numbers = #tpu.dot_dimension_numbers<[1], [0], [0], [1], [0, 0, 1, 1], [], []>} : vector<8x32xf32>, vector<32x32xf32>, vector<8x32xf32> -> vector<8x32xf32>
    %377 = arith.addf %370, %376 : vector<8x32xf32>
    %c6 = arith.constant 6 : index
    %c0_238 = arith.constant 0 : index
    %c0_239 = arith.constant 0 : index
    %378 = vector.load %arg21[%c6, %c0_238, %c0_239] : memref<9x8x8xf32, #tpu.memory_space<vmem>>, vector<1x8x8xf32>
    %379 = vector.shape_cast %378 : vector<1x8x8xf32> to vector<8x8xf32>
    %cst_240 = arith.constant dense<0.000000e+00> : vector<8x32xf32>
    %380 = tpu.matmul %379, %334, %cst_240 {dimension_numbers = #tpu.dot_dimension_numbers<[1], [0], [0], [1], [0, 0, 1, 1], [], []>} : vector<8x8xf32>, vector<8x32xf32>, vector<8x32xf32> -> vector<8x32xf32>
    %c6_241 = arith.constant 6 : index
    %c0_242 = arith.constant 0 : index
    %c0_243 = arith.constant 0 : index
    %381 = vector.load %arg22[%c6_241, %c0_242, %c0_243] : memref<9x32x32xf32, #tpu.memory_space<vmem>>, vector<1x32x32xf32>
    %382 = vector.shape_cast %381 : vector<1x32x32xf32> to vector<32x32xf32>
    %cst_244 = arith.constant dense<0.000000e+00> : vector<8x32xf32>
    %383 = tpu.matmul %380, %382, %cst_244 {dimension_numbers = #tpu.dot_dimension_numbers<[1], [0], [0], [1], [0, 0, 1, 1], [], []>} : vector<8x32xf32>, vector<32x32xf32>, vector<8x32xf32> -> vector<8x32xf32>
    %384 = arith.addf %377, %383 : vector<8x32xf32>
    %c7 = arith.constant 7 : index
    %c0_245 = arith.constant 0 : index
    %c0_246 = arith.constant 0 : index
    %385 = vector.load %arg21[%c7, %c0_245, %c0_246] : memref<9x8x8xf32, #tpu.memory_space<vmem>>, vector<1x8x8xf32>
    %386 = vector.shape_cast %385 : vector<1x8x8xf32> to vector<8x8xf32>
    %cst_247 = arith.constant dense<0.000000e+00> : vector<8x32xf32>
    %387 = tpu.matmul %386, %334, %cst_247 {dimension_numbers = #tpu.dot_dimension_numbers<[1], [0], [0], [1], [0, 0, 1, 1], [], []>} : vector<8x8xf32>, vector<8x32xf32>, vector<8x32xf32> -> vector<8x32xf32>
    %c7_248 = arith.constant 7 : index
    %c0_249 = arith.constant 0 : index
    %c0_250 = arith.constant 0 : index
    %388 = vector.load %arg22[%c7_248, %c0_249, %c0_250] : memref<9x32x32xf32, #tpu.memory_space<vmem>>, vector<1x32x32xf32>
    %389 = vector.shape_cast %388 : vector<1x32x32xf32> to vector<32x32xf32>
    %cst_251 = arith.constant dense<0.000000e+00> : vector<8x32xf32>
    %390 = tpu.matmul %387, %389, %cst_251 {dimension_numbers = #tpu.dot_dimension_numbers<[1], [0], [0], [1], [0, 0, 1, 1], [], []>} : vector<8x32xf32>, vector<32x32xf32>, vector<8x32xf32> -> vector<8x32xf32>
    %391 = arith.addf %384, %390 : vector<8x32xf32>
    %c8 = arith.constant 8 : index
    %c0_252 = arith.constant 0 : index
    %c0_253 = arith.constant 0 : index
    %392 = vector.load %arg21[%c8, %c0_252, %c0_253] : memref<9x8x8xf32, #tpu.memory_space<vmem>>, vector<1x8x8xf32>
    %393 = vector.shape_cast %392 : vector<1x8x8xf32> to vector<8x8xf32>
    %cst_254 = arith.constant dense<0.000000e+00> : vector<8x32xf32>
    %394 = tpu.matmul %393, %334, %cst_254 {dimension_numbers = #tpu.dot_dimension_numbers<[1], [0], [0], [1], [0, 0, 1, 1], [], []>} : vector<8x8xf32>, vector<8x32xf32>, vector<8x32xf32> -> vector<8x32xf32>
    %c8_255 = arith.constant 8 : index
    %c0_256 = arith.constant 0 : index
    %c0_257 = arith.constant 0 : index
    %395 = vector.load %arg22[%c8_255, %c0_256, %c0_257] : memref<9x32x32xf32, #tpu.memory_space<vmem>>, vector<1x32x32xf32>
    %396 = vector.shape_cast %395 : vector<1x32x32xf32> to vector<32x32xf32>
    %cst_258 = arith.constant dense<0.000000e+00> : vector<8x32xf32>
    %397 = tpu.matmul %394, %396, %cst_258 {dimension_numbers = #tpu.dot_dimension_numbers<[1], [0], [0], [1], [0, 0, 1, 1], [], []>} : vector<8x32xf32>, vector<32x32xf32>, vector<8x32xf32> -> vector<8x32xf32>
    %398 = arith.addf %391, %397 : vector<8x32xf32>
    %c0_259 = arith.constant 0 : index
    %c0_260 = arith.constant 0 : index
    %399 = vector.load %arg23[%c0_259, %c0_260] : memref<1x32xf32, #tpu.memory_space<vmem>>, vector<1x32xf32>
    %400 = vector.broadcast %399 : vector<1x32xf32> to vector<8x32xf32>
    %401 = arith.addf %398, %400 : vector<8x32xf32>
    %cst_261 = arith.constant 0.000000e+00 : f32
    %402 = vector.broadcast %cst_261 : f32 to vector<8x32xf32>
    %403 = arith.maximumf %401, %402 : vector<8x32xf32>
    %cst_262 = arith.constant 0.000000e+00 : f32
    %404 = vector.broadcast %cst_262 : f32 to vector<8x32xf32>
    %c0_263 = arith.constant 0 : index
    %c0_264 = arith.constant 0 : index
    %c0_265 = arith.constant 0 : index
    %405 = vector.load %arg21[%c0_263, %c0_264, %c0_265] : memref<9x8x8xf32, #tpu.memory_space<vmem>>, vector<1x8x8xf32>
    %406 = vector.shape_cast %405 : vector<1x8x8xf32> to vector<8x8xf32>
    %cst_266 = arith.constant dense<0.000000e+00> : vector<8x32xf32>
    %407 = tpu.matmul %406, %403, %cst_266 {dimension_numbers = #tpu.dot_dimension_numbers<[1], [0], [0], [1], [0, 0, 1, 1], [], []>} : vector<8x8xf32>, vector<8x32xf32>, vector<8x32xf32> -> vector<8x32xf32>
    %c0_267 = arith.constant 0 : index
    %c0_268 = arith.constant 0 : index
    %c0_269 = arith.constant 0 : index
    %408 = vector.load %arg24[%c0_267, %c0_268, %c0_269] : memref<9x32x32xf32, #tpu.memory_space<vmem>>, vector<1x32x32xf32>
    %409 = vector.shape_cast %408 : vector<1x32x32xf32> to vector<32x32xf32>
    %cst_270 = arith.constant dense<0.000000e+00> : vector<8x32xf32>
    %410 = tpu.matmul %407, %409, %cst_270 {dimension_numbers = #tpu.dot_dimension_numbers<[1], [0], [0], [1], [0, 0, 1, 1], [], []>} : vector<8x32xf32>, vector<32x32xf32>, vector<8x32xf32> -> vector<8x32xf32>
    %411 = arith.addf %404, %410 : vector<8x32xf32>
    %c1_271 = arith.constant 1 : index
    %c0_272 = arith.constant 0 : index
    %c0_273 = arith.constant 0 : index
    %412 = vector.load %arg21[%c1_271, %c0_272, %c0_273] : memref<9x8x8xf32, #tpu.memory_space<vmem>>, vector<1x8x8xf32>
    %413 = vector.shape_cast %412 : vector<1x8x8xf32> to vector<8x8xf32>
    %cst_274 = arith.constant dense<0.000000e+00> : vector<8x32xf32>
    %414 = tpu.matmul %413, %403, %cst_274 {dimension_numbers = #tpu.dot_dimension_numbers<[1], [0], [0], [1], [0, 0, 1, 1], [], []>} : vector<8x8xf32>, vector<8x32xf32>, vector<8x32xf32> -> vector<8x32xf32>
    %c1_275 = arith.constant 1 : index
    %c0_276 = arith.constant 0 : index
    %c0_277 = arith.constant 0 : index
    %415 = vector.load %arg24[%c1_275, %c0_276, %c0_277] : memref<9x32x32xf32, #tpu.memory_space<vmem>>, vector<1x32x32xf32>
    %416 = vector.shape_cast %415 : vector<1x32x32xf32> to vector<32x32xf32>
    %cst_278 = arith.constant dense<0.000000e+00> : vector<8x32xf32>
    %417 = tpu.matmul %414, %416, %cst_278 {dimension_numbers = #tpu.dot_dimension_numbers<[1], [0], [0], [1], [0, 0, 1, 1], [], []>} : vector<8x32xf32>, vector<32x32xf32>, vector<8x32xf32> -> vector<8x32xf32>
    %418 = arith.addf %411, %417 : vector<8x32xf32>
    %c2_279 = arith.constant 2 : index
    %c0_280 = arith.constant 0 : index
    %c0_281 = arith.constant 0 : index
    %419 = vector.load %arg21[%c2_279, %c0_280, %c0_281] : memref<9x8x8xf32, #tpu.memory_space<vmem>>, vector<1x8x8xf32>
    %420 = vector.shape_cast %419 : vector<1x8x8xf32> to vector<8x8xf32>
    %cst_282 = arith.constant dense<0.000000e+00> : vector<8x32xf32>
    %421 = tpu.matmul %420, %403, %cst_282 {dimension_numbers = #tpu.dot_dimension_numbers<[1], [0], [0], [1], [0, 0, 1, 1], [], []>} : vector<8x8xf32>, vector<8x32xf32>, vector<8x32xf32> -> vector<8x32xf32>
    %c2_283 = arith.constant 2 : index
    %c0_284 = arith.constant 0 : index
    %c0_285 = arith.constant 0 : index
    %422 = vector.load %arg24[%c2_283, %c0_284, %c0_285] : memref<9x32x32xf32, #tpu.memory_space<vmem>>, vector<1x32x32xf32>
    %423 = vector.shape_cast %422 : vector<1x32x32xf32> to vector<32x32xf32>
    %cst_286 = arith.constant dense<0.000000e+00> : vector<8x32xf32>
    %424 = tpu.matmul %421, %423, %cst_286 {dimension_numbers = #tpu.dot_dimension_numbers<[1], [0], [0], [1], [0, 0, 1, 1], [], []>} : vector<8x32xf32>, vector<32x32xf32>, vector<8x32xf32> -> vector<8x32xf32>
    %425 = arith.addf %418, %424 : vector<8x32xf32>
    %c3_287 = arith.constant 3 : index
    %c0_288 = arith.constant 0 : index
    %c0_289 = arith.constant 0 : index
    %426 = vector.load %arg21[%c3_287, %c0_288, %c0_289] : memref<9x8x8xf32, #tpu.memory_space<vmem>>, vector<1x8x8xf32>
    %427 = vector.shape_cast %426 : vector<1x8x8xf32> to vector<8x8xf32>
    %cst_290 = arith.constant dense<0.000000e+00> : vector<8x32xf32>
    %428 = tpu.matmul %427, %403, %cst_290 {dimension_numbers = #tpu.dot_dimension_numbers<[1], [0], [0], [1], [0, 0, 1, 1], [], []>} : vector<8x8xf32>, vector<8x32xf32>, vector<8x32xf32> -> vector<8x32xf32>
    %c3_291 = arith.constant 3 : index
    %c0_292 = arith.constant 0 : index
    %c0_293 = arith.constant 0 : index
    %429 = vector.load %arg24[%c3_291, %c0_292, %c0_293] : memref<9x32x32xf32, #tpu.memory_space<vmem>>, vector<1x32x32xf32>
    %430 = vector.shape_cast %429 : vector<1x32x32xf32> to vector<32x32xf32>
    %cst_294 = arith.constant dense<0.000000e+00> : vector<8x32xf32>
    %431 = tpu.matmul %428, %430, %cst_294 {dimension_numbers = #tpu.dot_dimension_numbers<[1], [0], [0], [1], [0, 0, 1, 1], [], []>} : vector<8x32xf32>, vector<32x32xf32>, vector<8x32xf32> -> vector<8x32xf32>
    %432 = arith.addf %425, %431 : vector<8x32xf32>
    %c4_295 = arith.constant 4 : index
    %c0_296 = arith.constant 0 : index
    %c0_297 = arith.constant 0 : index
    %433 = vector.load %arg21[%c4_295, %c0_296, %c0_297] : memref<9x8x8xf32, #tpu.memory_space<vmem>>, vector<1x8x8xf32>
    %434 = vector.shape_cast %433 : vector<1x8x8xf32> to vector<8x8xf32>
    %cst_298 = arith.constant dense<0.000000e+00> : vector<8x32xf32>
    %435 = tpu.matmul %434, %403, %cst_298 {dimension_numbers = #tpu.dot_dimension_numbers<[1], [0], [0], [1], [0, 0, 1, 1], [], []>} : vector<8x8xf32>, vector<8x32xf32>, vector<8x32xf32> -> vector<8x32xf32>
    %c4_299 = arith.constant 4 : index
    %c0_300 = arith.constant 0 : index
    %c0_301 = arith.constant 0 : index
    %436 = vector.load %arg24[%c4_299, %c0_300, %c0_301] : memref<9x32x32xf32, #tpu.memory_space<vmem>>, vector<1x32x32xf32>
    %437 = vector.shape_cast %436 : vector<1x32x32xf32> to vector<32x32xf32>
    %cst_302 = arith.constant dense<0.000000e+00> : vector<8x32xf32>
    %438 = tpu.matmul %435, %437, %cst_302 {dimension_numbers = #tpu.dot_dimension_numbers<[1], [0], [0], [1], [0, 0, 1, 1], [], []>} : vector<8x32xf32>, vector<32x32xf32>, vector<8x32xf32> -> vector<8x32xf32>
    %439 = arith.addf %432, %438 : vector<8x32xf32>
    %c5_303 = arith.constant 5 : index
    %c0_304 = arith.constant 0 : index
    %c0_305 = arith.constant 0 : index
    %440 = vector.load %arg21[%c5_303, %c0_304, %c0_305] : memref<9x8x8xf32, #tpu.memory_space<vmem>>, vector<1x8x8xf32>
    %441 = vector.shape_cast %440 : vector<1x8x8xf32> to vector<8x8xf32>
    %cst_306 = arith.constant dense<0.000000e+00> : vector<8x32xf32>
    %442 = tpu.matmul %441, %403, %cst_306 {dimension_numbers = #tpu.dot_dimension_numbers<[1], [0], [0], [1], [0, 0, 1, 1], [], []>} : vector<8x8xf32>, vector<8x32xf32>, vector<8x32xf32> -> vector<8x32xf32>
    %c5_307 = arith.constant 5 : index
    %c0_308 = arith.constant 0 : index
    %c0_309 = arith.constant 0 : index
    %443 = vector.load %arg24[%c5_307, %c0_308, %c0_309] : memref<9x32x32xf32, #tpu.memory_space<vmem>>, vector<1x32x32xf32>
    %444 = vector.shape_cast %443 : vector<1x32x32xf32> to vector<32x32xf32>
    %cst_310 = arith.constant dense<0.000000e+00> : vector<8x32xf32>
    %445 = tpu.matmul %442, %444, %cst_310 {dimension_numbers = #tpu.dot_dimension_numbers<[1], [0], [0], [1], [0, 0, 1, 1], [], []>} : vector<8x32xf32>, vector<32x32xf32>, vector<8x32xf32> -> vector<8x32xf32>
    %446 = arith.addf %439, %445 : vector<8x32xf32>
    %c6_311 = arith.constant 6 : index
    %c0_312 = arith.constant 0 : index
    %c0_313 = arith.constant 0 : index
    %447 = vector.load %arg21[%c6_311, %c0_312, %c0_313] : memref<9x8x8xf32, #tpu.memory_space<vmem>>, vector<1x8x8xf32>
    %448 = vector.shape_cast %447 : vector<1x8x8xf32> to vector<8x8xf32>
    %cst_314 = arith.constant dense<0.000000e+00> : vector<8x32xf32>
    %449 = tpu.matmul %448, %403, %cst_314 {dimension_numbers = #tpu.dot_dimension_numbers<[1], [0], [0], [1], [0, 0, 1, 1], [], []>} : vector<8x8xf32>, vector<8x32xf32>, vector<8x32xf32> -> vector<8x32xf32>
    %c6_315 = arith.constant 6 : index
    %c0_316 = arith.constant 0 : index
    %c0_317 = arith.constant 0 : index
    %450 = vector.load %arg24[%c6_315, %c0_316, %c0_317] : memref<9x32x32xf32, #tpu.memory_space<vmem>>, vector<1x32x32xf32>
    %451 = vector.shape_cast %450 : vector<1x32x32xf32> to vector<32x32xf32>
    %cst_318 = arith.constant dense<0.000000e+00> : vector<8x32xf32>
    %452 = tpu.matmul %449, %451, %cst_318 {dimension_numbers = #tpu.dot_dimension_numbers<[1], [0], [0], [1], [0, 0, 1, 1], [], []>} : vector<8x32xf32>, vector<32x32xf32>, vector<8x32xf32> -> vector<8x32xf32>
    %453 = arith.addf %446, %452 : vector<8x32xf32>
    %c7_319 = arith.constant 7 : index
    %c0_320 = arith.constant 0 : index
    %c0_321 = arith.constant 0 : index
    %454 = vector.load %arg21[%c7_319, %c0_320, %c0_321] : memref<9x8x8xf32, #tpu.memory_space<vmem>>, vector<1x8x8xf32>
    %455 = vector.shape_cast %454 : vector<1x8x8xf32> to vector<8x8xf32>
    %cst_322 = arith.constant dense<0.000000e+00> : vector<8x32xf32>
    %456 = tpu.matmul %455, %403, %cst_322 {dimension_numbers = #tpu.dot_dimension_numbers<[1], [0], [0], [1], [0, 0, 1, 1], [], []>} : vector<8x8xf32>, vector<8x32xf32>, vector<8x32xf32> -> vector<8x32xf32>
    %c7_323 = arith.constant 7 : index
    %c0_324 = arith.constant 0 : index
    %c0_325 = arith.constant 0 : index
    %457 = vector.load %arg24[%c7_323, %c0_324, %c0_325] : memref<9x32x32xf32, #tpu.memory_space<vmem>>, vector<1x32x32xf32>
    %458 = vector.shape_cast %457 : vector<1x32x32xf32> to vector<32x32xf32>
    %cst_326 = arith.constant dense<0.000000e+00> : vector<8x32xf32>
    %459 = tpu.matmul %456, %458, %cst_326 {dimension_numbers = #tpu.dot_dimension_numbers<[1], [0], [0], [1], [0, 0, 1, 1], [], []>} : vector<8x32xf32>, vector<32x32xf32>, vector<8x32xf32> -> vector<8x32xf32>
    %460 = arith.addf %453, %459 : vector<8x32xf32>
    %c8_327 = arith.constant 8 : index
    %c0_328 = arith.constant 0 : index
    %c0_329 = arith.constant 0 : index
    %461 = vector.load %arg21[%c8_327, %c0_328, %c0_329] : memref<9x8x8xf32, #tpu.memory_space<vmem>>, vector<1x8x8xf32>
    %462 = vector.shape_cast %461 : vector<1x8x8xf32> to vector<8x8xf32>
    %cst_330 = arith.constant dense<0.000000e+00> : vector<8x32xf32>
    %463 = tpu.matmul %462, %403, %cst_330 {dimension_numbers = #tpu.dot_dimension_numbers<[1], [0], [0], [1], [0, 0, 1, 1], [], []>} : vector<8x8xf32>, vector<8x32xf32>, vector<8x32xf32> -> vector<8x32xf32>
    %c8_331 = arith.constant 8 : index
    %c0_332 = arith.constant 0 : index
    %c0_333 = arith.constant 0 : index
    %464 = vector.load %arg24[%c8_331, %c0_332, %c0_333] : memref<9x32x32xf32, #tpu.memory_space<vmem>>, vector<1x32x32xf32>
    %465 = vector.shape_cast %464 : vector<1x32x32xf32> to vector<32x32xf32>
    %cst_334 = arith.constant dense<0.000000e+00> : vector<8x32xf32>
    %466 = tpu.matmul %463, %465, %cst_334 {dimension_numbers = #tpu.dot_dimension_numbers<[1], [0], [0], [1], [0, 0, 1, 1], [], []>} : vector<8x32xf32>, vector<32x32xf32>, vector<8x32xf32> -> vector<8x32xf32>
    %467 = arith.addf %460, %466 : vector<8x32xf32>
    %c0_335 = arith.constant 0 : index
    %c0_336 = arith.constant 0 : index
    %468 = vector.load %arg25[%c0_335, %c0_336] : memref<1x32xf32, #tpu.memory_space<vmem>>, vector<1x32xf32>
    %469 = vector.broadcast %468 : vector<1x32xf32> to vector<8x32xf32>
    %470 = arith.addf %467, %469 : vector<8x32xf32>
    %cst_337 = arith.constant 0.000000e+00 : f32
    %471 = vector.broadcast %cst_337 : f32 to vector<8x32xf32>
    %472 = arith.maximumf %470, %471 : vector<8x32xf32>
    %cst_338 = arith.constant 0.000000e+00 : f32
    %473 = vector.broadcast %cst_338 : f32 to vector<8x512xf32>
    %c0_339 = arith.constant 0 : index
    %c0_340 = arith.constant 0 : index
    %c0_341 = arith.constant 0 : index
    %474 = vector.load %arg21[%c0_339, %c0_340, %c0_341] : memref<9x8x8xf32, #tpu.memory_space<vmem>>, vector<1x8x8xf32>
    %475 = vector.shape_cast %474 : vector<1x8x8xf32> to vector<8x8xf32>
    %cst_342 = arith.constant dense<0.000000e+00> : vector<8x32xf32>
    %476 = tpu.matmul %475, %472, %cst_342 {dimension_numbers = #tpu.dot_dimension_numbers<[1], [0], [0], [1], [0, 0, 1, 1], [], []>} : vector<8x8xf32>, vector<8x32xf32>, vector<8x32xf32> -> vector<8x32xf32>
    %c0_343 = arith.constant 0 : index
    %c0_344 = arith.constant 0 : index
    %c0_345 = arith.constant 0 : index
    %477 = vector.load %arg26[%c0_343, %c0_344, %c0_345] : memref<9x32x512xf32, #tpu.memory_space<vmem>>, vector<1x32x512xf32>
    %478 = vector.shape_cast %477 : vector<1x32x512xf32> to vector<32x512xf32>
    %cst_346 = arith.constant dense<0.000000e+00> : vector<8x512xf32>
    %479 = tpu.matmul %476, %478, %cst_346 {dimension_numbers = #tpu.dot_dimension_numbers<[1], [0], [0], [1], [0, 0, 1, 1], [], []>} : vector<8x32xf32>, vector<32x512xf32>, vector<8x512xf32> -> vector<8x512xf32>
    %480 = arith.addf %473, %479 : vector<8x512xf32>
    %c1_347 = arith.constant 1 : index
    %c0_348 = arith.constant 0 : index
    %c0_349 = arith.constant 0 : index
    %481 = vector.load %arg21[%c1_347, %c0_348, %c0_349] : memref<9x8x8xf32, #tpu.memory_space<vmem>>, vector<1x8x8xf32>
    %482 = vector.shape_cast %481 : vector<1x8x8xf32> to vector<8x8xf32>
    %cst_350 = arith.constant dense<0.000000e+00> : vector<8x32xf32>
    %483 = tpu.matmul %482, %472, %cst_350 {dimension_numbers = #tpu.dot_dimension_numbers<[1], [0], [0], [1], [0, 0, 1, 1], [], []>} : vector<8x8xf32>, vector<8x32xf32>, vector<8x32xf32> -> vector<8x32xf32>
    %c1_351 = arith.constant 1 : index
    %c0_352 = arith.constant 0 : index
    %c0_353 = arith.constant 0 : index
    %484 = vector.load %arg26[%c1_351, %c0_352, %c0_353] : memref<9x32x512xf32, #tpu.memory_space<vmem>>, vector<1x32x512xf32>
    %485 = vector.shape_cast %484 : vector<1x32x512xf32> to vector<32x512xf32>
    %cst_354 = arith.constant dense<0.000000e+00> : vector<8x512xf32>
    %486 = tpu.matmul %483, %485, %cst_354 {dimension_numbers = #tpu.dot_dimension_numbers<[1], [0], [0], [1], [0, 0, 1, 1], [], []>} : vector<8x32xf32>, vector<32x512xf32>, vector<8x512xf32> -> vector<8x512xf32>
    %487 = arith.addf %480, %486 : vector<8x512xf32>
    %c2_355 = arith.constant 2 : index
    %c0_356 = arith.constant 0 : index
    %c0_357 = arith.constant 0 : index
    %488 = vector.load %arg21[%c2_355, %c0_356, %c0_357] : memref<9x8x8xf32, #tpu.memory_space<vmem>>, vector<1x8x8xf32>
    %489 = vector.shape_cast %488 : vector<1x8x8xf32> to vector<8x8xf32>
    %cst_358 = arith.constant dense<0.000000e+00> : vector<8x32xf32>
    %490 = tpu.matmul %489, %472, %cst_358 {dimension_numbers = #tpu.dot_dimension_numbers<[1], [0], [0], [1], [0, 0, 1, 1], [], []>} : vector<8x8xf32>, vector<8x32xf32>, vector<8x32xf32> -> vector<8x32xf32>
    %c2_359 = arith.constant 2 : index
    %c0_360 = arith.constant 0 : index
    %c0_361 = arith.constant 0 : index
    %491 = vector.load %arg26[%c2_359, %c0_360, %c0_361] : memref<9x32x512xf32, #tpu.memory_space<vmem>>, vector<1x32x512xf32>
    %492 = vector.shape_cast %491 : vector<1x32x512xf32> to vector<32x512xf32>
    %cst_362 = arith.constant dense<0.000000e+00> : vector<8x512xf32>
    %493 = tpu.matmul %490, %492, %cst_362 {dimension_numbers = #tpu.dot_dimension_numbers<[1], [0], [0], [1], [0, 0, 1, 1], [], []>} : vector<8x32xf32>, vector<32x512xf32>, vector<8x512xf32> -> vector<8x512xf32>
    %494 = arith.addf %487, %493 : vector<8x512xf32>
    %c3_363 = arith.constant 3 : index
    %c0_364 = arith.constant 0 : index
    %c0_365 = arith.constant 0 : index
    %495 = vector.load %arg21[%c3_363, %c0_364, %c0_365] : memref<9x8x8xf32, #tpu.memory_space<vmem>>, vector<1x8x8xf32>
    %496 = vector.shape_cast %495 : vector<1x8x8xf32> to vector<8x8xf32>
    %cst_366 = arith.constant dense<0.000000e+00> : vector<8x32xf32>
    %497 = tpu.matmul %496, %472, %cst_366 {dimension_numbers = #tpu.dot_dimension_numbers<[1], [0], [0], [1], [0, 0, 1, 1], [], []>} : vector<8x8xf32>, vector<8x32xf32>, vector<8x32xf32> -> vector<8x32xf32>
    %c3_367 = arith.constant 3 : index
    %c0_368 = arith.constant 0 : index
    %c0_369 = arith.constant 0 : index
    %498 = vector.load %arg26[%c3_367, %c0_368, %c0_369] : memref<9x32x512xf32, #tpu.memory_space<vmem>>, vector<1x32x512xf32>
    %499 = vector.shape_cast %498 : vector<1x32x512xf32> to vector<32x512xf32>
    %cst_370 = arith.constant dense<0.000000e+00> : vector<8x512xf32>
    %500 = tpu.matmul %497, %499, %cst_370 {dimension_numbers = #tpu.dot_dimension_numbers<[1], [0], [0], [1], [0, 0, 1, 1], [], []>} : vector<8x32xf32>, vector<32x512xf32>, vector<8x512xf32> -> vector<8x512xf32>
    %501 = arith.addf %494, %500 : vector<8x512xf32>
    %c4_371 = arith.constant 4 : index
    %c0_372 = arith.constant 0 : index
    %c0_373 = arith.constant 0 : index
    %502 = vector.load %arg21[%c4_371, %c0_372, %c0_373] : memref<9x8x8xf32, #tpu.memory_space<vmem>>, vector<1x8x8xf32>
    %503 = vector.shape_cast %502 : vector<1x8x8xf32> to vector<8x8xf32>
    %cst_374 = arith.constant dense<0.000000e+00> : vector<8x32xf32>
    %504 = tpu.matmul %503, %472, %cst_374 {dimension_numbers = #tpu.dot_dimension_numbers<[1], [0], [0], [1], [0, 0, 1, 1], [], []>} : vector<8x8xf32>, vector<8x32xf32>, vector<8x32xf32> -> vector<8x32xf32>
    %c4_375 = arith.constant 4 : index
    %c0_376 = arith.constant 0 : index
    %c0_377 = arith.constant 0 : index
    %505 = vector.load %arg26[%c4_375, %c0_376, %c0_377] : memref<9x32x512xf32, #tpu.memory_space<vmem>>, vector<1x32x512xf32>
    %506 = vector.shape_cast %505 : vector<1x32x512xf32> to vector<32x512xf32>
    %cst_378 = arith.constant dense<0.000000e+00> : vector<8x512xf32>
    %507 = tpu.matmul %504, %506, %cst_378 {dimension_numbers = #tpu.dot_dimension_numbers<[1], [0], [0], [1], [0, 0, 1, 1], [], []>} : vector<8x32xf32>, vector<32x512xf32>, vector<8x512xf32> -> vector<8x512xf32>
    %508 = arith.addf %501, %507 : vector<8x512xf32>
    %c5_379 = arith.constant 5 : index
    %c0_380 = arith.constant 0 : index
    %c0_381 = arith.constant 0 : index
    %509 = vector.load %arg21[%c5_379, %c0_380, %c0_381] : memref<9x8x8xf32, #tpu.memory_space<vmem>>, vector<1x8x8xf32>
    %510 = vector.shape_cast %509 : vector<1x8x8xf32> to vector<8x8xf32>
    %cst_382 = arith.constant dense<0.000000e+00> : vector<8x32xf32>
    %511 = tpu.matmul %510, %472, %cst_382 {dimension_numbers = #tpu.dot_dimension_numbers<[1], [0], [0], [1], [0, 0, 1, 1], [], []>} : vector<8x8xf32>, vector<8x32xf32>, vector<8x32xf32> -> vector<8x32xf32>
    %c5_383 = arith.constant 5 : index
    %c0_384 = arith.constant 0 : index
    %c0_385 = arith.constant 0 : index
    %512 = vector.load %arg26[%c5_383, %c0_384, %c0_385] : memref<9x32x512xf32, #tpu.memory_space<vmem>>, vector<1x32x512xf32>
    %513 = vector.shape_cast %512 : vector<1x32x512xf32> to vector<32x512xf32>
    %cst_386 = arith.constant dense<0.000000e+00> : vector<8x512xf32>
    %514 = tpu.matmul %511, %513, %cst_386 {dimension_numbers = #tpu.dot_dimension_numbers<[1], [0], [0], [1], [0, 0, 1, 1], [], []>} : vector<8x32xf32>, vector<32x512xf32>, vector<8x512xf32> -> vector<8x512xf32>
    %515 = arith.addf %508, %514 : vector<8x512xf32>
    %c6_387 = arith.constant 6 : index
    %c0_388 = arith.constant 0 : index
    %c0_389 = arith.constant 0 : index
    %516 = vector.load %arg21[%c6_387, %c0_388, %c0_389] : memref<9x8x8xf32, #tpu.memory_space<vmem>>, vector<1x8x8xf32>
    %517 = vector.shape_cast %516 : vector<1x8x8xf32> to vector<8x8xf32>
    %cst_390 = arith.constant dense<0.000000e+00> : vector<8x32xf32>
    %518 = tpu.matmul %517, %472, %cst_390 {dimension_numbers = #tpu.dot_dimension_numbers<[1], [0], [0], [1], [0, 0, 1, 1], [], []>} : vector<8x8xf32>, vector<8x32xf32>, vector<8x32xf32> -> vector<8x32xf32>
    %c6_391 = arith.constant 6 : index
    %c0_392 = arith.constant 0 : index
    %c0_393 = arith.constant 0 : index
    %519 = vector.load %arg26[%c6_391, %c0_392, %c0_393] : memref<9x32x512xf32, #tpu.memory_space<vmem>>, vector<1x32x512xf32>
    %520 = vector.shape_cast %519 : vector<1x32x512xf32> to vector<32x512xf32>
    %cst_394 = arith.constant dense<0.000000e+00> : vector<8x512xf32>
    %521 = tpu.matmul %518, %520, %cst_394 {dimension_numbers = #tpu.dot_dimension_numbers<[1], [0], [0], [1], [0, 0, 1, 1], [], []>} : vector<8x32xf32>, vector<32x512xf32>, vector<8x512xf32> -> vector<8x512xf32>
    %522 = arith.addf %515, %521 : vector<8x512xf32>
    %c7_395 = arith.constant 7 : index
    %c0_396 = arith.constant 0 : index
    %c0_397 = arith.constant 0 : index
    %523 = vector.load %arg21[%c7_395, %c0_396, %c0_397] : memref<9x8x8xf32, #tpu.memory_space<vmem>>, vector<1x8x8xf32>
    %524 = vector.shape_cast %523 : vector<1x8x8xf32> to vector<8x8xf32>
    %cst_398 = arith.constant dense<0.000000e+00> : vector<8x32xf32>
    %525 = tpu.matmul %524, %472, %cst_398 {dimension_numbers = #tpu.dot_dimension_numbers<[1], [0], [0], [1], [0, 0, 1, 1], [], []>} : vector<8x8xf32>, vector<8x32xf32>, vector<8x32xf32> -> vector<8x32xf32>
    %c7_399 = arith.constant 7 : index
    %c0_400 = arith.constant 0 : index
    %c0_401 = arith.constant 0 : index
    %526 = vector.load %arg26[%c7_399, %c0_400, %c0_401] : memref<9x32x512xf32, #tpu.memory_space<vmem>>, vector<1x32x512xf32>
    %527 = vector.shape_cast %526 : vector<1x32x512xf32> to vector<32x512xf32>
    %cst_402 = arith.constant dense<0.000000e+00> : vector<8x512xf32>
    %528 = tpu.matmul %525, %527, %cst_402 {dimension_numbers = #tpu.dot_dimension_numbers<[1], [0], [0], [1], [0, 0, 1, 1], [], []>} : vector<8x32xf32>, vector<32x512xf32>, vector<8x512xf32> -> vector<8x512xf32>
    %529 = arith.addf %522, %528 : vector<8x512xf32>
    %c8_403 = arith.constant 8 : index
    %c0_404 = arith.constant 0 : index
    %c0_405 = arith.constant 0 : index
    %530 = vector.load %arg21[%c8_403, %c0_404, %c0_405] : memref<9x8x8xf32, #tpu.memory_space<vmem>>, vector<1x8x8xf32>
    %531 = vector.shape_cast %530 : vector<1x8x8xf32> to vector<8x8xf32>
    %cst_406 = arith.constant dense<0.000000e+00> : vector<8x32xf32>
    %532 = tpu.matmul %531, %472, %cst_406 {dimension_numbers = #tpu.dot_dimension_numbers<[1], [0], [0], [1], [0, 0, 1, 1], [], []>} : vector<8x8xf32>, vector<8x32xf32>, vector<8x32xf32> -> vector<8x32xf32>
    %c8_407 = arith.constant 8 : index
    %c0_408 = arith.constant 0 : index
    %c0_409 = arith.constant 0 : index
    %533 = vector.load %arg26[%c8_407, %c0_408, %c0_409] : memref<9x32x512xf32, #tpu.memory_space<vmem>>, vector<1x32x512xf32>
    %534 = vector.shape_cast %533 : vector<1x32x512xf32> to vector<32x512xf32>
    %cst_410 = arith.constant dense<0.000000e+00> : vector<8x512xf32>
    %535 = tpu.matmul %532, %534, %cst_410 {dimension_numbers = #tpu.dot_dimension_numbers<[1], [0], [0], [1], [0, 0, 1, 1], [], []>} : vector<8x32xf32>, vector<32x512xf32>, vector<8x512xf32> -> vector<8x512xf32>
    %536 = arith.addf %529, %535 : vector<8x512xf32>
    %c0_411 = arith.constant 0 : index
    %c0_412 = arith.constant 0 : index
    %537 = vector.load %arg27[%c0_411, %c0_412] : memref<1x512xf32, #tpu.memory_space<vmem>>, vector<1x512xf32>
    %538 = vector.broadcast %537 : vector<1x512xf32> to vector<8x512xf32>
    %539 = arith.addf %536, %538 : vector<8x512xf32>
    %c0_413 = arith.constant 0 : index
    %c0_414 = arith.constant 0 : index
    %540 = vector.load %arg28[%c0_413, %c0_414] : memref<8x512xf32, #tpu.memory_space<vmem>>, vector<8x512xf32>
    tpu.vector_store %arg28[%c0_413, %c0_414], %539 {strides = array<i32>} : memref<8x512xf32, #tpu.memory_space<vmem>>, vector<8x512xf32>,
    return
  }
  func.func @transform_0(%arg0: i32) -> (i32, i32) {
    %c0_i32 = arith.constant 0 : i32
    %c0_i32_0 = arith.constant 0 : i32
    %c0_i32_1 = arith.constant 0 : i32
    return %c0_i32, %c0_i32_0 : i32, i32
  }
  func.func @transform_1(%arg0: i32) -> (i32, i32) {
    %c0_i32 = arith.constant 0 : i32
    %c0_i32_0 = arith.constant 0 : i32
    %c0_i32_1 = arith.constant 0 : i32
    return %c0_i32, %c0_i32_0 : i32, i32
  }
  func.func @transform_2(%arg0: i32) -> (i32, i32) {
    %c0_i32 = arith.constant 0 : i32
    %c0_i32_0 = arith.constant 0 : i32
    %c0_i32_1 = arith.constant 0 : i32
    return %c0_i32, %c0_i32_0 : i32, i32
  }
  func.func @transform_3(%arg0: i32) -> (i32, i32) {
    %c0_i32 = arith.constant 0 : i32
    %c0_i32_0 = arith.constant 0 : i32
    %c0_i32_1 = arith.constant 0 : i32
    return %c0_i32, %c0_i32_0 : i32, i32
  }
  func.func @transform_4(%arg0: i32) -> (i32, i32) {
    %c0_i32 = arith.constant 0 : i32
    %c0_i32_0 = arith.constant 0 : i32
    %c0_i32_1 = arith.constant 0 : i32
    return %c0_i32, %c0_i32_0 : i32, i32
  }
  func.func @transform_5(%arg0: i32) -> (i32, i32) {
    %c0_i32 = arith.constant 0 : i32
    %c0_i32_0 = arith.constant 0 : i32
    %c0_i32_1 = arith.constant 0 : i32
    return %c0_i32, %c0_i32_0 : i32, i32
  }
  func.func @transform_6(%arg0: i32) -> (i32, i32) {
    %c0_i32 = arith.constant 0 : i32
    %c0_i32_0 = arith.constant 0 : i32
    %c0_i32_1 = arith.constant 0 : i32
    return %c0_i32, %c0_i32_0 : i32, i32
  }
  func.func @transform_7(%arg0: i32) -> (i32, i32, i32) {
    %c0_i32 = arith.constant 0 : i32
    %c0_i32_0 = arith.constant 0 : i32
    %c0_i32_1 = arith.constant 0 : i32
    %c0_i32_2 = arith.constant 0 : i32
    return %c0_i32, %c0_i32_0, %c0_i32_1 : i32, i32, i32
  }
  func.func @transform_8(%arg0: i32) -> (i32, i32, i32) {
    %c0_i32 = arith.constant 0 : i32
    %c0_i32_0 = arith.constant 0 : i32
    %c0_i32_1 = arith.constant 0 : i32
    %c0_i32_2 = arith.constant 0 : i32
    return %c0_i32, %c0_i32_0, %c0_i32_1 : i32, i32, i32
  }
  func.func @transform_9(%arg0: i32) -> (i32, i32, i32) {
    %c0_i32 = arith.constant 0 : i32
    %c0_i32_0 = arith.constant 0 : i32
    %c0_i32_1 = arith.constant 0 : i32
    %c0_i32_2 = arith.constant 0 : i32
    return %c0_i32, %c0_i32_0, %c0_i32_1 : i32, i32, i32
  }
  func.func @transform_10(%arg0: i32) -> (i32, i32, i32) {
    %c0_i32 = arith.constant 0 : i32
    %c0_i32_0 = arith.constant 0 : i32
    %c0_i32_1 = arith.constant 0 : i32
    %c0_i32_2 = arith.constant 0 : i32
    return %c0_i32, %c0_i32_0, %c0_i32_1 : i32, i32, i32
  }
  func.func @transform_11(%arg0: i32) -> (i32, i32, i32) {
    %c0_i32 = arith.constant 0 : i32
    %c0_i32_0 = arith.constant 0 : i32
    %c0_i32_1 = arith.constant 0 : i32
    %c0_i32_2 = arith.constant 0 : i32
    return %c0_i32, %c0_i32_0, %c0_i32_1 : i32, i32, i32
  }
  func.func @transform_12(%arg0: i32) -> (i32, i32, i32) {
    %c0_i32 = arith.constant 0 : i32
    %c0_i32_0 = arith.constant 0 : i32
    %c0_i32_1 = arith.constant 0 : i32
    %c0_i32_2 = arith.constant 0 : i32
    return %c0_i32, %c0_i32_0, %c0_i32_1 : i32, i32, i32
  }
  func.func @transform_13(%arg0: i32) -> (i32, i32, i32) {
    %c0_i32 = arith.constant 0 : i32
    %c0_i32_0 = arith.constant 0 : i32
    %c0_i32_1 = arith.constant 0 : i32
    %c0_i32_2 = arith.constant 0 : i32
    return %c0_i32, %c0_i32_0, %c0_i32_1 : i32, i32, i32
  }
  func.func @transform_14(%arg0: i32) -> (i32, i32, i32) {
    %c0_i32 = arith.constant 0 : i32
    %c0_i32_0 = arith.constant 0 : i32
    %c0_i32_1 = arith.constant 0 : i32
    %c0_i32_2 = arith.constant 0 : i32
    return %c0_i32, %c0_i32_0, %c0_i32_1 : i32, i32, i32
  }
  func.func @transform_15(%arg0: i32) -> (i32, i32, i32) {
    %c0_i32 = arith.constant 0 : i32
    %c0_i32_0 = arith.constant 0 : i32
    %c0_i32_1 = arith.constant 0 : i32
    %c0_i32_2 = arith.constant 0 : i32
    return %c0_i32, %c0_i32_0, %c0_i32_1 : i32, i32, i32
  }
  func.func @transform_16(%arg0: i32) -> (i32, i32, i32) {
    %c0_i32 = arith.constant 0 : i32
    %c0_i32_0 = arith.constant 0 : i32
    %c0_i32_1 = arith.constant 0 : i32
    %c0_i32_2 = arith.constant 0 : i32
    return %c0_i32, %c0_i32_0, %c0_i32_1 : i32, i32, i32
  }
  func.func @transform_17(%arg0: i32) -> (i32, i32, i32) {
    %c0_i32 = arith.constant 0 : i32
    %c0_i32_0 = arith.constant 0 : i32
    %c0_i32_1 = arith.constant 0 : i32
    %c0_i32_2 = arith.constant 0 : i32
    return %c0_i32, %c0_i32_0, %c0_i32_1 : i32, i32, i32
  }
  func.func @transform_18(%arg0: i32) -> (i32, i32) {
    %c0_i32 = arith.constant 0 : i32
    %c0_i32_0 = arith.constant 0 : i32
    %c0_i32_1 = arith.constant 0 : i32
    return %c0_i32, %c0_i32_0 : i32, i32
  }
  func.func @transform_19(%arg0: i32) -> (i32, i32) {
    %c0_i32 = arith.constant 0 : i32
    %c0_i32_0 = arith.constant 0 : i32
    %c0_i32_1 = arith.constant 0 : i32
    return %c0_i32, %c0_i32_0 : i32, i32
  }
  func.func @transform_20(%arg0: i32) -> (i32, i32, i32) {
    %c0_i32 = arith.constant 0 : i32
    %c0_i32_0 = arith.constant 0 : i32
    %c0_i32_1 = arith.constant 0 : i32
    %c0_i32_2 = arith.constant 0 : i32
    return %c0_i32, %c0_i32_0, %c0_i32_1 : i32, i32, i32
  }
  func.func @transform_21(%arg0: i32) -> (i32, i32, i32) {
    %c0_i32 = arith.constant 0 : i32
    %c0_i32_0 = arith.constant 0 : i32
    %c0_i32_1 = arith.constant 0 : i32
    %c0_i32_2 = arith.constant 0 : i32
    return %c0_i32, %c0_i32_0, %c0_i32_1 : i32, i32, i32
  }
  func.func @transform_22(%arg0: i32) -> (i32, i32) {
    %c0_i32 = arith.constant 0 : i32
    %c0_i32_0 = arith.constant 0 : i32
    %c0_i32_1 = arith.constant 0 : i32
    return %c0_i32, %c0_i32_0 : i32, i32
  }
  func.func @transform_23(%arg0: i32) -> (i32, i32, i32) {
    %c0_i32 = arith.constant 0 : i32
    %c0_i32_0 = arith.constant 0 : i32
    %c0_i32_1 = arith.constant 0 : i32
    %c0_i32_2 = arith.constant 0 : i32
    return %c0_i32, %c0_i32_0, %c0_i32_1 : i32, i32, i32
  }
  func.func @transform_24(%arg0: i32) -> (i32, i32) {
    %c0_i32 = arith.constant 0 : i32
    %c0_i32_0 = arith.constant 0 : i32
    %c0_i32_1 = arith.constant 0 : i32
    return %c0_i32, %c0_i32_0 : i32, i32
  }
  func.func @transform_25(%arg0: i32) -> (i32, i32, i32) {
    %c0_i32 = arith.constant 0 : i32
    %c0_i32_0 = arith.constant 0 : i32
    %c0_i32_1 = arith.constant 0 : i32
    %c0_i32_2 = arith.constant 0 : i32
    return %c0_i32, %c0_i32_0, %c0_i32_1 : i32, i32, i32
  }
  func.func @transform_26(%arg0: i32) -> (i32, i32) {
    %c0_i32 = arith.constant 0 : i32
    %c0_i32_0 = arith.constant 0 : i32
    %c0_i32_1 = arith.constant 0 : i32
    return %c0_i32, %c0_i32_0 : i32, i32
  }
  func.func @transform_27(%arg0: i32) -> (i32, i32) {
    %c0_i32 = arith.constant 0 : i32
    %c0_i32_0 = arith.constant 0 : i32
    %c0_i32_1 = arith.constant 0 : i32
    return %c0_i32, %c0_i32_0 : i32, i32
  }
}

</mosaic_0001>

<bundles_post_ra>
// kernel: main_model_forward.1
= control target key start
LH: loop header
LB: loop body
LE: loop exit
PB: predicated region body
PF: predicated region fallthrough
CT: control target
= control target key end

     0   :  { %vm409_vm0 = vcmask 64512   ;;  %vm495_vm1 = vcmask 261120   ;;  %vm499_vm2 = vcmask 254976   ;;  %vm1059_vm3 = vcmask 1041408   ;;  %s11110_s1 = inlined_call_operand.vmem [shape: f32[768,32], index: 1, kind: input, shape index: {}]   ;;  %s11111_s0 = inlined_call_operand.vmem [shape: f32[8,768], index: 0, kind: input, shape index: {}]   ;;  %s11112_s4 = inlined_call_operand.vmem [shape: f32[10,8], index: 4, kind: input, shape index: {}]   ;;  %s11113_s2 = inlined_call_operand.vmem [shape: f32[1,32], index: 2, kind: input, shape index: {}]   ;;  %s11114_s3 = inlined_call_operand.vmem [shape: f32[10,32], index: 3, kind: input, shape index: {}]   ;;  %s11115_s10 = inlined_call_operand.vmem [shape: f32[6,32,32], index: 10, kind: input, shape index: {}]   ;;  %s11116_s8 = inlined_call_operand.vmem [shape: f32[4,1,32], index: 8, kind: input, shape index: {}]   ;;  %s11117_s9 = inlined_call_operand.vmem [shape: f32[4,1,32], index: 9, kind: input, shape index: {}]   ;;  %s11118_s11 = inlined_call_operand.vmem [shape: f32[6,1,32], index: 11, kind: input, shape index: {}]   ;;  %s11119_s7 = inlined_call_operand.vmem [shape: f32[2,1,32], index: 7, kind: input, shape index: {}]   ;;  %s11120_s6 = inlined_call_operand.vmem [shape: f32[10,10], index: 6, kind: input, shape index: {}]   ;;  %s11121_s12 = inlined_call_operand.vmem [shape: f32[2,32,32], index: 12, kind: input, shape index: {}]   ;;  %s11122_s13 = inlined_call_operand.vmem [shape: f32[2,1,32], index: 13, kind: input, shape index: {}]   ;;  %s11123_s14 = inlined_call_operand.vmem [shape: f32[2,32,128], index: 14, kind: input, shape index: {}]   ;;  %s11124_s16 = inlined_call_operand.vmem [shape: f32[2,128,32], index: 16, kind: input, shape index: {}]   ;;  %s11125_s15 = inlined_call_operand.vmem [shape: f32[2,1,128], index: 15, kind: input, shape index: {}]   ;;  %s11126_s17 = inlined_call_operand.vmem [shape: f32[2,1,32], index: 17, kind: input, shape index: {}]   ;;  %s11127_s18 = inlined_call_operand.vmem [shape: f32[1,32], index: 18, kind: input, shape index: {}]   ;;  %s11128_s19 = inlined_call_operand.vmem [shape: f32[1,32], index: 19, kind: input, shape index: {}]   ;;  %s11129_s5 = inlined_call_operand.vmem [shape: f32[8,10], index: 5, kind: input, shape index: {}]   ;;  %s11130_s20 = inlined_call_operand.vmem [shape: f32[9,8,8], index: 20, kind: input, shape index: {}]   ;;  %s11131_s21 = inlined_call_operand.vmem [shape: f32[9,32,32], index: 21, kind: input, shape index: {}]   ;;  %s11132_s23 = inlined_call_operand.vmem [shape: f32[9,32,32], index: 23, kind: input, shape index: {}]   ;;  %s11133_s22 = inlined_call_operand.vmem [shape: f32[1,32], index: 22, kind: input, shape index: {}]   ;;  %s11134_s25 = inlined_call_operand.vmem [shape: f32[9,32,512], index: 25, kind: input, shape index: {}]   ;;  %s11135_s24 = inlined_call_operand.vmem [shape: f32[1,32], index: 24, kind: input, shape index: {}]   ;;  %s11136_s26 = inlined_call_operand.vmem [shape: f32[1,512], index: 26, kind: input, shape index: {}]   ;;  %s11137_s27 = inlined_call_operand.vmem [shape: f32[8,512], index: 27, kind: output, shape index: {}]  }
   0x1   :  { %11149 = sst [smem:[#allocation2_spill]] %s11110_s1  ;;  %vm908_vm4 = vcmask 80896   ;;  %vm912_vm5 = vcmask 74752   ;;  %vm9090_vm6 = vmmov 0  }
   0x2   :  { %11150 = sst [smem:[#allocation3_spill]] %s11111_s0 }
   0x3   :  { %11151 = sst [smem:[#allocation4_spill]] %s11112_s4 }
   0x4   :  { %11152 = sst [smem:[#allocation5_spill]] %s11113_s2 }
   0x5   :  { %11153 = sst [smem:[#allocation6_spill]] %s11114_s3 }
   0x6   :  { %11154 = sst [smem:[#allocation7_spill]] %s11115_s10 }
   0x7   :  { %11155 = sst [smem:[#allocation8_spill]] %s11116_s8 }
   0x8   :  { %11156 = sst [smem:[#allocation9_spill]] %s11117_s9 }
   0x9   :  { %11157 = sst [smem:[#allocation10_spill]] %s11118_s11 }
   0xa   :  { %11158 = sst [smem:[#allocation11_spill]] %s11119_s7 }
   0xb   :  { %11159 = sst [smem:[#allocation12_spill]] %s11120_s6 }
   0xc   :  { %11160 = sst [smem:[#allocation13_spill]] %s11121_s12 }
   0xd   :  { %s11161_s11 = sld [smem:[#allocation2_spill]] }
   0xe   :  { %s11162_s8 = sld [smem:[#allocation3_spill]] }
   0xf   :  { %s11163_s7 = sld [smem:[#allocation4_spill]] }
  0x10   :  { %s11164_s28 = sld [smem:[#allocation5_spill]] }
  0x11   :  { %s11165_s1 = sld [smem:[#allocation6_spill]] }
  0x12   :  { %s11166_s4 = sld [smem:[#allocation7_spill]] }
  0x13   :  { %v123_v0 = vld [vmem:[%s11161_s11 + $0xf8] sm:$0xff]  ;;  %v122_v2 = vld [vmem:[%s11161_s11 + $0xf0] sm:$0xff]  ;;  %v121_v6 = vld [vmem:[%s11161_s11 + $0xe8] sm:$0xff]  ;;  %s11167_s12 = sld [smem:[#allocation8_spill]] }
  0x14   :  { %v107_v1 = vld [vmem:[%s11161_s11 + $0x78] sm:$0xff]  ;;  %8057 = vmatprep.subr.mxu0 %v123_v0  ;;  %v106_v4 = vld [vmem:[%s11161_s11 + $0x70] sm:$0xff]  ;;  %v105_v8 = vld [vmem:[%s11161_s11 + $0x68] sm:$0xff]  ;;  %s11168_s9 = sld [smem:[#allocation9_spill]] }
  0x15   :  { %v155_v3 = vld [vmem:[%s11161_s11 + $0x1f8] sm:$0xff]  ;;  %8058 = vmatpush3.msra.mxu0 %v107_v1  ;;  %v154_v7 = vld [vmem:[%s11161_s11 + $0x1f0] sm:$0xff]  ;;  %v153_v10 = vld [vmem:[%s11161_s11 + $0x1e8] sm:$0xff]  ;;  %s11170_s6 = sld [smem:[#allocation11_spill]] }
  0x16   :  { %v139_v5 = vld [vmem:[%s11161_s11 + $0x178] sm:$0xff]  ;;  %8092 = vmatprep.subr.mxu1 %v155_v3  ;;  %8059 = vmatprep.subr.mxu0 %v122_v2  ;;  %v138_v9 = vld [vmem:[%s11161_s11 + $0x170] sm:$0xff]  ;;  %v120_v11 = vld [vmem:[%s11161_s11 + $0xe0] sm:$0xff]  ;;  %s11172_s2 = sld [smem:[#allocation13_spill]] }
  0x17   :  { %8093 = vmatpush3.msra.mxu1 %v139_v5  ;;  %8060 = vmatpush3.msra.mxu0 %v106_v4  ;;  %v137_v12 = vld [vmem:[%s11161_s11 + $0x168] sm:$0xff]  ;;  %v104_v13 = vld [vmem:[%s11161_s11 + $0x60] sm:$0xff]  ;;  %v119_v15 = vld [vmem:[%s11161_s11 + $0xd8] sm:$0xff] }
  0x18   :  { %8094 = vmatprep.subr.mxu1 %v154_v7  ;;  %8061 = vmatprep.subr.mxu0 %v121_v6  ;;  %v152_v14 = vld [vmem:[%s11161_s11 + $0x1e0] sm:$0xff]  ;;  %v103_v17 = vld [vmem:[%s11161_s11 + $0x58] sm:$0xff]  ;;  %v118_v19 = vld [vmem:[%s11161_s11 + $0xd0] sm:$0xff] }
  0x19   :  { %8095 = vmatpush3.msra.mxu1 %v138_v9  ;;  %8062 = vmatpush3.msra.mxu0 %v105_v8  ;;  %v136_v16 = vld [vmem:[%s11161_s11 + $0x160] sm:$0xff]  ;;  %v151_v18 = vld [vmem:[%s11161_s11 + $0x1d8] sm:$0xff]  ;;  %v102_v21 = vld [vmem:[%s11161_s11 + $0x50] sm:$0xff] }
  0x1a   :  { %8096 = vmatprep.subr.mxu1 %v153_v10  ;;  %8063 = vmatprep.subr.mxu0 %v120_v11  ;;  %v135_v20 = vld [vmem:[%s11161_s11 + $0x158] sm:$0xff]  ;;  %v150_v22 = vld [vmem:[%s11161_s11 + $0x1d0] sm:$0xff]  ;;  %v117_v23 = vld [vmem:[%s11161_s11 + $0xc8] sm:$0xff] }
  0x1b   :  { %8097 = vmatpush3.msra.mxu1 %v137_v12  ;;  %8064 = vmatpush3.msra.mxu0 %v104_v13  ;;  %v134_v24 = vld [vmem:[%s11161_s11 + $0x150] sm:$0xff]  ;;  %v101_v25 = vld [vmem:[%s11161_s11 + $0x48] sm:$0xff]  ;;  %v116_v27 = vld [vmem:[%s11161_s11 + $0xc0] sm:$0xff] }
  0x1c   :  { %8098 = vmatprep.subr.mxu1 %v152_v14  ;;  %8065 = vmatprep.subr.mxu0 %v119_v15  ;;  %v149_v26 = vld [vmem:[%s11161_s11 + $0x1c8] sm:$0xff]  ;;  %v100_v29 = vld [vmem:[%s11161_s11 + $0x40] sm:$0xff]  ;;  %v115_v31 = vld [vmem:[%s11161_s11 + $0xb8] sm:$0xff] }
  0x1d   :  { %8099 = vmatpush3.msra.mxu1 %v136_v16  ;;  %8066 = vmatpush3.msra.mxu0 %v103_v17  ;;  %v133_v28 = vld [vmem:[%s11161_s11 + $0x148] sm:$0xff]  ;;  %v148_v30 = vld [vmem:[%s11161_s11 + $0x1c0] sm:$0xff]  ;;  %v99_v33 = vld [vmem:[%s11161_s11 + $0x38] sm:$0xff] }
  0x1e   :  { %8100 = vmatprep.subr.mxu1 %v151_v18  ;;  %8067 = vmatprep.subr.mxu0 %v118_v19  ;;  %v132_v32 = vld [vmem:[%s11161_s11 + $0x140] sm:$0xff]  ;;  %v147_v34 = vld [vmem:[%s11161_s11 + $0x1b8] sm:$0xff]  ;;  %v114_v35 = vld [vmem:[%s11161_s11 + $0xb0] sm:$0xff] }
  0x1f   :  { %8101 = vmatpush3.msra.mxu1 %v135_v20  ;;  %8068 = vmatpush3.msra.mxu0 %v102_v21  ;;  %v131_v36 = vld [vmem:[%s11161_s11 + $0x138] sm:$0xff]  ;;  %v98_v37 = vld [vmem:[%s11161_s11 + $0x30] sm:$0xff]  ;;  %v113_v39 = vld [vmem:[%s11161_s11 + $0xa8] sm:$0xff] }
  0x20   :  { %8102 = vmatprep.subr.mxu1 %v150_v22  ;;  %8069 = vmatprep.subr.mxu0 %v117_v23  ;;  %v146_v38 = vld [vmem:[%s11161_s11 + $0x1b0] sm:$0xff]  ;;  %v97_v41 = vld [vmem:[%s11161_s11 + $0x28] sm:$0xff]  ;;  %v112_v43 = vld [vmem:[%s11161_s11 + $0xa0] sm:$0xff] }
  0x21   :  { %8103 = vmatpush3.msra.mxu1 %v134_v24  ;;  %8070 = vmatpush3.msra.mxu0 %v101_v25  ;;  %v130_v40 = vld [vmem:[%s11161_s11 + $0x130] sm:$0xff]  ;;  %v145_v42 = vld [vmem:[%s11161_s11 + $0x1a8] sm:$0xff]  ;;  %v96_v45 = vld [vmem:[%s11161_s11 + $0x20] sm:$0xff] }
  0x22   :  { %8104 = vmatprep.subr.mxu1 %v149_v26  ;;  %8071 = vmatprep.subr.mxu0 %v116_v27  ;;  %v129_v44 = vld [vmem:[%s11161_s11 + $0x128] sm:$0xff]  ;;  %v144_v46 = vld [vmem:[%s11161_s11 + $0x1a0] sm:$0xff]  ;;  %v111_v47 = vld [vmem:[%s11161_s11 + $0x98] sm:$0xff] }
  0x23   :  { %8105 = vmatpush3.msra.mxu1 %v133_v28  ;;  %8072 = vmatpush3.msra.mxu0 %v100_v29  ;;  %v128_v48 = vld [vmem:[%s11161_s11 + $0x120] sm:$0xff]  ;;  %v95_v49 = vld [vmem:[%s11161_s11 + $0x18] sm:$0xff]  ;;  %v110_v51 = vld [vmem:[%s11161_s11 + $0x90] sm:$0xff] }
  0x24   :  { %8106 = vmatprep.subr.mxu1 %v148_v30  ;;  %8073 = vmatprep.subr.mxu0 %v115_v31  ;;  %v143_v50 = vld [vmem:[%s11161_s11 + $0x198] sm:$0xff]  ;;  %v94_v53 = vld [vmem:[%s11161_s11 + $0x10] sm:$0xff]  ;;  %v109_v55 = vld [vmem:[%s11161_s11 + $0x88] sm:$0xff] }
  0x25   :  { %8107 = vmatpush3.msra.mxu1 %v132_v32  ;;  %8074 = vmatpush3.msra.mxu0 %v99_v33  ;;  %v127_v52 = vld [vmem:[%s11161_s11 + $0x118] sm:$0xff]  ;;  %v142_v54 = vld [vmem:[%s11161_s11 + $0x190] sm:$0xff]  ;;  %v93_v57 = vld [vmem:[%s11161_s11 + $0x8] sm:$0xff] }
  0x26   :  { %8108 = vmatprep.subr.mxu1 %v147_v34  ;;  %8075 = vmatprep.subr.mxu0 %v114_v35  ;;  %v126_v56 = vld [vmem:[%s11161_s11 + $0x110] sm:$0xff]  ;;  %v141_v58 = vld [vmem:[%s11161_s11 + $0x188] sm:$0xff]  ;;  %v108_v59 = vld [vmem:[%s11161_s11 + $0x80] sm:$0xff] }
  0x27   :  { %8109 = vmatpush3.msra.mxu1 %v131_v36  ;;  %8076 = vmatpush3.msra.mxu0 %v98_v37  ;;  %v87_v60 = vld [vmem:[%s11162_s8 + $0x8] sm:$0xff]  ;;  %v92_v61 = vld [vmem:[%s11161_s11] sm:$0xff]  ;;  %v187_v1 = vld [vmem:[%s11161_s11 + $0x2f8] sm:$0xff] }
  0x28   :  { %8110 = vmatprep.subr.mxu1 %v146_v38  ;;  %8077 = vmatprep.subr.mxu0 %v113_v39  ;;  %v125_v62 = vld [vmem:[%s11161_s11 + $0x108] sm:$0xff]  ;;  %v86_v63 = vld [vmem:[%s11162_s8] sm:$0xff]  ;;  %v89_v3 = vld [vmem:[%s11162_s8 + $0x18] sm:$0xff] }
  0x29   :  { %8111 = vmatpush3.msra.mxu1 %v130_v40  ;;  %8078 = vmatpush3.msra.mxu0 %v97_v41  ;;  %v140_v0 = vld [vmem:[%s11161_s11 + $0x180] sm:$0xff]  ;;  %v171_v4 = vld [vmem:[%s11161_s11 + $0x278] sm:$0xff]  ;;  %v88_v5 = vld [vmem:[%s11162_s8 + $0x10] sm:$0xff] }
  0x2a   :  { %8112 = vmatprep.subr.mxu1 %v145_v42  ;;  %8079 = vmatprep.subr.mxu0 %v112_v43  ;;  %v124_v2 = vld [vmem:[%s11161_s11 + $0x100] sm:$0xff]  ;;  %v186_v6 = vld [vmem:[%s11161_s11 + $0x2f0] sm:$0xff]  ;;  %v91_v8 = vld [vmem:[%s11162_s8 + $0x28] sm:$0xff] }
  0x2b   :  { %8113 = vmatpush3.msra.mxu1 %v129_v44  ;;  %8080 = vmatpush3.msra.mxu0 %v96_v45  ;;  %v170_v7 = vld [vmem:[%s11161_s11 + $0x270] sm:$0xff]  ;;  %v185_v9 = vld [vmem:[%s11161_s11 + $0x2e8] sm:$0xff]  ;;  %v184_v11 = vld [vmem:[%s11161_s11 + $0x2e0] sm:$0xff] }
  0x2c   :  { %8114 = vmatprep.subr.mxu1 %v144_v46  ;;  %8081 = vmatprep.subr.mxu0 %v111_v47  ;;  %v169_v10 = vld [vmem:[%s11161_s11 + $0x268] sm:$0xff]  ;;  %v168_v12 = vld [vmem:[%s11161_s11 + $0x260] sm:$0xff]  ;;  %v183_v13 = vld [vmem:[%s11161_s11 + $0x2d8] sm:$0xff] }
  0x2d   :  { %8115 = vmatpush3.msra.mxu1 %v128_v48  ;;  %8082 = vmatpush3.msra.mxu0 %v95_v49  ;;  %v167_v14 = vld [vmem:[%s11161_s11 + $0x258] sm:$0xff]  ;;  %v182_v15 = vld [vmem:[%s11161_s11 + $0x2d0] sm:$0xff]  ;;  %v181_v17 = vld [vmem:[%s11161_s11 + $0x2c8] sm:$0xff] }
  0x2e   :  { %8116 = vmatprep.subr.mxu1 %v143_v50  ;;  %8083 = vmatprep.subr.mxu0 %v110_v51  ;;  %v166_v16 = vld [vmem:[%s11161_s11 + $0x250] sm:$0xff]  ;;  %v165_v18 = vld [vmem:[%s11161_s11 + $0x248] sm:$0xff]  ;;  %v180_v19 = vld [vmem:[%s11161_s11 + $0x2c0] sm:$0xff] }
  0x2f   :  { %8117 = vmatpush3.msra.mxu1 %v127_v52  ;;  %8084 = vmatpush3.msra.mxu0 %v94_v53  ;;  %v164_v20 = vld [vmem:[%s11161_s11 + $0x240] sm:$0xff]  ;;  %v179_v21 = vld [vmem:[%s11161_s11 + $0x2b8] sm:$0xff]  ;;  %v178_v23 = vld [vmem:[%s11161_s11 + $0x2b0] sm:$0xff] }
  0x30   :  { %8118 = vmatprep.subr.mxu1 %v142_v54  ;;  %8085 = vmatprep.subr.mxu0 %v109_v55  ;;  %v163_v22 = vld [vmem:[%s11161_s11 + $0x238] sm:$0xff]  ;;  %v162_v24 = vld [vmem:[%s11161_s11 + $0x230] sm:$0xff]  ;;  %v177_v25 = vld [vmem:[%s11161_s11 + $0x2a8] sm:$0xff] }
  0x31   :  { %8119 = vmatpush3.msra.mxu1 %v126_v56  ;;  %8086 = vmatpush3.msra.mxu0 %v93_v57  ;;  %v161_v26 = vld [vmem:[%s11161_s11 + $0x228] sm:$0xff]  ;;  %v176_v27 = vld [vmem:[%s11161_s11 + $0x2a0] sm:$0xff]  ;;  %v175_v29 = vld [vmem:[%s11161_s11 + $0x298] sm:$0xff] }
  0x32   :  { %8120 = vmatprep.subr.mxu1 %v141_v58  ;;  %8087 = vmatprep.subr.mxu0 %v108_v59  ;;  %v160_v28 = vld [vmem:[%s11161_s11 + $0x220] sm:$0xff]  ;;  %v159_v30 = vld [vmem:[%s11161_s11 + $0x218] sm:$0xff]  ;;  %v174_v31 = vld [vmem:[%s11161_s11 + $0x290] sm:$0xff] }
  0x33   :  { %259 = vmatprep.mubr.f32.mxu0 %v87_v60  ;;  %8088 = vmatpush3.msra.mxu0 %v92_v61  ;;  %v158_v32 = vld [vmem:[%s11161_s11 + $0x210] sm:$0xff]  ;;  %v173_v33 = vld [vmem:[%s11161_s11 + $0x288] sm:$0xff]  ;;  %v172_v35 = vld [vmem:[%s11161_s11 + $0x280] sm:$0xff] }
  0x34   :  { %8121 = vmatpush3.msra.mxu1 %v125_v62  ;;  %260 = vmatmul.mubr.f32.vlgmr.msra.gmra.mxu0 %v86_v63  ;;  %v157_v34 = vld [vmem:[%s11161_s11 + $0x208] sm:$0xff]  ;;  %v156_v36 = vld [vmem:[%s11161_s11 + $0x200] sm:$0xff] }
  0x35   :  { %8122 = vmatprep.subr.mxu1 %v140_v0  ;;  %8127 = vmatprep.subr.mxu0 %v187_v1  ;;  %v90_v37 = vld [vmem:[%s11162_s8 + $0x20] sm:$0xff]  ;;  %v406_v52 = vld [vmem:[%s11163_s7 + $0x8] sm:$0x3]  ;;  %s11171_s8 = sld [smem:[#allocation12_spill]] }
  0x36   :  { %8123 = vmatpush3.msra.mxu1 %v124_v2  ;;  %329 = vmatprep.mubr.f32.mxu1 %v89_v3  ;;  %v405_v38 = vld [vmem:[%s11163_s7] sm:$0xff]  ;;  %v408_v55 = vld [vmem:[%s11165_s1 + $0x8] sm:$0x3] }
  0x37   :  { %8128 = vmatpush3.msra.mxu0 %v171_v4  ;;  %330 = vmatmul.mubr.f32.vlgmr.msra.gmra.mxu1 %v88_v5  ;;  %v7656_v43 = vld [vmem:[%s11164_s28] ss:$0 sm:$0xff]  ;;  %s11169_s28 = sld [smem:[#allocation10_spill]] }
  0x38   :  { %8129 = vmatprep.subr.mxu0 %v186_v6  ;;  %399 = vmatprep.mubr.f32.mxu0 %v91_v8  ;;  %v407_v54 = vld [vmem:[%s11165_s1] sm:$0xff]  ;;  %v542_v8 = vld [vmem:[%s11166_s4 + $0x10] sm:$0xff] }
  0x39   :  { %8130 = vmatpush3.msra.mxu0 %v170_v7  ;;  %8442 = vmatprep.mubr.msk.f32.mxu1 %vm409_vm0, %v405_v38  ;;  %v543_v7 = vld [vmem:[%s11166_s4 + $0x18] sm:$0xff] }
  0x3a   :  { %8131 = vmatprep.subr.mxu0 %v185_v9  ;;  %v541_v9 = vld [vmem:[%s11166_s4 + $0x8] sm:$0xff] }
  0x3b   :  { %8132 = vmatpush3.msra.mxu0 %v169_v10  ;;  %v540_v10 = vld [vmem:[%s11166_s4] sm:$0xff] }
  0x3c   :  { %8133 = vmatprep.subr.mxu0 %v184_v11  ;;  %v7667_v11 = vld [vmem:[%s11166_s4 + $0x38] sm:$0xff] }
  0x3d   :  { %8134 = vmatpush3.msra.mxu0 %v168_v12 }
  0x3e   :  { %8135 = vmatprep.subr.mxu0 %v183_v13 }
  0x3f   :  { %8136 = vmatpush3.msra.mxu0 %v167_v14 }
  0x40   :  { %8137 = vmatprep.subr.mxu0 %v182_v15 }
  0x41   :  { %8138 = vmatpush3.msra.mxu0 %v166_v16 }
  0x42   :  { %8139 = vmatprep.subr.mxu0 %v181_v17 }
  0x43   :  { %8140 = vmatpush3.msra.mxu0 %v165_v18 }
  0x44   :  { %8141 = vmatprep.subr.mxu0 %v180_v19  ;;  %v7659_v19 = vld [vmem:[%s11167_s12] ss:$0 sm:$0xff] }
  0x45   :  { %8142 = vmatpush3.msra.mxu0 %v164_v20 }
  0x46   :  { %8143 = vmatprep.subr.mxu0 %v179_v21  ;;  %v7660_v21 = vld [vmem:[%s11168_s9] ss:$0 sm:$0xff] }
  0x47   :  { %8144 = vmatpush3.msra.mxu0 %v163_v22 }
  0x48   :  { %8145 = vmatprep.subr.mxu0 %v178_v23 }
  0x49   :  { %8146 = vmatpush3.msra.mxu0 %v162_v24 }
  0x4a   :  { %8147 = vmatprep.subr.mxu0 %v177_v25 }
  0x4b   :  { %8148 = vmatpush3.msra.mxu0 %v161_v26 }
  0x4c   :  { %8149 = vmatprep.subr.mxu0 %v176_v27 }
  0x4d   :  { %8150 = vmatpush3.msra.mxu0 %v160_v28  ;;  %v7666_v28 = vld [vmem:[%s11166_s4 + $0x30] sm:$0xff] }
  0x4e   :  { %8151 = vmatprep.subr.mxu0 %v175_v29  ;;  %v7665_v29 = vld [vmem:[%s11166_s4 + $0x28] sm:$0xff] }
  0x4f   :  { %8152 = vmatpush3.msra.mxu0 %v159_v30  ;;  %v7664_v30 = vld [vmem:[%s11166_s4 + $0x20] sm:$0xff] }
  0x50   :  { %8153 = vmatprep.subr.mxu0 %v174_v31  ;;  %v7675_v31 = vld [vmem:[%s11166_s4 + $0x58] sm:$0xff] }
  0x51   :  { %8154 = vmatpush3.msra.mxu0 %v158_v32  ;;  %v7674_v32 = vld [vmem:[%s11166_s4 + $0x50] sm:$0xff] }
  0x52   :  { %8155 = vmatprep.subr.mxu0 %v173_v33  ;;  %v7673_v33 = vld [vmem:[%s11166_s4 + $0x48] sm:$0xff] }
  0x53   :  { %8156 = vmatpush3.msra.mxu0 %v157_v34  ;;  %v7672_v34 = vld [vmem:[%s11166_s4 + $0x40] sm:$0xff] }
  0x54   :  { %8157 = vmatprep.subr.mxu0 %v172_v35 }
  0x55   :  { %8158 = vmatpush3.msra.mxu0 %v156_v36  ;;  %v7661_v36 = vld [vmem:[%s11169_s28] ss:$0 sm:$0xff] }
  0x56   :  { %400 = vmatmul.mubr.f32.vlgmr.msra.gmra.mxu0 %v90_v37 }
  0xf4   :  { %v8089_v39 = vpop.f32.mrf.mxu0 }
  0xf6   :  { %v8090_v40 = vpop.f32.mrf.mxu0 }
  0xf7   :  { %v8124_v41 = vpop.f32.mrf.mxu1  ;;  %v8091_v42 = vadd.f32 %v8090_v40, %v8089_v39  ;;  %v9620_v39 = vld [vmem:[%s11170_s6] ss:$0 sm:$0xff]  ;;  %v9625_v40 = vld [vmem:[%s11170_s6 + $0x1] ss:$0 sm:$0xff] }
  0xf9   :  { %v8125_v44 = vpop.f32.mrf.mxu1  ;;  %v262_v45 = vadd.f32 %v8091_v42, %v7656_v43  ;;  %v7669_v43 = vld [vmem:[%s11169_s28 + $0x1] ss:$0 sm:$0xff] }
  0xfa   :  { %v8126_v46 = vadd.f32 %v8125_v44, %v8124_v41 }
  0xfc   :  { %v332_v49 = vadd.f32 %v8126_v46, %v262_v45 }
 0x116   :  { %v8159_v47 = vpop.f32.mrf.mxu0 }
 0x118   :  { %v8160_v48 = vpop.f32.mrf.mxu0 }
 0x119   :  { %v8161_v50 = vadd.f32 %v8160_v48, %v8159_v47 }
 0x11b   :  { %v402_v51 = vadd.f32 %v8161_v50, %v332_v49  ;;  %v7677_v49 = vld [vmem:[%s11169_s28 + $0x2] ss:$0 sm:$0xff] }
 0x11d   :  { %8440 = vmatprep.subr.mxu1 %v402_v51 }
 0x11e   :  { %8441 = vmatpush3.msra.mxu1 %v402_v51 }
 0x11f   :  { %8443 = vmatmul.mubr.msk.f32.vlgmr.msra.gmra.mxu1 %vm409_vm0, %v406_v52  ;;  %8445 = vmatprep.subr.mxu1 %v543_v7 }
 0x120   :  { %8446 = vmatpush3.msra.mxu1 %v543_v7  ;;  %v9665_v7 = vld [vmem:[%s11171_s8 + $0x8] sm:$0x3] }
 0x121   :  { %8447 = vmatprep.subr.mxu1 %v542_v8 }
 0x122   :  { %8448 = vmatpush3.msra.mxu1 %v542_v8 }
 0x123   :  { %8449 = vmatprep.subr.mxu1 %v541_v9 }
 0x124   :  { %8450 = vmatpush3.msra.mxu1 %v541_v9 }
 0x125   :  { %8451 = vmatprep.subr.mxu1 %v540_v10 }
 0x126   :  { %8452 = vmatpush3.msra.mxu1 %v540_v10 }
 0x127   :  { %8456 = vmatprep.subr.mxu1 %v7667_v11 }
 0x1df   :  { %v8444_v53 = vpop.f32.mrf.mxu1 }
 0x1e0   :  { %v9556_v58 = vadd.f32 %v8444_v53, %v408_v55 }
 0x1e1   :  { %v482_v56 = vpop.f32.mrf.mxu1 }
 0x1e2   :  { %v9554_v57 = vadd.f32 %v482_v56, %v407_v54  ;;  %v500_v60 = vsel %vm499_vm2, %v9556_v58, 0.0 }
 0x1e4   :  { %v496_v59 = vsel %vm495_vm1, %v9554_v57, 0.0 }
 0x1e5   :  { %497 = vadd.xlane.f32.xlu0 %v496_v59 }
 0x1e9   :  { %501 = vadd.xlane.f32.xlu0 %v500_v60 }
 0x26e   :  { %v498_v61 = vpop.xlane.xlu0 %497 }
 0x26f   :  { %v504_v62 = vmul.f32 0.03125, %v498_v61 }
 0x271   :  { %v506_v63 = vsub.f32 %v9554_v57, %v504_v62 }
 0x272   :  { %v502_v0 = vpop.xlane.xlu0 %501 }
 0x273   :  { %v505_v1 = vmul.f32 0.03125, %v502_v0  ;;  %v508_v2 = vmul.f32 %v506_v63, %v506_v63 }
 0x275   :  { %v507_v3 = vsub.f32 %v9556_v58, %v505_v1  ;;  %v510_v4 = vsel %vm495_vm1, %v508_v2, 0.0  ;;  %v9660_v2 = vld [vmem:[%s11171_s8] sm:$0xff] }
 0x276   :  { %511 = vadd.xlane.f32.xlu1 %v510_v4 }
 0x277   :  { %v509_v5 = vmul.f32 %v507_v3, %v507_v3 }
 0x279   :  { %v513_v6 = vsel %vm499_vm2, %v509_v5, 0.0 }
 0x27a   :  { %514 = vadd.xlane.f32.xlu1 %v513_v6 }
 0x2ff   :  { %v512_v12 = vpop.xlane.xlu1 %511 }
 0x300   :  { %v516_v13 = vmul.f32 0.03125, %v512_v12 }
 0x302   :  { %v518_v14 = vadd.f32 1e-12, %v516_v13 }
 0x303   :  { %v515_v15 = vpop.xlane.xlu1 %514 }
 0x304   :  { %9023 = vrsqrt.f32 %v518_v14  ;;  %v517_v16 = vmul.f32 0.03125, %v515_v15 }
 0x306   :  { %v519_v17 = vadd.f32 1e-12, %v517_v16 }
 0x308   :  { %9025 = vrsqrt.f32 %v519_v17 }
 0x311   :  { %v9024_v18 = vpop.eup %9023 }
 0x312   :  { %v522_v20 = vmul.f32 %v9024_v18, %v506_v63 }
 0x314   :  { %v530_v22 = vmul.f32 %v7659_v19, %v522_v20 }
 0x315   :  { %v9026_v23 = vpop.eup %9025 }
 0x316   :  { %v523_v24 = vmul.f32 %v9026_v23, %v507_v3  ;;  %v538_v25 = vadd.f32 %v7660_v21, %v530_v22 }
 0x318   :  { %v531_v26 = vmul.f32 %v7659_v19, %v523_v24  ;;  %8453 = vmatprep.mubr.msk.f32.mxu1 %vm495_vm1, %v538_v25 }
 0x31a   :  { %v539_v27 = vadd.f32 %v7660_v21, %v531_v26 }
 0x31c   :  { %8454 = vmatmul.mubr.msk.f32.vlgmr.msra.gmra.mxu1 %vm495_vm1, %v539_v27 }
 0x31d   :  { %8457 = vmatpush3.msra.mxu1 %v7667_v11  ;;  %8464 = vmatprep.mubr.msk.f32.mxu1 %vm495_vm1, %v538_v25 }
 0x31e   :  { %8458 = vmatprep.subr.mxu1 %v7666_v28 }
 0x31f   :  { %8459 = vmatpush3.msra.mxu1 %v7666_v28 }
 0x320   :  { %8460 = vmatprep.subr.mxu1 %v7665_v29 }
 0x321   :  { %8461 = vmatpush3.msra.mxu1 %v7665_v29 }
 0x322   :  { %8462 = vmatprep.subr.mxu1 %v7664_v30 }
 0x323   :  { %8463 = vmatpush3.msra.mxu1 %v7664_v30 }
 0x324   :  { %8465 = vmatmul.mubr.msk.f32.vlgmr.msra.gmra.mxu1 %vm495_vm1, %v539_v27  ;;  %8467 = vmatprep.subr.mxu1 %v7675_v31 }
 0x325   :  { %8468 = vmatpush3.msra.mxu1 %v7675_v31  ;;  %8475 = vmatprep.mubr.msk.f32.mxu1 %vm495_vm1, %v538_v25 }
 0x326   :  { %8469 = vmatprep.subr.mxu1 %v7674_v32 }
 0x327   :  { %8470 = vmatpush3.msra.mxu1 %v7674_v32 }
 0x328   :  { %8471 = vmatprep.subr.mxu1 %v7673_v33 }
 0x329   :  { %8472 = vmatpush3.msra.mxu1 %v7673_v33 }
 0x32a   :  { %8473 = vmatprep.subr.mxu1 %v7672_v34 }
 0x32b   :  { %8474 = vmatpush3.msra.mxu1 %v7672_v34 }
 0x32c   :  { %8476 = vmatmul.mubr.msk.f32.vlgmr.msra.gmra.mxu1 %vm495_vm1, %v539_v27 }
 0x3dc   :  { %v8455_v35 = vpop.f32.mrf.mxu1 }
 0x3dd   :  { %v629_v48 = vadd.f32 %v8455_v35, %v7661_v36 }
 0x3de   :  { %v623_v37 = vpop.f32.mrf.mxu1 }
 0x3df   :  { %v624_v38 = vadd.f32 %v7661_v36, %v623_v37  ;;  %v816_v51 = vmul.f32 %v9620_v39, %v629_v48  ;;  %v943_v52 = vmul.f32 %v9625_v40, %v629_v48  ;;  %v1225_v36 = vld [vmem:[%s11172_s2 + $0x18] sm:$0xff] }
 0x3e1   :  { %v815_v41 = vmul.f32 %v9620_v39, %v624_v38  ;;  %v942_v42 = vmul.f32 %v9625_v40, %v624_v38 }
 0x3e3   :  { %8482 = vmatprep.mubr.msk.f32.mxu1 %vm495_vm1, %v815_v41  ;;  %8489 = vmatprep.mubr.msk.f32.mxu0 %vm495_vm1, %v942_v42 }
 0x3e4   :  { %v8466_v44 = vpop.f32.mrf.mxu1 }
 0x3e5   :  { %v717_v45 = vadd.f32 %v8466_v44, %v7669_v43 }
 0x3e6   :  { %v711_v46 = vpop.f32.mrf.mxu1 }
 0x3e7   :  { %v712_v47 = vadd.f32 %v7669_v43, %v711_v46  ;;  %8478 = vmatprep.subr.msk.mxu1 %vm495_vm1, %v717_v45  ;;  %8485 = vmatprep.subr.msk.mxu0 %vm495_vm1, %v717_v45 }
 0x3e8   :  { %8479 = vmatpush3.xpose.msk.msra.mxu1 %vm495_vm1, %v717_v45  ;;  %8486 = vmatpush3.xpose.msk.msra.mxu0 %vm495_vm1, %v717_v45 }
 0x3e9   :  { %8480 = vmatprep.subr.msk.mxu1 %vm495_vm1, %v712_v47  ;;  %8487 = vmatprep.subr.msk.mxu0 %vm495_vm1, %v712_v47 }
 0x3ec   :  { %v8477_v50 = vpop.f32.mrf.mxu1  ;;  %8481 = vmatpush3.xpose.msk.msra.mxu1 %vm495_vm1, %v712_v47  ;;  %8488 = vmatpush3.xpose.msk.msra.mxu0 %vm495_vm1, %v712_v47 }
 0x3ed   :  { %v805_v53 = vadd.f32 %v8477_v50, %v7677_v49 }
 0x3ee   :  { %v799_v54 = vpop.f32.mrf.mxu1 }
 0x3ef   :  { %v933_v55 = vmul.f32 %v9620_v39, %v805_v53  ;;  %v1052_v56 = vmul.f32 %v9625_v40, %v805_v53  ;;  %v800_v59 = vadd.f32 %v7677_v49, %v799_v54  ;;  %8483 = vmatmul.mubr.msk.f32.vlgmr.msra.gmra.mxu1 %vm495_vm1, %v816_v51  ;;  %8490 = vmatmul.mubr.msk.f32.vlgmr.msra.gmra.mxu0 %vm495_vm1, %v943_v52  ;;  %v1224_v51 = vld [vmem:[%s11172_s2 + $0x10] sm:$0xff]  ;;  %v1223_v52 = vld [vmem:[%s11172_s2 + $0x8] sm:$0xff]  ;;  %v1222_v53 = vld [vmem:[%s11172_s2] sm:$0xff] }
 0x3f1   :  { %v932_v60 = vmul.f32 %v9620_v39, %v800_v59  ;;  %v1051_v61 = vmul.f32 %v9625_v40, %v800_v59  ;;  %8492 = vmatprep.subr.msk.mxu1 %vm1059_vm3, %v1052_v56  ;;  %8499 = vmatprep.subr.msk.mxu0 %vm1059_vm3, %v933_v55 }
 0x3f2   :  { %8493 = vmatpush3.msk.msra.mxu1 %vm1059_vm3, %v1052_v56  ;;  %8500 = vmatpush3.msk.msra.mxu0 %vm1059_vm3, %v933_v55 }
 0x3f3   :  { %8494 = vmatprep.subr.mxu1 %v1051_v61  ;;  %8501 = vmatprep.subr.mxu0 %v932_v60 }
 0x3f4   :  { %8495 = vmatpush3.msra.mxu1 %v1051_v61  ;;  %8502 = vmatpush3.msra.mxu0 %v932_v60 }
 0x3f5   :  { %8506 = vmatprep.subr.mxu1 %v1225_v36 }
 0x4af   :  { %v8484_v62 = vpop.f32.mrf.mxu1  ;;  %v8491_v63 = vpop.f32.mrf.mxu0 }
 0x4b0   :  { %v905_v3 = vmul.f32 0.25, %v8484_v62  ;;  %v1026_v4 = vmul.f32 0.25, %v8491_v63  ;;  %v7699_v63 = vld [vmem:[%s11122_s13] ss:$0 sm:$0xff] }
 0x4b1   :  { %v895_v0 = vpop.f32.mrf.mxu1  ;;  %v1016_v1 = vpop.f32.mrf.mxu0 }
 0x4b2   :  { %v904_v5 = vmul.f32 0.25, %v895_v0  ;;  %v1025_v6 = vmul.f32 0.25, %v1016_v1  ;;  %v1028_v12 = vadd.f32 %v1026_v4, %v9665_v7  ;;  %v907_v13 = vadd.f32 %v905_v3, %v9665_v7 }
 0x4b4   :  { %v1027_v8 = vadd.f32 %v1025_v6, %v9660_v2  ;;  %v906_v9 = vadd.f32 %v904_v5, %v9660_v2  ;;  %v1032_v14 = vsel %vm912_vm5, %v1028_v12, -inf  ;;  %v913_v15 = vsel %vm912_vm5, %v907_v13, -inf }
 0x4b6   :  { %v1029_v10 = vsel %vm908_vm4, %v1027_v8, -inf  ;;  %v909_v11 = vsel %vm908_vm4, %v906_v9, -inf }
 0x4b7   :  { %1030 = vmax.xlane.f32.xlu1 %v1029_v10  ;;  %910 = vmax.xlane.f32.xlu0 %v909_v11 }
 0x4bb   :  { %1033 = vmax.xlane.f32.xlu1 %v1032_v14  ;;  %914 = vmax.xlane.f32.xlu0 %v913_v15 }
 0x540   :  { %v1031_v16 = vpop.xlane.xlu1 %1030  ;;  %v911_v17 = vpop.xlane.xlu0 %910 }
 0x541   :  { %v1035_v18 = vsub.f32 %v1027_v8, %v1031_v16  ;;  %v916_v19 = vsub.f32 %v906_v9, %v911_v17  ;;  %v1367_v17 = vld [vmem:[%s11123_s14 + $0x18] sm:$0xff] }
 0x542   :  { %8517 = vmatprep.subr.mxu0 %v1367_v17 }
 0x543   :  { %v1037_v20 = vmul.f32 1.442695, %v1035_v18  ;;  %v918_v21 = vmul.f32 1.442695, %v916_v19  ;;  %v1366_v18 = vld [vmem:[%s11123_s14 + $0x10] sm:$0xff]  ;;  %v1365_v19 = vld [vmem:[%s11123_s14 + $0x8] sm:$0xff] }
 0x544   :  { %v1034_v22 = vpop.xlane.xlu1 %1033  ;;  %v915_v23 = vpop.xlane.xlu0 %914 }
 0x545   :  { %9027 = vpow2.f32 %v1037_v20  ;;  %v1036_v24 = vsub.f32 %v1028_v12, %v1034_v22  ;;  %v917_v25 = vsub.f32 %v907_v13, %v915_v23  ;;  %v1364_v20 = vld [vmem:[%s11123_s14] sm:$0xff] }
 0x546   :  { %9029 = vpow2.f32 %v918_v21 }
 0x547   :  { %v1039_v26 = vmul.f32 1.442695, %v1036_v24  ;;  %v920_v27 = vmul.f32 1.442695, %v917_v25 }
 0x549   :  { %9031 = vpow2.f32 %v1039_v26 }
 0x54a   :  { %9033 = vpow2.f32 %v920_v27 }
 0x552   :  { %v9028_v28 = vpop.eup %9027 }
 0x553   :  { %v9030_v29 = vpop.eup %9029  ;;  %v1041_v30 = vsel %vm908_vm4, %v9028_v28, 0.0 }
 0x554   :  { %1042 = vadd.xlane.f32.xlu1 %v1041_v30  ;;  %v922_v31 = vsel %vm908_vm4, %v9030_v29, 0.0 }
 0x555   :  { %923 = vadd.xlane.f32.xlu0 %v922_v31 }
 0x556   :  { %v9032_v32 = vpop.eup %9031 }
 0x557   :  { %v9034_v33 = vpop.eup %9033  ;;  %v1044_v34 = vsel %vm912_vm5, %v9032_v32, 0.0 }
 0x558   :  { %1045 = vadd.xlane.f32.xlu1 %v1044_v34  ;;  %v925_v35 = vsel %vm912_vm5, %v9034_v33, 0.0 }
 0x559   :  { %926 = vadd.xlane.f32.xlu0 %v925_v35 }
 0x5dd   :  { %v1043_v37 = vpop.xlane.xlu1 %1042 }
 0x5de   :  { %9035 = vrcp.f32 %v1043_v37  ;;  %v924_v38 = vpop.xlane.xlu0 %923  ;;  %v1489_v37 = vld [vmem:[%s11124_s16 + $0x78] sm:$0xff] }
 0x5df   :  { %9037 = vrcp.f32 %v924_v38  ;;  %v1488_v38 = vld [vmem:[%s11124_s16 + $0x70] sm:$0xff] }
 0x5e1   :  { %v1046_v41 = vpop.xlane.xlu1 %1045 }
 0x5e2   :  { %9039 = vrcp.f32 %v1046_v41  ;;  %v927_v42 = vpop.xlane.xlu0 %926  ;;  %v1487_v41 = vld [vmem:[%s11124_s16 + $0x68] sm:$0xff] }
 0x5e3   :  { %9041 = vrcp.f32 %v927_v42  ;;  %v1486_v42 = vld [vmem:[%s11124_s16 + $0x60] sm:$0xff] }
 0x5eb   :  { %v9036_v43 = vpop.eup %9035 }
 0x5ec   :  { %v9038_v44 = vpop.eup %9037  ;;  %v1049_v45 = vmul.f32 %v9036_v43, %v9028_v28  ;;  %v7702_v28 = vld [vmem:[%s11167_s12 + $0x1] ss:$0 sm:$0xff]  ;;  %v1485_v43 = vld [vmem:[%s11124_s16 + $0x58] sm:$0xff] }
 0x5ed   :  { %v930_v46 = vmul.f32 %v9038_v44, %v9030_v29  ;;  %v1484_v44 = vld [vmem:[%s11124_s16 + $0x50] sm:$0xff] }
 0x5ee   :  { %8496 = vmatprep.mubr.msk.f32.mxu1 %vm908_vm4, %v1049_v45  ;;  %v1483_v45 = vld [vmem:[%s11124_s16 + $0x48] sm:$0xff] }
 0x5ef   :  { %v9040_v47 = vpop.eup %9039  ;;  %8503 = vmatprep.mubr.msk.f32.mxu0 %vm908_vm4, %v930_v46  ;;  %v1482_v46 = vld [vmem:[%s11124_s16 + $0x40] sm:$0xff] }
 0x5f0   :  { %v9042_v48 = vpop.eup %9041  ;;  %v1050_v49 = vmul.f32 %v9040_v47, %v9032_v32  ;;  %v1481_v47 = vld [vmem:[%s11124_s16 + $0x38] sm:$0xff] }
 0x5f1   :  { %v931_v50 = vmul.f32 %v9042_v48, %v9034_v33  ;;  %v7703_v33 = vld [vmem:[%s11168_s9 + $0x1] ss:$0 sm:$0xff]  ;;  %v1480_v48 = vld [vmem:[%s11124_s16 + $0x30] sm:$0xff] }
 0x5f2   :  { %8497 = vmatmul.mubr.msk.f32.vlgmr.msra.gmra.mxu1 %vm908_vm4, %v1050_v49  ;;  %v1479_v49 = vld [vmem:[%s11124_s16 + $0x28] sm:$0xff] }
 0x5f3   :  { %8504 = vmatmul.mubr.msk.f32.vlgmr.msra.gmra.mxu0 %vm908_vm4, %v931_v50  ;;  %8507 = vmatpush3.msra.mxu1 %v1225_v36  ;;  %v1478_v50 = vld [vmem:[%s11124_s16 + $0x20] sm:$0xff] }
 0x5f4   :  { %8508 = vmatprep.subr.mxu1 %v1224_v51  ;;  %8518 = vmatpush3.msra.mxu0 %v1367_v17 }
 0x5f5   :  { %8509 = vmatpush3.msra.mxu1 %v1224_v51  ;;  %8519 = vmatprep.subr.mxu0 %v1366_v18  ;;  %v1477_v51 = vld [vmem:[%s11124_s16 + $0x18] sm:$0xff] }
 0x5f6   :  { %8510 = vmatprep.subr.mxu1 %v1223_v52  ;;  %8520 = vmatpush3.msra.mxu0 %v1366_v18 }
 0x5f7   :  { %8511 = vmatpush3.msra.mxu1 %v1223_v52  ;;  %8521 = vmatprep.subr.mxu0 %v1365_v19  ;;  %v1476_v52 = vld [vmem:[%s11124_s16 + $0x10] sm:$0xff] }
 0x5f8   :  { %8512 = vmatprep.subr.mxu1 %v1222_v53  ;;  %8522 = vmatpush3.msra.mxu0 %v1365_v19  ;;  %v7707_v19 = vld [vmem:[%s11126_s17] ss:$0 sm:$0xff] }
 0x5f9   :  { %8513 = vmatpush3.msra.mxu1 %v1222_v53  ;;  %8523 = vmatprep.subr.mxu0 %v1364_v20  ;;  %v1475_v53 = vld [vmem:[%s11124_s16 + $0x8] sm:$0xff] }
 0x5fa   :  { %8524 = vmatpush3.msra.mxu0 %v1364_v20  ;;  %8528 = vmatprep.subr.mxu1 %v1489_v37 }
 0x6b2   :  { %v8498_v54 = vpop.f32.mrf.mxu1 }
 0x6b3   :  { %v8505_v55 = vpop.f32.mrf.mxu0 }
 0x6b4   :  { %v1129_v56 = vpop.f32.mrf.mxu1  ;;  %v1219_v61 = vadd.f32 %v8505_v55, %v8498_v54  ;;  %v1474_v54 = vld [vmem:[%s11124_s16] sm:$0xff] }
 0x6b5   :  { %v1213_v59 = vpop.f32.mrf.mxu0  ;;  %v7704_v55 = vld [vmem:[%s11125_s15] ss:$0 sm:$0xff] }
 0x6b6   :  { %v1214_v60 = vadd.f32 %v1213_v59, %v1129_v56 }
 0x6b8   :  { %8514 = vmatprep.mubr.msk.f32.mxu1 %vm495_vm1, %v1214_v60 }
 0x6b9   :  { %8515 = vmatmul.mubr.msk.f32.vlgmr.msra.gmra.mxu1 %vm495_vm1, %v1219_v61 }
 0x6ba   :  { %8529 = vmatpush3.msra.mxu1 %v1489_v37  ;;  %v7713_v37 = vld [vmem:[%s11166_s4 + $0x68] sm:$0xff] }
 0x6bb   :  { %8530 = vmatprep.subr.mxu1 %v1488_v38 }
 0x6bc   :  { %8531 = vmatpush3.msra.mxu1 %v1488_v38  ;;  %v7712_v38 = vld [vmem:[%s11166_s4 + $0x60] sm:$0xff] }
 0x6bd   :  { %8532 = vmatprep.subr.mxu1 %v1487_v41 }
 0x6be   :  { %8533 = vmatpush3.msra.mxu1 %v1487_v41  ;;  %v7723_v41 = vld [vmem:[%s11166_s4 + $0x98] sm:$0xff] }
 0x6bf   :  { %8534 = vmatprep.subr.mxu1 %v1486_v42 }
 0x6c0   :  { %8535 = vmatpush3.msra.mxu1 %v1486_v42 }
 0x6c1   :  { %8536 = vmatprep.subr.mxu1 %v1485_v43 }
 0x6c2   :  { %8537 = vmatpush3.msra.mxu1 %v1485_v43 }
 0x6c3   :  { %8538 = vmatprep.subr.mxu1 %v1484_v44 }
 0x6c4   :  { %8539 = vmatpush3.msra.mxu1 %v1484_v44 }
 0x6c5   :  { %8540 = vmatprep.subr.mxu1 %v1483_v45 }
 0x6c6   :  { %8541 = vmatpush3.msra.mxu1 %v1483_v45 }
 0x6c7   :  { %8542 = vmatprep.subr.mxu1 %v1482_v46 }
 0x6c8   :  { %8543 = vmatpush3.msra.mxu1 %v1482_v46 }
 0x6c9   :  { %8544 = vmatprep.subr.mxu1 %v1481_v47 }
 0x6ca   :  { %8545 = vmatpush3.msra.mxu1 %v1481_v47 }
 0x6cb   :  { %8546 = vmatprep.subr.mxu1 %v1480_v48 }
 0x6cc   :  { %8547 = vmatpush3.msra.mxu1 %v1480_v48 }
 0x6cd   :  { %8548 = vmatprep.subr.mxu1 %v1479_v49 }
 0x6ce   :  { %8549 = vmatpush3.msra.mxu1 %v1479_v49  ;;  %v7710_v49 = vld [vmem:[%s11167_s12 + $0x2] ss:$0 sm:$0xff] }
 0x6cf   :  { %8550 = vmatprep.subr.mxu1 %v1478_v50 }
 0x6d0   :  { %8551 = vmatpush3.msra.mxu1 %v1478_v50 }
 0x6d1   :  { %8552 = vmatprep.subr.mxu1 %v1477_v51 }
 0x6d2   :  { %8553 = vmatpush3.msra.mxu1 %v1477_v51 }
 0x6d3   :  { %8554 = vmatprep.subr.mxu1 %v1476_v52 }
 0x6d4   :  { %8555 = vmatpush3.msra.mxu1 %v1476_v52 }
 0x6d5   :  { %8556 = vmatprep.subr.mxu1 %v1475_v53 }
 0x6d6   :  { %8557 = vmatpush3.msra.mxu1 %v1475_v53 }
 0x6d7   :  { %8558 = vmatprep.subr.mxu1 %v1474_v54 }
 0x6d8   :  { %8559 = vmatpush3.msra.mxu1 %v1474_v54  ;;  %v7711_v54 = vld [vmem:[%s11168_s9 + $0x2] ss:$0 sm:$0xff] }
 0x779   :  { %v8516_v62 = vpop.f32.mrf.mxu1 }
 0x77a   :  { %v1308_v0 = vadd.f32 %v8516_v62, %v9556_v58 }
 0x77b   :  { %v1298_v1 = vpop.f32.mrf.mxu1 }
 0x77c   :  { %v9701_v3 = vadd.f32 %v7699_v63, %v1308_v0  ;;  %v1307_v4 = vadd.f32 %v1298_v1, %v9554_v57 }
 0x77e   :  { %v9704_v5 = vadd.f32 %v7699_v63, %v1307_v4  ;;  %v1325_v6 = vsel %vm499_vm2, %v9701_v3, 0.0 }
 0x77f   :  { %1326 = vadd.xlane.f32.xlu1 %v1325_v6 }
 0x780   :  { %v1322_v8 = vsel %vm495_vm1, %v9704_v5, 0.0 }
 0x781   :  { %1323 = vadd.xlane.f32.xlu0 %v1322_v8 }
 0x808   :  { %v1327_v9 = vpop.xlane.xlu1 %1326 }
 0x809   :  { %v1329_v10 = vmul.f32 0.03125, %v1327_v9 }
 0x80a   :  { %v1324_v11 = vpop.xlane.xlu0 %1323 }
 0x80b   :  { %v1331_v58 = vsub.f32 %v9701_v3, %v1329_v10  ;;  %v1328_v12 = vmul.f32 0.03125, %v1324_v11 }
 0x80d   :  { %v1330_v13 = vsub.f32 %v9704_v5, %v1328_v12  ;;  %v1333_v14 = vmul.f32 %v1331_v58, %v1331_v58 }
 0x80f   :  { %v1337_v57 = vsel %vm499_vm2, %v1333_v14, 0.0  ;;  %v1332_v15 = vmul.f32 %v1330_v13, %v1330_v13 }
 0x810   :  { %1338 = vadd.xlane.f32.xlu1 %v1337_v57 }
 0x811   :  { %v1334_v16 = vsel %vm495_vm1, %v1332_v15, 0.0 }
 0x812   :  { %1335 = vadd.xlane.f32.xlu0 %v1334_v16 }
 0x899   :  { %v1339_v21 = vpop.xlane.xlu1 %1338 }
 0x89a   :  { %v1341_v22 = vmul.f32 0.03125, %v1339_v21 }
 0x89b   :  { %v1336_v23 = vpop.xlane.xlu0 %1335 }
 0x89c   :  { %v1343_v24 = vadd.f32 1e-12, %v1341_v22  ;;  %v1340_v25 = vmul.f32 0.03125, %v1336_v23 }
 0x89e   :  { %9043 = vrsqrt.f32 %v1343_v24  ;;  %v1342_v26 = vadd.f32 1e-12, %v1340_v25 }
 0x8a0   :  { %9045 = vrsqrt.f32 %v1342_v26 }
 0x8ab   :  { %v9044_v27 = vpop.eup %9043 }
 0x8ac   :  { %v1347_v29 = vmul.f32 %v9044_v27, %v1331_v58 }
 0x8ad   :  { %v9046_v30 = vpop.eup %9045 }
 0x8ae   :  { %v1346_v31 = vmul.f32 %v9046_v30, %v1330_v13  ;;  %v1355_v32 = vmul.f32 %v7702_v28, %v1347_v29 }
 0x8b0   :  { %v1354_v34 = vmul.f32 %v7702_v28, %v1346_v31  ;;  %v1363_v36 = vadd.f32 %v7703_v33, %v1355_v32 }
 0x8b2   :  { %v1362_v35 = vadd.f32 %v7703_v33, %v1354_v34 }
 0x8b4   :  { %8525 = vmatprep.mubr.msk.f32.mxu0 %vm495_vm1, %v1362_v35  ;;  %v7715_v35 = vld [vmem:[%s11166_s4 + $0x78] sm:$0xff] }
 0x8b5   :  { %8526 = vmatmul.mubr.msk.f32.vlgmr.msra.gmra.mxu0 %vm495_vm1, %v1363_v36  ;;  %v7714_v36 = vld [vmem:[%s11166_s4 + $0x70] sm:$0xff]  ;;  %8563 = vmatprep.subr.mxu0 %v7715_v35 }
 0x8b6   :  { %8564 = vmatpush3.msra.mxu0 %v7715_v35 }
 0x8b7   :  { %8565 = vmatprep.subr.mxu0 %v7714_v36 }
 0x8b8   :  { %8566 = vmatpush3.msra.mxu0 %v7714_v36 }
 0x8b9   :  { %8567 = vmatprep.subr.mxu0 %v7713_v37 }
 0x8ba   :  { %8568 = vmatpush3.msra.mxu0 %v7713_v37 }
 0x8bb   :  { %8569 = vmatprep.subr.mxu0 %v7712_v38 }
 0x8bc   :  { %8570 = vmatpush3.msra.mxu0 %v7712_v38 }
 0x8bd   :  { %8574 = vmatprep.subr.mxu0 %v7723_v41 }
 0x975   :  { %v8527_v56 = vpop.f32.mrf.mxu0 }
 0x976   :  { %v1453_v59 = vadd.f32 %v8527_v56, %v7704_v55 }
 0x977   :  { %v1447_v60 = vpop.f32.mrf.mxu0 }
 0x978   :  { %v1459_v61 = vmul.f32 0.044715, %v1453_v59  ;;  %v1448_v62 = vadd.f32 %v7704_v55, %v1447_v60  ;;  %v1457_v15 = vmul.f32 0.5, %v1453_v59  ;;  %v7722_v60 = vld [vmem:[%s11166_s4 + $0x90] sm:$0xff] }
 0x97a   :  { %v1461_v63 = vmul.f32 %v1459_v61, %v1453_v59  ;;  %v1458_v0 = vmul.f32 0.044715, %v1448_v62  ;;  %v1456_v14 = vmul.f32 0.5, %v1448_v62  ;;  %v7721_v61 = vld [vmem:[%s11166_s4 + $0x88] sm:$0xff] }
 0x97c   :  { %v1463_v1 = vmul.f32 %v1461_v63, %v1453_v59  ;;  %v1460_v4 = vmul.f32 %v1458_v0, %v1448_v62  ;;  %v7731_v63 = vld [vmem:[%s11166_s4 + $0xb8] sm:$0xff]  ;;  %v7730_v0 = vld [vmem:[%s11166_s4 + $0xb0] sm:$0xff] }
 0x97e   :  { %v1465_v6 = vadd.f32 %v1463_v1, %v1453_v59  ;;  %v1462_v8 = vmul.f32 %v1460_v4, %v1448_v62  ;;  %v7729_v1 = vld [vmem:[%s11166_s4 + $0xa8] sm:$0xff]  ;;  %v7728_v4 = vld [vmem:[%s11166_s4 + $0xa0] sm:$0xff] }
 0x980   :  { %v1464_v9 = vadd.f32 %v1462_v8, %v1448_v62  ;;  %v1467_v10 = vmul.f32 0.7978846, %v1465_v6  ;;  %v7720_v62 = vld [vmem:[%s11166_s4 + $0x80] sm:$0xff] }
 0x981   :  { %v7717_v8 = vld [vmem:[%s11169_s28 + $0x3] ss:$0 sm:$0xff] }
 0x982   :  { %v1466_v11 = vmul.f32 0.7978846, %v1464_v9  ;;  %9047 = vtanh.f32 %v1467_v10 }
 0x984   :  { %9049 = vtanh.f32 %v1466_v11 }
 0x98f   :  { %v9048_v58 = vpop.eup %9047 }
 0x990   :  { %v1471_v13 = vadd.f32 1.0, %v9048_v58 }
 0x991   :  { %v9050_v12 = vpop.eup %9049 }
 0x992   :  { %v1470_v57 = vadd.f32 1.0, %v9050_v12  ;;  %v1473_v17 = vmul.f32 %v1471_v13, %v1457_v15  ;;  %v7725_v12 = vld [vmem:[%s11169_s28 + $0x4] ss:$0 sm:$0xff] }
 0x994   :  { %v1472_v16 = vmul.f32 %v1470_v57, %v1456_v14 }
 0x996   :  { %8560 = vmatprep.mubr.f32.mxu1 %v1472_v16 }
 0x997   :  { %8561 = vmatmul.mubr.f32.vlgmr.msra.gmra.mxu1 %v1473_v17  ;;  %v7733_v17 = vld [vmem:[%s11169_s28 + $0x5] ss:$0 sm:$0xff] }
 0xa57   :  { %v8562_v18 = vpop.f32.mrf.mxu1 }
 0xa58   :  { %v1566_v20 = vadd.f32 %v8562_v18, %v9701_v3 }
 0xa59   :  { %v1556_v21 = vpop.f32.mrf.mxu1 }
 0xa5a   :  { %v9789_v22 = vadd.f32 %v7707_v19, %v1566_v20  ;;  %v1565_v23 = vadd.f32 %v1556_v21, %v9704_v5 }
 0xa5c   :  { %v9792_v24 = vadd.f32 %v7707_v19, %v1565_v23  ;;  %v1583_v25 = vsel %vm499_vm2, %v9789_v22, 0.0 }
 0xa5d   :  { %1584 = vadd.xlane.f32.xlu1 %v1583_v25 }
 0xa5e   :  { %v1580_v26 = vsel %vm495_vm1, %v9792_v24, 0.0 }
 0xa5f   :  { %1581 = vadd.xlane.f32.xlu0 %v1580_v26 }
 0xae6   :  { %v1585_v27 = vpop.xlane.xlu1 %1584 }
 0xae7   :  { %v1587_v28 = vmul.f32 0.03125, %v1585_v27 }
 0xae8   :  { %v1582_v29 = vpop.xlane.xlu0 %1581 }
 0xae9   :  { %v1589_v3 = vsub.f32 %v9789_v22, %v1587_v28  ;;  %v1586_v30 = vmul.f32 0.03125, %v1582_v29 }
 0xaeb   :  { %v1588_v31 = vsub.f32 %v9792_v24, %v1586_v30  ;;  %v1591_v32 = vmul.f32 %v1589_v3, %v1589_v3 }
 0xaed   :  { %v1595_v5 = vsel %vm499_vm2, %v1591_v32, 0.0  ;;  %v1590_v33 = vmul.f32 %v1588_v31, %v1588_v31 }
 0xaee   :  { %1596 = vadd.xlane.f32.xlu1 %v1595_v5 }
 0xaef   :  { %v1592_v34 = vsel %vm495_vm1, %v1590_v33, 0.0 }
 0xaf0   :  { %1593 = vadd.xlane.f32.xlu0 %v1592_v34 }
 0xb77   :  { %v1597_v42 = vpop.xlane.xlu1 %1596 }
 0xb78   :  { %v1599_v43 = vmul.f32 0.03125, %v1597_v42 }
 0xb79   :  { %v1594_v44 = vpop.xlane.xlu0 %1593 }
 0xb7a   :  { %v1601_v45 = vadd.f32 1e-12, %v1599_v43  ;;  %v1598_v46 = vmul.f32 0.03125, %v1594_v44 }
 0xb7c   :  { %9051 = vrsqrt.f32 %v1601_v45  ;;  %v1600_v47 = vadd.f32 1e-12, %v1598_v46 }
 0xb7e   :  { %9053 = vrsqrt.f32 %v1600_v47 }
 0xb89   :  { %v9052_v48 = vpop.eup %9051 }
 0xb8a   :  { %v1605_v50 = vmul.f32 %v9052_v48, %v1589_v3 }
 0xb8b   :  { %v9054_v51 = vpop.eup %9053 }
 0xb8c   :  { %v1604_v52 = vmul.f32 %v9054_v51, %v1588_v31  ;;  %v1613_v53 = vmul.f32 %v7710_v49, %v1605_v50 }
 0xb8e   :  { %v1612_v55 = vmul.f32 %v7710_v49, %v1604_v52  ;;  %v1621_v59 = vadd.f32 %v7711_v54, %v1613_v53 }
 0xb90   :  { %v1620_v56 = vadd.f32 %v7711_v54, %v1612_v55 }
 0xb92   :  { %8571 = vmatprep.mubr.msk.f32.mxu0 %vm495_vm1, %v1620_v56 }
 0xb93   :  { %8572 = vmatmul.mubr.msk.f32.vlgmr.msra.gmra.mxu0 %vm495_vm1, %v1621_v59 }
 0xb94   :  { %8575 = vmatpush3.msra.mxu0 %v7723_v41  ;;  %8582 = vmatprep.mubr.msk.f32.mxu0 %vm495_vm1, %v1620_v56 }
 0xb95   :  { %8576 = vmatprep.subr.mxu0 %v7722_v60 }
 0xb96   :  { %8577 = vmatpush3.msra.mxu0 %v7722_v60 }
 0xb97   :  { %8578 = vmatprep.subr.mxu0 %v7721_v61 }
 0xb98   :  { %8579 = vmatpush3.msra.mxu0 %v7721_v61 }
 0xb99   :  { %8580 = vmatprep.subr.mxu0 %v7720_v62 }
 0xb9a   :  { %8581 = vmatpush3.msra.mxu0 %v7720_v62 }
 0xb9b   :  { %8583 = vmatmul.mubr.msk.f32.vlgmr.msra.gmra.mxu0 %vm495_vm1, %v1621_v59  ;;  %8585 = vmatprep.subr.mxu0 %v7731_v63 }
 0xb9c   :  { %8586 = vmatpush3.msra.mxu0 %v7731_v63  ;;  %8593 = vmatprep.mubr.msk.f32.mxu0 %vm495_vm1, %v1620_v56 }
 0xb9d   :  { %8587 = vmatprep.subr.mxu0 %v7730_v0 }
 0xb9e   :  { %8588 = vmatpush3.msra.mxu0 %v7730_v0 }
 0xb9f   :  { %8589 = vmatprep.subr.mxu0 %v7729_v1 }
 0xba0   :  { %8590 = vmatpush3.msra.mxu0 %v7729_v1 }
 0xba1   :  { %8591 = vmatprep.subr.mxu0 %v7728_v4 }
 0xba2   :  { %8592 = vmatpush3.msra.mxu0 %v7728_v4 }
 0xba3   :  { %8594 = vmatmul.mubr.msk.f32.vlgmr.msra.gmra.mxu0 %vm495_vm1, %v1621_v59 }
 0xc53   :  { %v8573_v6 = vpop.f32.mrf.mxu0 }
 0xc54   :  { %v1713_v16 = vadd.f32 %v8573_v6, %v7717_v8 }
 0xc55   :  { %v1707_v9 = vpop.f32.mrf.mxu0 }
 0xc56   :  { %v1708_v10 = vadd.f32 %v7717_v8, %v1707_v9  ;;  %v1893_v19 = vmul.f32 %v9620_v39, %v1713_v16  ;;  %v2010_v20 = vmul.f32 %v9625_v40, %v1713_v16  ;;  %v7751_v16 = vld [vmem:[%s11172_s2 + $0x28] sm:$0xff] }
 0xc58   :  { %v1892_v11 = vmul.f32 %v9620_v39, %v1708_v10  ;;  %v2009_v58 = vmul.f32 %v9625_v40, %v1708_v10 }
 0xc5a   :  { %8600 = vmatprep.mubr.msk.f32.mxu0 %vm495_vm1, %v1892_v11  ;;  %8607 = vmatprep.mubr.msk.f32.mxu1 %vm495_vm1, %v2009_v58 }
 0xc5b   :  { %v8584_v13 = vpop.f32.mrf.mxu0 }
 0xc5c   :  { %v1801_v14 = vadd.f32 %v8584_v13, %v7725_v12 }
 0xc5d   :  { %v1795_v57 = vpop.f32.mrf.mxu0 }
 0xc5e   :  { %v1796_v15 = vadd.f32 %v7725_v12, %v1795_v57  ;;  %8596 = vmatprep.subr.msk.mxu0 %vm495_vm1, %v1801_v14  ;;  %8603 = vmatprep.subr.msk.mxu1 %vm495_vm1, %v1801_v14 }
 0xc5f   :  { %8597 = vmatpush3.xpose.msk.msra.mxu0 %vm495_vm1, %v1801_v14  ;;  %8604 = vmatpush3.xpose.msk.msra.mxu1 %vm495_vm1, %v1801_v14 }
 0xc60   :  { %8598 = vmatprep.subr.msk.mxu0 %vm495_vm1, %v1796_v15  ;;  %8605 = vmatprep.subr.msk.mxu1 %vm495_vm1, %v1796_v15 }
 0xc63   :  { %v8595_v18 = vpop.f32.mrf.mxu0  ;;  %8599 = vmatpush3.xpose.msk.msra.mxu0 %vm495_vm1, %v1796_v15  ;;  %8606 = vmatpush3.xpose.msk.msra.mxu1 %vm495_vm1, %v1796_v15  ;;  %v7753_v15 = vld [vmem:[%s11172_s2 + $0x38] sm:$0xff] }
 0xc64   :  { %v1889_v21 = vadd.f32 %v8595_v18, %v7733_v17  ;;  %8624 = vmatprep.subr.mxu1 %v7753_v15 }
 0xc65   :  { %v1883_v23 = vpop.f32.mrf.mxu0 }
 0xc66   :  { %v2119_v25 = vmul.f32 %v9625_v40, %v1889_v21  ;;  %v9874_v26 = vadd.f32 %v7733_v17, %v1883_v23  ;;  %8601 = vmatmul.mubr.msk.f32.vlgmr.msra.gmra.mxu0 %vm495_vm1, %v1893_v19  ;;  %8608 = vmatmul.mubr.msk.f32.vlgmr.msra.gmra.mxu1 %vm495_vm1, %v2010_v20  ;;  %v9883_v28 = vmul.f32 %v9620_v39, %v1889_v21  ;;  %v7750_v17 = vld [vmem:[%s11172_s2 + $0x20] sm:$0xff] }
 0xc67   :  { %8625 = vmatpush3.msra.mxu1 %v7753_v15  ;;  %v7770_v15 = vld [vmem:[%s11124_s16 + $0x80] sm:$0xff] }
 0xc68   :  { %v2118_v27 = vmul.f32 %v9625_v40, %v9874_v26  ;;  %8610 = vmatprep.subr.msk.mxu0 %vm1059_vm3, %v2119_v25  ;;  %v2007_v13 = vmul.f32 %v9620_v39, %v9874_v26  ;;  %v7752_v39 = vld [vmem:[%s11172_s2 + $0x30] sm:$0xff] }
 0xc69   :  { %8611 = vmatpush3.msk.msra.mxu0 %vm1059_vm3, %v2119_v25  ;;  %8626 = vmatprep.subr.mxu1 %v7752_v39 }
 0xc6a   :  { %8612 = vmatprep.subr.mxu0 %v2118_v27  ;;  %8627 = vmatpush3.msra.mxu1 %v7752_v39  ;;  %v7767_v39 = vld [vmem:[%s11125_s15 + $0x1] ss:$0 sm:$0xff] }
 0xc6b   :  { %8613 = vmatpush3.msra.mxu0 %v2118_v27  ;;  %8628 = vmatprep.subr.mxu1 %v7751_v16  ;;  %v7757_v27 = vld [vmem:[%s11122_s13 + $0x1] ss:$0 sm:$0xff] }
 0xc6c   :  { %8617 = vmatprep.subr.msk.mxu0 %vm1059_vm3, %v9883_v28  ;;  %8629 = vmatpush3.msra.mxu1 %v7751_v16 }
 0xc6d   :  { %8630 = vmatprep.subr.mxu1 %v7750_v17 }
 0xc6e   :  { %8631 = vmatpush3.msra.mxu1 %v7750_v17 }
 0xd26   :  { %v8602_v29 = vpop.f32.mrf.mxu0  ;;  %v8609_v3 = vpop.f32.mrf.mxu1 }
 0xd27   :  { %v1982_v30 = vmul.f32 0.25, %v8602_v29  ;;  %v2093_v31 = vmul.f32 0.25, %v8609_v3 }
 0xd28   :  { %v1972_v32 = vpop.f32.mrf.mxu0  ;;  %v2083_v5 = vpop.f32.mrf.mxu1 }
 0xd29   :  { %v1981_v33 = vmul.f32 0.25, %v1972_v32  ;;  %v2092_v40 = vmul.f32 0.25, %v2083_v5  ;;  %v2095_v34 = vadd.f32 %v2093_v31, %v9665_v7  ;;  %v1984_v37 = vadd.f32 %v1982_v30, %v9665_v7 }
 0xd2b   :  { %v2099_v35 = vsel %vm912_vm5, %v2095_v34, -inf  ;;  %v2094_v36 = vadd.f32 %v2092_v40, %v9660_v2  ;;  %v1983_v41 = vadd.f32 %v1981_v33, %v9660_v2  ;;  %v1988_v42 = vsel %vm912_vm5, %v1984_v37, -inf }
 0xd2c   :  { %2100 = vmax.xlane.f32.xlu1 %v2099_v35 }
 0xd2d   :  { %v2096_v38 = vsel %vm908_vm4, %v2094_v36, -inf  ;;  %v1985_v43 = vsel %vm908_vm4, %v1983_v41, -inf }
 0xd2e   :  { %2097 = vmax.xlane.f32.xlu0 %v2096_v38 }
 0xd30   :  { %1989 = vmax.xlane.f32.xlu1 %v1988_v42  ;;  %v7765_v42 = vld [vmem:[%s11123_s14 + $0x38] sm:$0xff] }
 0xd32   :  { %1986 = vmax.xlane.f32.xlu0 %v1985_v43  ;;  %v7764_v43 = vld [vmem:[%s11123_s14 + $0x30] sm:$0xff] }
 0xdb5   :  { %v2101_v44 = vpop.xlane.xlu1 %2100 }
 0xdb6   :  { %v2103_v45 = vsub.f32 %v2095_v34, %v2101_v44  ;;  %v7763_v44 = vld [vmem:[%s11123_s14 + $0x28] sm:$0xff] }
 0xdb7   :  { %v2098_v46 = vpop.xlane.xlu0 %2097 }
 0xdb8   :  { %v2106_v47 = vmul.f32 1.442695, %v2103_v45  ;;  %v2102_v48 = vsub.f32 %v2094_v36, %v2098_v46  ;;  %v7762_v45 = vld [vmem:[%s11123_s14 + $0x20] sm:$0xff] }
 0xdb9   :  { %v1990_v49 = vpop.xlane.xlu1 %1989 }
 0xdba   :  { %9055 = vpow2.f32 %v2106_v47  ;;  %v2104_v7 = vmul.f32 1.442695, %v2102_v48  ;;  %v1992_v50 = vsub.f32 %v1984_v37, %v1990_v49 }
 0xdbb   :  { %v1987_v51 = vpop.xlane.xlu0 %1986 }
 0xdbc   :  { %9057 = vpow2.f32 %v2104_v7  ;;  %v1995_v52 = vmul.f32 1.442695, %v1992_v50  ;;  %v1991_v2 = vsub.f32 %v1983_v41, %v1987_v51 }
 0xdbe   :  { %9059 = vpow2.f32 %v1995_v52  ;;  %v1993_v53 = vmul.f32 1.442695, %v1991_v2  ;;  %v7760_v52 = vld [vmem:[%s11167_s12 + $0x3] ss:$0 sm:$0xff] }
 0xdc0   :  { %9061 = vpow2.f32 %v1993_v53 }
 0xdc7   :  { %v9056_v54 = vpop.eup %9055 }
 0xdc8   :  { %v2111_v55 = vsel %vm912_vm5, %v9056_v54, 0.0 }
 0xdc9   :  { %v9058_v56 = vpop.eup %9057  ;;  %2112 = vadd.xlane.f32.xlu1 %v2111_v55 }
 0xdca   :  { %v2108_v59 = vsel %vm908_vm4, %v9058_v56, 0.0 }
 0xdcb   :  { %v9060_v60 = vpop.eup %9059  ;;  %2109 = vadd.xlane.f32.xlu0 %v2108_v59 }
 0xdcc   :  { %v2000_v61 = vsel %vm912_vm5, %v9060_v60, 0.0 }
 0xdcd   :  { %v9062_v62 = vpop.eup %9061  ;;  %2001 = vadd.xlane.f32.xlu1 %v2000_v61 }
 0xdce   :  { %v1997_v63 = vsel %vm908_vm4, %v9062_v62, 0.0 }
 0xdcf   :  { %1998 = vadd.xlane.f32.xlu0 %v1997_v63  ;;  %v7784_v63 = vld [vmem:[%s11124_s16 + $0xf0] sm:$0xff] }
 0xe52   :  { %v2113_v0 = vpop.xlane.xlu1 %2112 }
 0xe53   :  { %9063 = vrcp.f32 %v2113_v0  ;;  %v7783_v0 = vld [vmem:[%s11124_s16 + $0xe8] sm:$0xff] }
 0xe54   :  { %v2110_v1 = vpop.xlane.xlu0 %2109 }
 0xe55   :  { %9065 = vrcp.f32 %v2110_v1  ;;  %v7782_v1 = vld [vmem:[%s11124_s16 + $0xe0] sm:$0xff] }
 0xe56   :  { %v2002_v4 = vpop.xlane.xlu1 %2001 }
 0xe57   :  { %9067 = vrcp.f32 %v2002_v4  ;;  %v7781_v4 = vld [vmem:[%s11124_s16 + $0xd8] sm:$0xff] }
 0xe58   :  { %v1999_v6 = vpop.xlane.xlu0 %1998 }
 0xe59   :  { %9069 = vrcp.f32 %v1999_v6  ;;  %v7780_v6 = vld [vmem:[%s11124_s16 + $0xd0] sm:$0xff] }
 0xe60   :  { %v9064_v8 = vpop.eup %9063 }
 0xe61   :  { %v2117_v11 = vmul.f32 %v9064_v8, %v9056_v54  ;;  %v7779_v8 = vld [vmem:[%s11124_s16 + $0xc8] sm:$0xff] }
 0xe62   :  { %v9066_v9 = vpop.eup %9065 }
 0xe63   :  { %v2116_v10 = vmul.f32 %v9066_v9, %v9058_v56  ;;  %v7761_v56 = vld [vmem:[%s11168_s9 + $0x3] ss:$0 sm:$0xff] }
 0xe64   :  { %v9068_v58 = vpop.eup %9067  ;;  %v7778_v9 = vld [vmem:[%s11124_s16 + $0xc0] sm:$0xff] }
 0xe65   :  { %8614 = vmatprep.mubr.msk.f32.mxu0 %vm908_vm4, %v2116_v10  ;;  %v2006_v57 = vmul.f32 %v9068_v58, %v9060_v60  ;;  %v7777_v10 = vld [vmem:[%s11124_s16 + $0xb8] sm:$0xff]  ;;  %v7775_v58 = vld [vmem:[%s11124_s16 + $0xa8] sm:$0xff] }
 0xe66   :  { %v9070_v12 = vpop.eup %9069  ;;  %8615 = vmatmul.mubr.msk.f32.vlgmr.msra.gmra.mxu0 %vm908_vm4, %v2117_v11  ;;  %v7776_v11 = vld [vmem:[%s11124_s16 + $0xb0] sm:$0xff] }
 0xe67   :  { %8618 = vmatpush3.msk.msra.mxu0 %vm1059_vm3, %v9883_v28  ;;  %v2005_v14 = vmul.f32 %v9070_v12, %v9062_v62  ;;  %v7785_v62 = vld [vmem:[%s11124_s16 + $0xf8] sm:$0xff]  ;;  %v7774_v12 = vld [vmem:[%s11124_s16 + $0xa0] sm:$0xff] }
 0xe68   :  { %8619 = vmatprep.subr.mxu0 %v2007_v13  ;;  %8646 = vmatprep.subr.mxu1 %v7785_v62 }
 0xe69   :  { %8620 = vmatpush3.msra.mxu0 %v2007_v13  ;;  %8621 = vmatprep.mubr.msk.f32.mxu0 %vm908_vm4, %v2005_v14  ;;  %v7773_v13 = vld [vmem:[%s11124_s16 + $0x98] sm:$0xff]  ;;  %v7772_v14 = vld [vmem:[%s11124_s16 + $0x90] sm:$0xff] }
 0xe6a   :  { %8622 = vmatmul.mubr.msk.f32.vlgmr.msra.gmra.mxu0 %vm908_vm4, %v2006_v57  ;;  %8635 = vmatprep.subr.mxu0 %v7765_v42  ;;  %v7771_v57 = vld [vmem:[%s11124_s16 + $0x88] sm:$0xff] }
 0xe6b   :  { %8636 = vmatpush3.msra.mxu0 %v7765_v42 }
 0xe6c   :  { %8637 = vmatprep.subr.mxu0 %v7764_v43 }
 0xe6d   :  { %8638 = vmatpush3.msra.mxu0 %v7764_v43 }
 0xe6e   :  { %8639 = vmatprep.subr.mxu0 %v7763_v44 }
 0xe6f   :  { %8640 = vmatpush3.msra.mxu0 %v7763_v44 }
 0xe70   :  { %8641 = vmatprep.subr.mxu0 %v7762_v45 }
 0xe71   :  { %8642 = vmatpush3.msra.mxu0 %v7762_v45 }
 0xf26   :  { %v8616_v18 = vpop.f32.mrf.mxu0 }
 0xf28   :  { %v2195_v19 = vpop.f32.mrf.mxu0 }
 0xf2a   :  { %v8623_v20 = vpop.f32.mrf.mxu0 }
 0xf2b   :  { %v2285_v25 = vadd.f32 %v8623_v20, %v8616_v18 }
 0xf2c   :  { %v2279_v21 = vpop.f32.mrf.mxu0 }
 0xf2d   :  { %v2280_v23 = vadd.f32 %v2279_v21, %v2195_v19 }
 0xf2f   :  { %8632 = vmatprep.mubr.msk.f32.mxu1 %vm495_vm1, %v2280_v23 }
 0xf30   :  { %8633 = vmatmul.mubr.msk.f32.vlgmr.msra.gmra.mxu1 %vm495_vm1, %v2285_v25 }
 0xf31   :  { %8647 = vmatpush3.msra.mxu1 %v7785_v62 }
 0xf32   :  { %8648 = vmatprep.subr.mxu1 %v7784_v63 }
 0xf33   :  { %8649 = vmatpush3.msra.mxu1 %v7784_v63 }
 0xf34   :  { %8650 = vmatprep.subr.mxu1 %v7783_v0 }
 0xf35   :  { %8651 = vmatpush3.msra.mxu1 %v7783_v0  ;;  %v7788_v0 = vld [vmem:[%s11127_s18] ss:$0 sm:$0xff] }
 0xf36   :  { %8652 = vmatprep.subr.mxu1 %v7782_v1 }
 0xf37   :  { %8653 = vmatpush3.msra.mxu1 %v7782_v1 }
 0xf38   :  { %8654 = vmatprep.subr.mxu1 %v7781_v4 }
 0xf39   :  { %8655 = vmatpush3.msra.mxu1 %v7781_v4 }
 0xf3a   :  { %8656 = vmatprep.subr.mxu1 %v7780_v6 }
 0xf3b   :  { %8657 = vmatpush3.msra.mxu1 %v7780_v6  ;;  %v7789_v6 = vld [vmem:[%s11128_s19] ss:$0 sm:$0xff] }
 0xf3c   :  { %8658 = vmatprep.subr.mxu1 %v7779_v8 }
 0xf3d   :  { %8659 = vmatpush3.msra.mxu1 %v7779_v8 }
 0xf3e   :  { %8660 = vmatprep.subr.mxu1 %v7778_v9 }
 0xf3f   :  { %8661 = vmatpush3.msra.mxu1 %v7778_v9 }
 0xf40   :  { %8662 = vmatprep.subr.mxu1 %v7777_v10 }
 0xf41   :  { %8663 = vmatpush3.msra.mxu1 %v7777_v10 }
 0xf42   :  { %8664 = vmatprep.subr.mxu1 %v7776_v11 }
 0xf43   :  { %8665 = vmatpush3.msra.mxu1 %v7776_v11 }
 0xf44   :  { %8666 = vmatprep.subr.mxu1 %v7775_v58 }
 0xf45   :  { %8667 = vmatpush3.msra.mxu1 %v7775_v58 }
 0xf46   :  { %8668 = vmatprep.subr.mxu1 %v7774_v12 }
 0xf47   :  { %8669 = vmatpush3.msra.mxu1 %v7774_v12  ;;  %v2692_v12 = vld [vmem:[%s11129_s5] sm:$0xff] }
 0xf48   :  { %8670 = vmatprep.subr.mxu1 %v7773_v13 }
 0xf49   :  { %8671 = vmatpush3.msra.mxu1 %v7773_v13  ;;  %v10042_v13 = vld [vmem:[%s11130_s20] sm:$0xff] }
 0xf4a   :  { %8672 = vmatprep.subr.mxu1 %v7772_v14 }
 0xf4b   :  { %8673 = vmatpush3.msra.mxu1 %v7772_v14 }
 0xf4c   :  { %8674 = vmatprep.subr.mxu1 %v7771_v57 }
 0xf4d   :  { %8675 = vmatpush3.msra.mxu1 %v7771_v57 }
 0xf4e   :  { %8676 = vmatprep.subr.mxu1 %v7770_v15 }
 0xf4f   :  { %8677 = vmatpush3.msra.mxu1 %v7770_v15  ;;  %v10056_v15 = vld [vmem:[%s11130_s20 + $0x8] sm:$0xff] }
 0xff0   :  { %v8634_v26 = vpop.f32.mrf.mxu1 }
 0xff1   :  { %v2375_v28 = vadd.f32 %v8634_v26, %v9789_v22 }
 0xff2   :  { %v2365_v29 = vpop.f32.mrf.mxu1 }
 0xff3   :  { %v9925_v3 = vadd.f32 %v7757_v27, %v2375_v28  ;;  %v2374_v30 = vadd.f32 %v2365_v29, %v9792_v24 }
 0xff5   :  { %v9928_v31 = vadd.f32 %v7757_v27, %v2374_v30  ;;  %v2393_v32 = vsel %vm499_vm2, %v9925_v3, 0.0 }
 0xff6   :  { %2394 = vadd.xlane.f32.xlu1 %v2393_v32 }
 0xff7   :  { %v2390_v5 = vsel %vm495_vm1, %v9928_v31, 0.0 }
 0xff8   :  { %2391 = vadd.xlane.f32.xlu0 %v2390_v5 }
0x107f   :  { %v2395_v33 = vpop.xlane.xlu1 %2394 }
0x1080   :  { %v2397_v40 = vmul.f32 0.03125, %v2395_v33 }
0x1081   :  { %v2392_v34 = vpop.xlane.xlu0 %2391 }
0x1082   :  { %v2399_v22 = vsub.f32 %v9925_v3, %v2397_v40  ;;  %v2396_v35 = vmul.f32 0.03125, %v2392_v34 }
0x1084   :  { %v2398_v36 = vsub.f32 %v9928_v31, %v2396_v35  ;;  %v2401_v37 = vmul.f32 %v2399_v22, %v2399_v22 }
0x1086   :  { %v2405_v24 = vsel %vm499_vm2, %v2401_v37, 0.0  ;;  %v2400_v38 = vmul.f32 %v2398_v36, %v2398_v36 }
0x1087   :  { %2406 = vadd.xlane.f32.xlu1 %v2405_v24 }
0x1088   :  { %v2402_v41 = vsel %vm495_vm1, %v2400_v38, 0.0  ;;  %v7787_v38 = vld [vmem:[%s11126_s17 + $0x1] ss:$0 sm:$0xff] }
0x1089   :  { %2403 = vadd.xlane.f32.xlu0 %v2402_v41 }
0x1110   :  { %v2407_v46 = vpop.xlane.xlu1 %2406 }
0x1111   :  { %v2409_v47 = vmul.f32 0.03125, %v2407_v46 }
0x1112   :  { %v2404_v48 = vpop.xlane.xlu0 %2403 }
0x1113   :  { %v2411_v49 = vadd.f32 1e-12, %v2409_v47  ;;  %v2408_v7 = vmul.f32 0.03125, %v2404_v48 }
0x1115   :  { %9071 = vrsqrt.f32 %v2411_v49  ;;  %v2410_v50 = vadd.f32 1e-12, %v2408_v7 }
0x1117   :  { %9073 = vrsqrt.f32 %v2410_v50 }
0x1122   :  { %v9072_v51 = vpop.eup %9071 }
0x1123   :  { %v2415_v2 = vmul.f32 %v9072_v51, %v2399_v22 }
0x1124   :  { %v9074_v53 = vpop.eup %9073 }
0x1125   :  { %v2414_v54 = vmul.f32 %v9074_v53, %v2398_v36  ;;  %v2423_v55 = vmul.f32 %v7760_v52, %v2415_v2 }
0x1127   :  { %v2422_v59 = vmul.f32 %v7760_v52, %v2414_v54  ;;  %v2431_v61 = vadd.f32 %v7761_v56, %v2423_v55  ;;  %v9089_v54 = vmov 0.0  }
0x1128   :  { %8681 = vmatprep.subr.mxu0 %v9089_v54  ;;  %8725 = vmatprep.subr.mxu1 %v9089_v54 }
0x1129   :  { %v2430_v60 = vadd.f32 %v7761_v56, %v2422_v59 }
0x112b   :  { %8643 = vmatprep.mubr.msk.f32.mxu0 %vm495_vm1, %v2430_v60 }
0x112c   :  { %8644 = vmatmul.mubr.msk.f32.vlgmr.msra.gmra.mxu0 %vm495_vm1, %v2431_v61 }
0x112d   :  { %8685 = vmatprep.mubr.msk.f32.mxu0 %vm9090_vm6, %v9089_v54 }
0x11ec   :  { %v8645_v16 = vpop.f32.mrf.mxu0 }
0x11ed   :  { %v2523_v17 = vadd.f32 %v8645_v16, %v7767_v39  ;;  %v7797_v16 = vld [vmem:[%s11131_s21 + $0x30] sm:$0xff] }
0x11ee   :  { %v2517_v18 = vpop.f32.mrf.mxu0 }
0x11ef   :  { %v2529_v19 = vmul.f32 0.044715, %v2523_v17  ;;  %v2518_v20 = vadd.f32 %v7767_v39, %v2517_v18  ;;  %v2527_v35 = vmul.f32 0.5, %v2523_v17  ;;  %v7798_v39 = vld [vmem:[%s11131_s21 + $0x38] sm:$0xff]  ;;  %v7795_v18 = vld [vmem:[%s11131_s21 + $0x20] sm:$0xff] }
0x11f1   :  { %v2531_v21 = vmul.f32 %v2529_v19, %v2523_v17  ;;  %v2528_v23 = vmul.f32 0.044715, %v2518_v20  ;;  %v2526_v34 = vmul.f32 0.5, %v2518_v20 }
0x11f3   :  { %v2533_v25 = vmul.f32 %v2531_v21, %v2523_v17  ;;  %v2530_v26 = vmul.f32 %v2528_v23, %v2518_v20  ;;  %v2846_v21 = vld [vmem:[%s11131_s21 + $0x18] sm:$0xff] }
0x11f5   :  { %v2535_v27 = vadd.f32 %v2533_v25, %v2523_v17  ;;  %v2532_v28 = vmul.f32 %v2530_v26, %v2518_v20  ;;  %v7796_v17 = vld [vmem:[%s11131_s21 + $0x28] sm:$0xff]  ;;  %v2845_v25 = vld [vmem:[%s11131_s21 + $0x10] sm:$0xff] }
0x11f7   :  { %v2534_v29 = vadd.f32 %v2532_v28, %v2518_v20  ;;  %v2537_v30 = vmul.f32 0.7978846, %v2535_v27  ;;  %v2844_v27 = vld [vmem:[%s11131_s21 + $0x8] sm:$0xff]  ;;  %v2843_v28 = vld [vmem:[%s11131_s21] sm:$0xff] }
0x11f9   :  { %v2536_v32 = vmul.f32 0.7978846, %v2534_v29  ;;  %9075 = vtanh.f32 %v2537_v30  ;;  %v10105_v29 = vld [vmem:[%s11130_s20 + $0x10] sm:$0xff]  ;;  %v10116_v30 = vld [vmem:[%s11130_s20 + $0x18] sm:$0xff] }
0x11fb   :  { %9077 = vtanh.f32 %v2536_v32  ;;  %v7806_v32 = vld [vmem:[%s11131_s21 + $0x58] sm:$0xff] }
0x1206   :  { %v9076_v5 = vpop.eup %9075 }
0x1207   :  { %v2541_v40 = vadd.f32 1.0, %v9076_v5  ;;  %v7805_v5 = vld [vmem:[%s11131_s21 + $0x50] sm:$0xff] }
0x1208   :  { %v9078_v33 = vpop.eup %9077 }
0x1209   :  { %v2540_v22 = vadd.f32 1.0, %v9078_v33  ;;  %v2543_v37 = vmul.f32 %v2541_v40, %v2527_v35  ;;  %v7804_v33 = vld [vmem:[%s11131_s21 + $0x48] sm:$0xff]  ;;  %v7813_v40 = vld [vmem:[%s11131_s21 + $0x78] sm:$0xff] }
0x120a   :  { %v7811_v35 = vld [vmem:[%s11131_s21 + $0x68] sm:$0xff] }
0x120b   :  { %v2542_v36 = vmul.f32 %v2540_v22, %v2526_v34  ;;  %v7803_v34 = vld [vmem:[%s11131_s21 + $0x40] sm:$0xff]  ;;  %v7812_v22 = vld [vmem:[%s11131_s21 + $0x70] sm:$0xff] }
0x120d   :  { %8678 = vmatprep.mubr.f32.mxu1 %v2542_v36  ;;  %v7810_v36 = vld [vmem:[%s11131_s21 + $0x60] sm:$0xff] }
0x120e   :  { %8679 = vmatmul.mubr.f32.vlgmr.msra.gmra.mxu1 %v2543_v37 }
0x120f   :  { %8733 = vmatprep.mubr.msk.f32.mxu1 %vm9090_vm6, %v9089_v54  ;;  %8726 = vmatpush3.msra.mxu1 %v7806_v32  ;;  %v7847_v32 = vld [vmem:[%s11131_s21 + $0x110] sm:$0xff] }
0x1210   :  { %8727 = vmatprep.subr.mxu1 %v9089_v54 }
0x1211   :  { %8728 = vmatpush3.msra.mxu1 %v7805_v5  ;;  %v7846_v5 = vld [vmem:[%s11131_s21 + $0x108] sm:$0xff] }
0x1212   :  { %8729 = vmatprep.subr.mxu1 %v9089_v54 }
0x1213   :  { %8730 = vmatpush3.msra.mxu1 %v7804_v33  ;;  %v7845_v33 = vld [vmem:[%s11131_s21 + $0x100] sm:$0xff] }
0x1214   :  { %8731 = vmatprep.subr.mxu1 %v9089_v54 }
0x1215   :  { %8732 = vmatpush3.msra.mxu1 %v7803_v34 }
0x1216   :  { %8752 = vmatprep.subr.mxu1 %v9089_v54 }
0x12ce   :  { %v8680_v24 = vpop.f32.mrf.mxu1 }
0x12cf   :  { %v2637_v41 = vadd.f32 %v8680_v24, %v9925_v3 }
0x12d0   :  { %v2627_v42 = vpop.f32.mrf.mxu1 }
0x12d1   :  { %v2636_v43 = vadd.f32 %v2627_v42, %v9928_v31  ;;  %v2647_v44 = vadd.f32 %v7787_v38, %v2637_v41 }
0x12d3   :  { %v2653_v45 = vsel %vm499_vm2, %v2647_v44, 0.0  ;;  %v2646_v46 = vadd.f32 %v7787_v38, %v2636_v43 }
0x12d4   :  { %2654 = vadd.xlane.f32.xlu0 %v2653_v45  ;;  %v10162_v45 = vld [vmem:[%s11130_s20 + $0x20] sm:$0xff] }
0x12d5   :  { %v2650_v47 = vsel %vm495_vm1, %v2646_v46, 0.0 }
0x12d6   :  { %2651 = vadd.xlane.f32.xlu1 %v2650_v47  ;;  %v7820_v47 = vld [vmem:[%s11131_s21 + $0x98] sm:$0xff] }
0x135d   :  { %v2655_v48 = vpop.xlane.xlu0 %2654 }
0x135e   :  { %v2657_v49 = vmul.f32 0.03125, %v2655_v48  ;;  %v10177_v48 = vld [vmem:[%s11130_s20 + $0x28] sm:$0xff] }
0x135f   :  { %v2652_v7 = vpop.xlane.xlu1 %2651 }
0x1360   :  { %v2659_v50 = vsub.f32 %v2647_v44, %v2657_v49  ;;  %v2656_v51 = vmul.f32 0.03125, %v2652_v7  ;;  %v7819_v49 = vld [vmem:[%s11131_s21 + $0x90] sm:$0xff] }
0x1362   :  { %v2658_v52 = vsub.f32 %v2646_v46, %v2656_v51  ;;  %v2661_v2 = vmul.f32 %v2659_v50, %v2659_v50  ;;  %v7827_v51 = vld [vmem:[%s11131_s21 + $0xb8] sm:$0xff] }
0x1364   :  { %v2665_v3 = vsel %vm499_vm2, %v2661_v2, 0.0  ;;  %v2660_v53 = vmul.f32 %v2658_v52, %v2658_v52  ;;  %v7826_v2 = vld [vmem:[%s11131_s21 + $0xb0] sm:$0xff] }
0x1365   :  { %2666 = vadd.xlane.f32.xlu0 %v2665_v3  ;;  %v7825_v3 = vld [vmem:[%s11131_s21 + $0xa8] sm:$0xff] }
0x1366   :  { %v2662_v31 = vsel %vm495_vm1, %v2660_v53, 0.0  ;;  %v7824_v53 = vld [vmem:[%s11131_s21 + $0xa0] sm:$0xff] }
0x1367   :  { %2663 = vadd.xlane.f32.xlu1 %v2662_v31 }
0x13ee   :  { %v2667_v55 = vpop.xlane.xlu0 %2666 }
0x13ef   :  { %v2669_v56 = vmul.f32 0.03125, %v2667_v55 }
0x13f0   :  { %v2664_v59 = vpop.xlane.xlu1 %2663 }
0x13f1   :  { %v2671_v60 = vadd.f32 1e-12, %v2669_v56  ;;  %v2668_v61 = vmul.f32 0.03125, %v2664_v59 }
0x13f3   :  { %9079 = vrsqrt.f32 %v2671_v60  ;;  %v2670_v62 = vadd.f32 1e-12, %v2668_v61 }
0x13f5   :  { %9081 = vrsqrt.f32 %v2670_v62 }
0x1400   :  { %v9080_v63 = vpop.eup %9079 }
0x1401   :  { %v2675_v1 = vmul.f32 %v9080_v63, %v2659_v50  ;;  %v7818_v50 = vld [vmem:[%s11131_s21 + $0x88] sm:$0xff] }
0x1402   :  { %v9082_v4 = vpop.eup %9081 }
0x1403   :  { %v2683_v8 = vmul.f32 %v7788_v0, %v2675_v1  ;;  %v2674_v9 = vmul.f32 %v9082_v4, %v2658_v52  ;;  %v7817_v52 = vld [vmem:[%s11131_s21 + $0x80] sm:$0xff]  ;;  %v7834_v4 = vld [vmem:[%s11131_s21 + $0xd8] sm:$0xff] }
0x1405   :  { %v2691_v10 = vadd.f32 %v7789_v6, %v2683_v8  ;;  %v2682_v11 = vmul.f32 %v7788_v0, %v2674_v9  ;;  %v10222_v0 = vld [vmem:[%s11130_s20 + $0x30] sm:$0xff] }
0x1406   :  { %v7833_v8 = vld [vmem:[%s11131_s21 + $0xd0] sm:$0xff] }
0x1407   :  { %8682 = vmatpush3.msk.msra.mxu0 %vm1059_vm3, %v2691_v10  ;;  %v2690_v58 = vadd.f32 %v7789_v6, %v2682_v11  ;;  %v10237_v6 = vld [vmem:[%s11130_s20 + $0x38] sm:$0xff]  ;;  %v7832_v10 = vld [vmem:[%s11131_s21 + $0xc8] sm:$0xff] }
0x1408   :  { %8683 = vmatprep.subr.mxu0 %v9089_v54  ;;  %v7841_v11 = vld [vmem:[%s11131_s21 + $0xf8] sm:$0xff] }
0x1409   :  { %8684 = vmatpush3.msra.mxu0 %v2690_v58  ;;  %v7831_v58 = vld [vmem:[%s11131_s21 + $0xc0] sm:$0xff] }
0x140a   :  { %8686 = vmatmul.mubr.msk.f32.vlgmr.msra.gmra.mxu0 %vm908_vm4, %v2692_v12  ;;  %8688 = vmatprep.subr.mxu0 %v9089_v54  ;;  %v7840_v12 = vld [vmem:[%s11131_s21 + $0xf0] sm:$0xff] }
0x140b   :  { %8690 = vmatprep.mubr.msk.f32.mxu0 %vm9090_vm6, %v9089_v54 }
0x14ca   :  { %v10044_v14 = vpop.f32.mrf.mxu0 }
0x14cb   :  { %8689 = vmatpush3.msra.mxu0 %v10044_v14 }
0x14cc   :  { %v8687_v57 = vpop.f32.mrf.mxu0  ;;  %8691 = vmatmul.mubr.msk.f32.vlgmr.msra.gmra.mxu0 %vm409_vm0, %v10042_v13  ;;  %8693 = vmatprep.subr.mxu0 %v9089_v54 }
0x14cd   :  { %8694 = vmatpush3.msra.mxu0 %v10044_v14  ;;  %8695 = vmatprep.mubr.msk.f32.mxu0 %vm9090_vm6, %v9089_v54  ;;  %v7839_v57 = vld [vmem:[%s11131_s21 + $0xe8] sm:$0xff] }
0x14ce   :  { %8698 = vmatprep.subr.mxu0 %v9089_v54 }
0x14d0   :  { %8696 = vmatmul.mubr.msk.f32.vlgmr.msra.gmra.mxu0 %vm409_vm0, %v10056_v15 }
0x14d1   :  { %8699 = vmatpush3.msra.mxu0 %v7798_v39  ;;  %8706 = vmatprep.mubr.msk.f32.mxu0 %vm9090_vm6, %v9089_v54  ;;  %v7838_v39 = vld [vmem:[%s11131_s21 + $0xe0] sm:$0xff] }
0x14d2   :  { %8700 = vmatprep.subr.mxu0 %v9089_v54 }
0x14d3   :  { %8701 = vmatpush3.msra.mxu0 %v7797_v16 }
0x14d4   :  { %8702 = vmatprep.subr.mxu0 %v9089_v54 }
0x14d5   :  { %8703 = vmatpush3.msra.mxu0 %v7796_v17 }
0x14d6   :  { %8704 = vmatprep.subr.mxu0 %v9089_v54 }
0x14d7   :  { %8705 = vmatpush3.msra.mxu0 %v7795_v18 }
0x14d8   :  { %8709 = vmatprep.subr.mxu0 %v9089_v54 }
0x158c   :  { %v2839_v19 = vpop.f32.mrf.mxu0 }
0x158e   :  { %v8692_v20 = vpop.f32.mrf.mxu0 }
0x1590   :  { %v2918_v23 = vpop.f32.mrf.mxu0 }
0x1591   :  { %8707 = vmatmul.mubr.msk.f32.vlgmr.msra.gmra.mxu0 %vm495_vm1, %v2918_v23 }
0x1592   :  { %8710 = vmatpush3.msra.mxu0 %v2846_v21  ;;  %v8697_v26 = vpop.f32.mrf.mxu0  ;;  %8717 = vmatprep.mubr.msk.f32.mxu0 %vm9090_vm6, %v9089_v54 }
0x1593   :  { %8711 = vmatprep.subr.mxu0 %v9089_v54  ;;  %v10282_v26 = vld [vmem:[%s11130_s20 + $0x40] sm:$0xff] }
0x1594   :  { %8712 = vmatpush3.msra.mxu0 %v2845_v25 }
0x1595   :  { %8713 = vmatprep.subr.mxu0 %v9089_v54 }
0x1596   :  { %8714 = vmatpush3.msra.mxu0 %v2844_v27  ;;  %v7848_v27 = vld [vmem:[%s11131_s21 + $0x118] sm:$0xff] }
0x1597   :  { %8715 = vmatprep.subr.mxu0 %v9089_v54 }
0x1598   :  { %8716 = vmatpush3.msra.mxu0 %v2843_v28 }
0x1599   :  { %8718 = vmatmul.mubr.msk.f32.vlgmr.msra.gmra.mxu0 %vm495_vm1, %v2839_v19  ;;  %8720 = vmatprep.subr.mxu0 %v9089_v54 }
0x159a   :  { %8721 = vmatpush3.msra.mxu0 %v10044_v14  ;;  %8722 = vmatprep.mubr.msk.f32.mxu0 %vm9090_vm6, %v9089_v54 }
0x159b   :  { %8736 = vmatprep.subr.mxu0 %v9089_v54 }
0x159d   :  { %8723 = vmatmul.mubr.msk.f32.vlgmr.msra.gmra.mxu0 %vm409_vm0, %v10105_v29 }
0x159e   :  { %8737 = vmatpush3.msra.mxu0 %v10044_v14  ;;  %8738 = vmatprep.mubr.msk.f32.mxu0 %vm9090_vm6, %v9089_v54 }
0x159f   :  { %8741 = vmatprep.subr.mxu0 %v9089_v54 }
0x15a1   :  { %8739 = vmatmul.mubr.msk.f32.vlgmr.msra.gmra.mxu0 %vm409_vm0, %v10116_v30 }
0x15a2   :  { %8749 = vmatprep.mubr.msk.f32.mxu0 %vm9090_vm6, %v9089_v54  ;;  %8742 = vmatpush3.msra.mxu0 %v7813_v40 }
0x15a3   :  { %8743 = vmatprep.subr.mxu0 %v9089_v54 }
0x15a4   :  { %8744 = vmatpush3.msra.mxu0 %v7812_v22 }
0x15a5   :  { %8745 = vmatprep.subr.mxu0 %v9089_v54 }
0x15a6   :  { %8746 = vmatpush3.msra.mxu0 %v7811_v35 }
0x15a7   :  { %8747 = vmatprep.subr.mxu0 %v9089_v54 }
0x15a8   :  { %8748 = vmatpush3.msra.mxu0 %v7810_v36 }
0x15a9   :  { %8768 = vmatprep.subr.mxu0 %v9089_v54 }
0x1651   :  { %v2996_v37 = vpop.f32.mrf.mxu0 }
0x1653   :  { %v8708_v24 = vpop.f32.mrf.mxu0 }
0x1659   :  { %v3069_v38 = vpop.f32.mrf.mxu0 }
0x165a   :  { %v3070_v41 = vadd.f32 %v3069_v38, %v2996_v37 }
0x165b   :  { %v8719_v42 = vpop.f32.mrf.mxu0 }
0x165c   :  { %v7855_v42 = vld [vmem:[%s11132_s23 + $0x30] sm:$0xff] }
0x165d   :  { %v3144_v43 = vpop.f32.mrf.mxu0 }
0x165e   :  { %8734 = vmatmul.mubr.msk.f32.vlgmr.msra.gmra.mxu1 %vm495_vm1, %v3144_v43 }
0x165f   :  { %8753 = vmatpush3.msra.mxu1 %v10044_v14  ;;  %v8724_v44 = vpop.f32.mrf.mxu0  ;;  %8754 = vmatprep.mubr.msk.f32.mxu1 %vm9090_vm6, %v9089_v54 }
0x1660   :  { %8757 = vmatprep.subr.mxu1 %v9089_v54  ;;  %v7850_v44 = vld [vmem:[%s11133_s22] ss:$0 sm:$0xff] }
0x1661   :  { %v3298_v46 = vpop.f32.mrf.mxu0 }
0x1662   :  { %8750 = vmatmul.mubr.msk.f32.vlgmr.msra.gmra.mxu0 %vm495_vm1, %v3298_v46  ;;  %8755 = vmatmul.mubr.msk.f32.vlgmr.msra.gmra.mxu1 %vm409_vm0, %v10162_v45 }
0x1663   :  { %8769 = vmatpush3.msra.mxu0 %v10044_v14  ;;  %8770 = vmatprep.mubr.msk.f32.mxu0 %vm9090_vm6, %v9089_v54  ;;  %v8740_v7 = vpop.f32.mrf.mxu0 }
0x1664   :  { %8758 = vmatpush3.msra.mxu1 %v7820_v47  ;;  %8773 = vmatprep.subr.mxu0 %v9089_v54 }
0x1665   :  { %8759 = vmatprep.subr.mxu1 %v9089_v54  ;;  %8765 = vmatprep.mubr.msk.f32.mxu1 %vm9090_vm6, %v9089_v54 }
0x1666   :  { %8771 = vmatmul.mubr.msk.f32.vlgmr.msra.gmra.mxu0 %vm409_vm0, %v10177_v48  ;;  %8760 = vmatpush3.msra.mxu1 %v7819_v49 }
0x1667   :  { %8761 = vmatprep.subr.mxu1 %v9089_v54  ;;  %8781 = vmatprep.mubr.msk.f32.mxu0 %vm9090_vm6, %v9089_v54 }
0x1668   :  { %8762 = vmatpush3.msra.mxu1 %v7818_v50  ;;  %8774 = vmatpush3.msra.mxu0 %v7827_v51  ;;  %v4233_v50 = vld [vmem:[%s11132_s23 + $0x18] sm:$0xff]  ;;  %v4232_v51 = vld [vmem:[%s11132_s23 + $0x10] sm:$0xff] }
0x1669   :  { %8763 = vmatprep.subr.mxu1 %v9089_v54  ;;  %8775 = vmatprep.subr.mxu0 %v9089_v54 }
0x166a   :  { %8764 = vmatpush3.msra.mxu1 %v7817_v52  ;;  %8776 = vmatpush3.msra.mxu0 %v7826_v2  ;;  %v4231_v52 = vld [vmem:[%s11132_s23 + $0x8] sm:$0xff]  ;;  %v4230_v2 = vld [vmem:[%s11132_s23] sm:$0xff] }
0x166b   :  { %8777 = vmatprep.subr.mxu0 %v9089_v54  ;;  %8784 = vmatprep.subr.mxu1 %v9089_v54 }
0x166c   :  { %8778 = vmatpush3.msra.mxu0 %v7825_v3  ;;  %v7854_v3 = vld [vmem:[%s11132_s23 + $0x28] sm:$0xff] }
0x166d   :  { %8779 = vmatprep.subr.mxu0 %v9089_v54 }
0x166e   :  { %8780 = vmatpush3.msra.mxu0 %v7824_v53  ;;  %v7853_v53 = vld [vmem:[%s11132_s23 + $0x20] sm:$0xff] }
0x166f   :  { %8800 = vmatprep.subr.mxu0 %v9089_v54 }
0x171e   :  { %v3222_v31 = vpop.f32.mrf.mxu1 }
0x171f   :  { %v3226_v55 = vadd.f32 %v3222_v31, %v3070_v41  ;;  %v7856_v41 = vld [vmem:[%s11132_s23 + $0x38] sm:$0xff] }
0x1720   :  { %v8735_v56 = vpop.f32.mrf.mxu1 }
0x1722   :  { %v3376_v59 = vpop.f32.mrf.mxu0  ;;  %v3452_v60 = vpop.f32.mrf.mxu1 }
0x1723   :  { %v3380_v61 = vadd.f32 %v3376_v59, %v3226_v55  ;;  %8766 = vmatmul.mubr.msk.f32.vlgmr.msra.gmra.mxu1 %vm495_vm1, %v3452_v60  ;;  %v7863_v60 = vld [vmem:[%s11132_s23 + $0x58] sm:$0xff] }
0x1724   :  { %8785 = vmatpush3.msra.mxu1 %v10044_v14  ;;  %v8751_v62 = vpop.f32.mrf.mxu0  ;;  %v8756_v63 = vpop.f32.mrf.mxu1  ;;  %8786 = vmatprep.mubr.msk.f32.mxu1 %vm9090_vm6, %v9089_v54 }
0x1725   :  { %8789 = vmatprep.subr.mxu1 %v9089_v54  ;;  %v7869_v62 = vld [vmem:[%s11132_s23 + $0x78] sm:$0xff]  ;;  %v7860_v63 = vld [vmem:[%s11132_s23 + $0x40] sm:$0xff] }
0x1726   :  { %v3606_v1 = vpop.f32.mrf.mxu0 }
0x1727   :  { %8782 = vmatmul.mubr.msk.f32.vlgmr.msra.gmra.mxu0 %vm495_vm1, %v3606_v1  ;;  %8787 = vmatmul.mubr.msk.f32.vlgmr.msra.gmra.mxu1 %vm409_vm0, %v10222_v0  ;;  %v7868_v1 = vld [vmem:[%s11132_s23 + $0x70] sm:$0xff] }
0x1728   :  { %8801 = vmatpush3.msra.mxu0 %v10044_v14  ;;  %8802 = vmatprep.mubr.msk.f32.mxu0 %vm9090_vm6, %v9089_v54  ;;  %v8772_v9 = vpop.f32.mrf.mxu0 }
0x1729   :  { %8790 = vmatpush3.msra.mxu1 %v7834_v4  ;;  %8805 = vmatprep.subr.mxu0 %v9089_v54  ;;  %v7867_v4 = vld [vmem:[%s11132_s23 + $0x68] sm:$0xff] }
0x172a   :  { %8791 = vmatprep.subr.mxu1 %v9089_v54  ;;  %8797 = vmatprep.mubr.msk.f32.mxu1 %vm9090_vm6, %v9089_v54 }
0x172b   :  { %8803 = vmatmul.mubr.msk.f32.vlgmr.msra.gmra.mxu0 %vm409_vm0, %v10237_v6  ;;  %8792 = vmatpush3.msra.mxu1 %v7833_v8  ;;  %v7866_v8 = vld [vmem:[%s11132_s23 + $0x60] sm:$0xff] }
0x172c   :  { %8793 = vmatprep.subr.mxu1 %v9089_v54  ;;  %8813 = vmatprep.mubr.msk.f32.mxu0 %vm9090_vm6, %v9089_v54 }
0x172d   :  { %8794 = vmatpush3.msra.mxu1 %v7832_v10  ;;  %8806 = vmatpush3.msra.mxu0 %v7841_v11 }
0x172e   :  { %8795 = vmatprep.subr.mxu1 %v9089_v54  ;;  %8807 = vmatprep.subr.mxu0 %v9089_v54 }
0x172f   :  { %8796 = vmatpush3.msra.mxu1 %v7831_v58  ;;  %8808 = vmatpush3.msra.mxu0 %v7840_v12 }
0x1730   :  { %8816 = vmatprep.subr.mxu1 %v9089_v54  ;;  %8809 = vmatprep.subr.mxu0 %v9089_v54 }
0x1731   :  { %8810 = vmatpush3.msra.mxu0 %v7839_v57 }
0x1732   :  { %8811 = vmatprep.subr.mxu0 %v9089_v54 }
0x1733   :  { %8812 = vmatpush3.msra.mxu0 %v7838_v39 }
0x1734   :  { %8832 = vmatprep.subr.mxu0 %v9089_v54 }
0x17e3   :  { %v3530_v16 = vpop.f32.mrf.mxu1 }
0x17e4   :  { %v3534_v17 = vadd.f32 %v3530_v16, %v3380_v61  ;;  %v7862_v61 = vld [vmem:[%s11132_s23 + $0x50] sm:$0xff] }
0x17e5   :  { %v8767_v18 = vpop.f32.mrf.mxu1 }
0x17e6   :  { %v7874_v18 = vld [vmem:[%s11132_s23 + $0x90] sm:$0xff] }
0x17e7   :  { %v3684_v19 = vpop.f32.mrf.mxu0  ;;  %v3760_v20 = vpop.f32.mrf.mxu1 }
0x17e8   :  { %v3688_v21 = vadd.f32 %v3684_v19, %v3534_v17  ;;  %8798 = vmatmul.mubr.msk.f32.vlgmr.msra.gmra.mxu1 %vm495_vm1, %v3760_v20  ;;  %v7875_v17 = vld [vmem:[%s11132_s23 + $0x98] sm:$0xff] }
0x17e9   :  { %8817 = vmatpush3.msra.mxu1 %v10044_v14  ;;  %v8783_v23 = vpop.f32.mrf.mxu0  ;;  %v8788_v25 = vpop.f32.mrf.mxu1  ;;  %8818 = vmatprep.mubr.msk.f32.mxu1 %vm9090_vm6, %v9089_v54  ;;  %v7881_v20 = vld [vmem:[%s11132_s23 + $0xb8] sm:$0xff] }
0x17ea   :  { %8821 = vmatprep.subr.mxu1 %v9089_v54  ;;  %v7879_v23 = vld [vmem:[%s11132_s23 + $0xa8] sm:$0xff]  ;;  %v7878_v25 = vld [vmem:[%s11132_s23 + $0xa0] sm:$0xff] }
0x17eb   :  { %v3914_v28 = vpop.f32.mrf.mxu0 }
0x17ec   :  { %8814 = vmatmul.mubr.msk.f32.vlgmr.msra.gmra.mxu0 %vm495_vm1, %v3914_v28  ;;  %8819 = vmatmul.mubr.msk.f32.vlgmr.msra.gmra.mxu1 %vm409_vm0, %v10282_v26 }
0x17ed   :  { %8822 = vmatpush3.msra.mxu1 %v7848_v27  ;;  %v8804_v14 = vpop.f32.mrf.mxu0  ;;  %8829 = vmatprep.mubr.msk.f32.mxu1 %vm9090_vm6, %v9089_v54 }
0x17ee   :  { %8823 = vmatprep.subr.mxu1 %v9089_v54  ;;  %8834 = vmatprep.mubr.msk.f32.mxu0 %vm9090_vm6, %v9089_v54 }
0x17ef   :  { %8824 = vmatpush3.msra.mxu1 %v7847_v32 }
0x17f0   :  { %8825 = vmatprep.subr.mxu1 %v9089_v54 }
0x17f1   :  { %8826 = vmatpush3.msra.mxu1 %v7846_v5 }
0x17f2   :  { %8827 = vmatprep.subr.mxu1 %v9089_v54 }
0x17f3   :  { %8828 = vmatpush3.msra.mxu1 %v7845_v33 }
0x17f4   :  { %8842 = vmatprep.subr.mxu1 %v9089_v54 }
0x18a8   :  { %v3838_v40 = vpop.f32.mrf.mxu1 }
0x18a9   :  { %v3842_v34 = vadd.f32 %v3838_v40, %v3688_v21  ;;  %v7880_v21 = vld [vmem:[%s11132_s23 + $0xb0] sm:$0xff] }
0x18aa   :  { %v8799_v22 = vpop.f32.mrf.mxu1 }
0x18ac   :  { %v3992_v35 = vpop.f32.mrf.mxu0  ;;  %v4068_v36 = vpop.f32.mrf.mxu1 }
0x18ad   :  { %v3996_v37 = vadd.f32 %v3992_v35, %v3842_v34  ;;  %8830 = vmatmul.mubr.msk.f32.vlgmr.msra.gmra.mxu1 %vm495_vm1, %v4068_v36  ;;  %v7887_v35 = vld [vmem:[%s11132_s23 + $0xd8] sm:$0xff]  ;;  %v7886_v36 = vld [vmem:[%s11132_s23 + $0xd0] sm:$0xff] }
0x18ae   :  { %v8820_v24 = vpop.f32.mrf.mxu1  ;;  %v8815_v38 = vpop.f32.mrf.mxu0  ;;  %8850 = vmatprep.mubr.msk.f32.mxu1 %vm9090_vm6, %v9089_v54  ;;  %8843 = vmatpush3.msra.mxu1 %v7856_v41  ;;  %v7891_v41 = vld [vmem:[%s11132_s23 + $0xe8] sm:$0xff] }
0x18af   :  { %8844 = vmatprep.subr.mxu1 %v9089_v54  ;;  %v7893_v24 = vld [vmem:[%s11132_s23 + $0xf8] sm:$0xff]  ;;  %v7884_v38 = vld [vmem:[%s11132_s23 + $0xc0] sm:$0xff] }
0x18b0   :  { %8845 = vmatpush3.msra.mxu1 %v7855_v42  ;;  %v7890_v42 = vld [vmem:[%s11132_s23 + $0xe0] sm:$0xff] }
0x18b1   :  { %8846 = vmatprep.subr.mxu1 %v9089_v54 }
0x18b2   :  { %8847 = vmatpush3.msra.mxu1 %v7854_v3 }
0x18b3   :  { %8848 = vmatprep.subr.mxu1 %v9089_v54 }
0x18b4   :  { %8849 = vmatpush3.msra.mxu1 %v7853_v53 }
0x18b5   :  { %8864 = vmatprep.subr.mxu1 %v9089_v54 }
0x196d   :  { %v4146_v43 = vpop.f32.mrf.mxu1 }
0x196e   :  { %v4150_v46 = vadd.f32 %v4146_v43, %v3996_v37 }
0x196f   :  { %v8831_v47 = vpop.f32.mrf.mxu1 }
0x1970   :  { %v4158_v49 = vadd.f32 %v7850_v44, %v4150_v46 }
0x1972   :  { %v10322_v7 = vmax.f32 %v4158_v49, 0.0 }
0x1974   :  { %8833 = vmatpush3.msra.mxu0 %v10322_v7 }
0x1975   :  { %8835 = vmatmul.mubr.msk.f32.vlgmr.msra.gmra.mxu0 %vm409_vm0, %v10042_v13  ;;  %8837 = vmatprep.subr.mxu0 %v9089_v54 }
0x1976   :  { %8838 = vmatpush3.msra.mxu0 %v10322_v7  ;;  %8839 = vmatprep.mubr.msk.f32.mxu0 %vm9090_vm6, %v9089_v54 }
0x1977   :  { %8853 = vmatprep.subr.mxu0 %v9089_v54 }
0x1979   :  { %8840 = vmatmul.mubr.msk.f32.vlgmr.msra.gmra.mxu0 %vm409_vm0, %v10056_v15 }
0x197a   :  { %8854 = vmatpush3.msra.mxu0 %v4233_v50  ;;  %8861 = vmatprep.mubr.msk.f32.mxu0 %vm9090_vm6, %v9089_v54 }
0x197b   :  { %8855 = vmatprep.subr.mxu0 %v9089_v54 }
0x197c   :  { %8856 = vmatpush3.msra.mxu0 %v4232_v51 }
0x197d   :  { %8857 = vmatprep.subr.mxu0 %v9089_v54 }
0x197e   :  { %8858 = vmatpush3.msra.mxu0 %v4231_v52 }
0x197f   :  { %8859 = vmatprep.subr.mxu0 %v9089_v54 }
0x1980   :  { %8860 = vmatpush3.msra.mxu0 %v4230_v2  ;;  %v7899_v2 = vld [vmem:[%s11132_s23 + $0x118] sm:$0xff] }
0x1981   :  { %8869 = vmatprep.subr.mxu0 %v9089_v54 }
0x1a35   :  { %v4226_v31 = vpop.f32.mrf.mxu0 }
0x1a36   :  { %8862 = vmatmul.mubr.msk.f32.vlgmr.msra.gmra.mxu0 %vm495_vm1, %v4226_v31  ;;  %v7896_v31 = vld [vmem:[%s11132_s23 + $0x100] sm:$0xff] }
0x1a37   :  { %v8836_v55 = vpop.f32.mrf.mxu0  ;;  %8877 = vmatprep.mubr.msk.f32.mxu0 %vm9090_vm6, %v9089_v54  ;;  %8870 = vmatpush3.msra.mxu0 %v7863_v60 }
0x1a38   :  { %8871 = vmatprep.subr.mxu0 %v9089_v54 }
0x1a39   :  { %v4300_v56 = vpop.f32.mrf.mxu0  ;;  %8872 = vmatpush3.msra.mxu0 %v7862_v61 }
0x1a3a   :  { %8851 = vmatmul.mubr.msk.f32.vlgmr.msra.gmra.mxu1 %vm495_vm1, %v4300_v56  ;;  %8873 = vmatprep.subr.mxu0 %v9089_v54 }
0x1a3b   :  { %8865 = vmatpush3.msra.mxu1 %v10322_v7  ;;  %v8841_v59 = vpop.f32.mrf.mxu0  ;;  %8866 = vmatprep.mubr.msk.f32.mxu1 %vm9090_vm6, %v9089_v54 }
0x1a3c   :  { %8880 = vmatprep.subr.mxu1 %v9089_v54 }
0x1a3e   :  { %8867 = vmatmul.mubr.msk.f32.vlgmr.msra.gmra.mxu1 %vm409_vm0, %v10105_v29 }
0x1a3f   :  { %8881 = vmatpush3.msra.mxu1 %v10322_v7  ;;  %8882 = vmatprep.mubr.msk.f32.mxu1 %vm9090_vm6, %v9089_v54 }
0x1a40   :  { %8885 = vmatprep.subr.mxu1 %v9089_v54 }
0x1a42   :  { %8883 = vmatmul.mubr.msk.f32.vlgmr.msra.gmra.mxu1 %vm409_vm0, %v10116_v30  ;;  %v7861_v30 = vld [vmem:[%s11132_s23 + $0x48] sm:$0xff] }
0x1a43   :  { %8893 = vmatprep.mubr.msk.f32.mxu1 %vm9090_vm6, %v9089_v54  ;;  %8874 = vmatpush3.msra.mxu0 %v7861_v30 }
0x1a44   :  { %8886 = vmatpush3.msra.mxu1 %v7869_v62  ;;  %8875 = vmatprep.subr.mxu0 %v9089_v54 }
0x1a45   :  { %8887 = vmatprep.subr.mxu1 %v9089_v54  ;;  %8876 = vmatpush3.msra.mxu0 %v7860_v63 }
0x1a46   :  { %8888 = vmatpush3.msra.mxu1 %v7868_v1  ;;  %8896 = vmatprep.subr.mxu0 %v9089_v54  ;;  %v7917_v1 = vld [vmem:[%s11134_s25 + $0xe8] sm:$0xff] }
0x1a47   :  { %8889 = vmatprep.subr.mxu1 %v9089_v54 }
0x1a48   :  { %8890 = vmatpush3.msra.mxu1 %v7867_v4  ;;  %v7916_v4 = vld [vmem:[%s11134_s25 + $0xe0] sm:$0xff] }
0x1a49   :  { %8891 = vmatprep.subr.mxu1 %v9089_v54 }
0x1a4a   :  { %8892 = vmatpush3.msra.mxu1 %v7866_v8  ;;  %v7913_v8 = vld [vmem:[%s11134_s25 + $0xc8] sm:$0xff] }
0x1a4b   :  { %8912 = vmatprep.subr.mxu1 %v9089_v54 }
0x1af6   :  { %v4451_v9 = vpop.f32.mrf.mxu0 }
0x1af8   :  { %v8863_v10 = vpop.f32.mrf.mxu0 }
0x1afa   :  { %v4378_v11 = vpop.f32.mrf.mxu1 }
0x1afb   :  { %v4452_v58 = vadd.f32 %v4451_v9, %v4378_v11  ;;  %v7912_v9 = vld [vmem:[%s11134_s25 + $0xc0] sm:$0xff] }
0x1afc   :  { %v8852_v12 = vpop.f32.mrf.mxu1  ;;  %v7901_v11 = vld [vmem:[%s11135_s24] ss:$0 sm:$0xff] }
0x1afe   :  { %v4521_v57 = vpop.f32.mrf.mxu1 }
0x1aff   :  { %8878 = vmatmul.mubr.msk.f32.vlgmr.msra.gmra.mxu0 %vm495_vm1, %v4521_v57 }
0x1b00   :  { %8897 = vmatpush3.msra.mxu0 %v10322_v7  ;;  %v8868_v39 = vpop.f32.mrf.mxu1  ;;  %8898 = vmatprep.mubr.msk.f32.mxu0 %vm9090_vm6, %v9089_v54 }
0x1b01   :  { %8901 = vmatprep.subr.mxu0 %v9089_v54 }
0x1b02   :  { %v4670_v16 = vpop.f32.mrf.mxu1 }
0x1b03   :  { %8894 = vmatmul.mubr.msk.f32.vlgmr.msra.gmra.mxu1 %vm495_vm1, %v4670_v16  ;;  %8899 = vmatmul.mubr.msk.f32.vlgmr.msra.gmra.mxu0 %vm409_vm0, %v10162_v45  ;;  %v7873_v45 = vld [vmem:[%s11132_s23 + $0x88] sm:$0xff]  ;;  %v7919_v16 = vld [vmem:[%s11134_s25 + $0xf8] sm:$0xff] }
0x1b04   :  { %8913 = vmatpush3.msra.mxu1 %v10322_v7  ;;  %8914 = vmatprep.mubr.msk.f32.mxu1 %vm9090_vm6, %v9089_v54  ;;  %v8884_v19 = vpop.f32.mrf.mxu1 }
0x1b05   :  { %8902 = vmatpush3.msra.mxu0 %v7875_v17  ;;  %8917 = vmatprep.subr.mxu1 %v9089_v54  ;;  %v7918_v17 = vld [vmem:[%s11134_s25 + $0xf0] sm:$0xff]  ;;  %v7909_v19 = vld [vmem:[%s11134_s25 + $0xa8] sm:$0xff] }
0x1b06   :  { %8903 = vmatprep.subr.mxu0 %v9089_v54  ;;  %8909 = vmatprep.mubr.msk.f32.mxu0 %vm9090_vm6, %v9089_v54 }
0x1b07   :  { %8915 = vmatmul.mubr.msk.f32.vlgmr.msra.gmra.mxu1 %vm409_vm0, %v10177_v48  ;;  %8904 = vmatpush3.msra.mxu0 %v7874_v18  ;;  %v7872_v48 = vld [vmem:[%s11132_s23 + $0x80] sm:$0xff]  ;;  %v7915_v18 = vld [vmem:[%s11134_s25 + $0xd8] sm:$0xff] }
0x1b08   :  { %8905 = vmatprep.subr.mxu0 %v9089_v54  ;;  %8925 = vmatprep.mubr.msk.f32.mxu1 %vm9090_vm6, %v9089_v54 }
0x1b09   :  { %8906 = vmatpush3.msra.mxu0 %v7873_v45  ;;  %8918 = vmatpush3.msra.mxu1 %v7881_v20  ;;  %v7911_v45 = vld [vmem:[%s11134_s25 + $0xb8] sm:$0xff]  ;;  %v7910_v20 = vld [vmem:[%s11134_s25 + $0xb0] sm:$0xff] }
0x1b0a   :  { %8907 = vmatprep.subr.mxu0 %v9089_v54  ;;  %8919 = vmatprep.subr.mxu1 %v9089_v54 }
0x1b0b   :  { %8908 = vmatpush3.msra.mxu0 %v7872_v48  ;;  %8920 = vmatpush3.msra.mxu1 %v7880_v21  ;;  %v7905_v48 = vld [vmem:[%s11134_s25 + $0x88] sm:$0xff]  ;;  %v7907_v21 = vld [vmem:[%s11134_s25 + $0x98] sm:$0xff] }
0x1b0c   :  { %8921 = vmatprep.subr.mxu1 %v9089_v54  ;;  %8928 = vmatprep.subr.mxu0 %v9089_v54 }
0x1b0d   :  { %8922 = vmatpush3.msra.mxu1 %v7879_v23  ;;  %v7904_v23 = vld [vmem:[%s11134_s25 + $0x80] sm:$0xff] }
0x1b0e   :  { %8923 = vmatprep.subr.mxu1 %v9089_v54 }
0x1b0f   :  { %8924 = vmatpush3.msra.mxu1 %v7878_v25  ;;  %v7906_v25 = vld [vmem:[%s11134_s25 + $0x90] sm:$0xff] }
0x1b10   :  { %8944 = vmatprep.subr.mxu1 %v9089_v54 }
0x1bbf   :  { %v4599_v27 = vpop.f32.mrf.mxu0 }
0x1bc0   :  { %v4603_v28 = vadd.f32 %v4599_v27, %v4452_v58  ;;  %v5590_v27 = vld [vmem:[%s11134_s25 + $0x68] sm:$0xff] }
0x1bc1   :  { %v8879_v14 = vpop.f32.mrf.mxu0 }
0x1bc3   :  { %v4748_v32 = vpop.f32.mrf.mxu1  ;;  %v4819_v5 = vpop.f32.mrf.mxu0 }
0x1bc4   :  { %v4752_v33 = vadd.f32 %v4748_v32, %v4603_v28  ;;  %8910 = vmatmul.mubr.msk.f32.vlgmr.msra.gmra.mxu0 %vm495_vm1, %v4819_v5  ;;  %v5592_v28 = vld [vmem:[%s11134_s25 + $0x78] sm:$0xff]  ;;  %v5589_v5 = vld [vmem:[%s11134_s25 + $0x60] sm:$0xff] }
0x1bc5   :  { %8929 = vmatpush3.msra.mxu0 %v10322_v7  ;;  %v8895_v40 = vpop.f32.mrf.mxu1  ;;  %v8900_v34 = vpop.f32.mrf.mxu0  ;;  %8930 = vmatprep.mubr.msk.f32.mxu0 %vm9090_vm6, %v9089_v54 }
0x1bc6   :  { %8933 = vmatprep.subr.mxu0 %v9089_v54  ;;  %v5586_v34 = vld [vmem:[%s11134_s25 + $0x48] sm:$0xff] }
0x1bc7   :  { %v4968_v22 = vpop.f32.mrf.mxu1 }
0x1bc8   :  { %8926 = vmatmul.mubr.msk.f32.vlgmr.msra.gmra.mxu1 %vm495_vm1, %v4968_v22  ;;  %8931 = vmatmul.mubr.msk.f32.vlgmr.msra.gmra.mxu0 %vm409_vm0, %v10222_v0  ;;  %v7885_v0 = vld [vmem:[%s11132_s23 + $0xc8] sm:$0xff]  ;;  %v5588_v22 = vld [vmem:[%s11134_s25 + $0x58] sm:$0xff] }
0x1bc9   :  { %8945 = vmatpush3.msra.mxu1 %v10322_v7  ;;  %8946 = vmatprep.mubr.msk.f32.mxu1 %vm9090_vm6, %v9089_v54  ;;  %v8916_v37 = vpop.f32.mrf.mxu1 }
0x1bca   :  { %8934 = vmatpush3.msra.mxu0 %v7887_v35  ;;  %8949 = vmatprep.subr.mxu1 %v9089_v54  ;;  %v5585_v35 = vld [vmem:[%s11134_s25 + $0x40] sm:$0xff] }
0x1bcb   :  { %8935 = vmatprep.subr.mxu0 %v9089_v54  ;;  %8941 = vmatprep.mubr.msk.f32.mxu0 %vm9090_vm6, %v9089_v54 }
0x1bcc   :  { %8947 = vmatmul.mubr.msk.f32.vlgmr.msra.gmra.mxu1 %vm409_vm0, %v10237_v6  ;;  %8936 = vmatpush3.msra.mxu0 %v7886_v36  ;;  %v7892_v6 = vld [vmem:[%s11132_s23 + $0xf0] sm:$0xff] }
0x1bcd   :  { %8937 = vmatprep.subr.mxu0 %v9089_v54  ;;  %8957 = vmatprep.mubr.msk.f32.mxu1 %vm9090_vm6, %v9089_v54  ;;  %v5587_v36 = vld [vmem:[%s11134_s25 + $0x50] sm:$0xff] }
0x1bce   :  { %8938 = vmatpush3.msra.mxu0 %v7885_v0  ;;  %8950 = vmatpush3.msra.mxu1 %v7893_v24  ;;  %v5582_v0 = vld [vmem:[%s11134_s25 + $0x28] sm:$0xff]  ;;  %v5584_v24 = vld [vmem:[%s11134_s25 + $0x38] sm:$0xff] }
0x1bcf   :  { %8939 = vmatprep.subr.mxu0 %v9089_v54  ;;  %8951 = vmatprep.subr.mxu1 %v9089_v54 }
0x1bd0   :  { %8940 = vmatpush3.msra.mxu0 %v7884_v38  ;;  %8952 = vmatpush3.msra.mxu1 %v7892_v6  ;;  %v5581_v38 = vld [vmem:[%s11134_s25 + $0x20] sm:$0xff]  ;;  %v5583_v6 = vld [vmem:[%s11134_s25 + $0x30] sm:$0xff] }
0x1bd1   :  { %8960 = vmatprep.subr.mxu0 %v9089_v54  ;;  %8953 = vmatprep.subr.mxu1 %v9089_v54 }
0x1bd2   :  { %8954 = vmatpush3.msra.mxu1 %v7891_v41  ;;  %v5578_v41 = vld [vmem:[%s11134_s25 + $0x8] sm:$0xff] }
0x1bd3   :  { %8955 = vmatprep.subr.mxu1 %v9089_v54 }
0x1bd4   :  { %8956 = vmatpush3.msra.mxu1 %v7890_v42  ;;  %v5580_v42 = vld [vmem:[%s11134_s25 + $0x18] sm:$0xff] }
0x1bd5   :  { %8976 = vmatprep.subr.mxu1 %v9089_v54 }
0x1c84   :  { %v4897_v43 = vpop.f32.mrf.mxu0 }
0x1c85   :  { %v4901_v44 = vadd.f32 %v4897_v43, %v4752_v33  ;;  %v5591_v33 = vld [vmem:[%s11134_s25 + $0x70] sm:$0xff]  ;;  %v5577_v43 = vld [vmem:[%s11134_s25] sm:$0xff] }
0x1c86   :  { %v8911_v46 = vpop.f32.mrf.mxu0 }
0x1c87   :  { %v7938_v46 = vld [vmem:[%s11134_s25 + $0x168] sm:$0xff] }
0x1c88   :  { %v5046_v47 = vpop.f32.mrf.mxu1  ;;  %v5117_v49 = vpop.f32.mrf.mxu0 }
0x1c89   :  { %v5050_v50 = vadd.f32 %v5046_v47, %v4901_v44  ;;  %8942 = vmatmul.mubr.msk.f32.vlgmr.msra.gmra.mxu0 %vm495_vm1, %v5117_v49  ;;  %v5579_v44 = vld [vmem:[%s11134_s25 + $0x10] sm:$0xff]  ;;  %v7937_v47 = vld [vmem:[%s11134_s25 + $0x160] sm:$0xff]  ;;  %v7940_v49 = vld [vmem:[%s11134_s25 + $0x178] sm:$0xff] }
0x1c8a   :  { %8961 = vmatpush3.msra.mxu0 %v10322_v7  ;;  %v8927_v51 = vpop.f32.mrf.mxu1  ;;  %v8932_v52 = vpop.f32.mrf.mxu0  ;;  %8962 = vmatprep.mubr.msk.f32.mxu0 %vm9090_vm6, %v9089_v54  ;;  %v7898_v7 = vld [vmem:[%s11132_s23 + $0x110] sm:$0xff] }
0x1c8b   :  { %8965 = vmatprep.subr.mxu0 %v9089_v54  ;;  %v7933_v51 = vld [vmem:[%s11134_s25 + $0x140] sm:$0xff]  ;;  %v7936_v52 = vld [vmem:[%s11134_s25 + $0x158] sm:$0xff] }
0x1c8c   :  { %v5266_v3 = vpop.f32.mrf.mxu1 }
0x1c8d   :  { %8958 = vmatmul.mubr.msk.f32.vlgmr.msra.gmra.mxu1 %vm495_vm1, %v5266_v3  ;;  %8963 = vmatmul.mubr.msk.f32.vlgmr.msra.gmra.mxu0 %vm409_vm0, %v10282_v26  ;;  %v7897_v26 = vld [vmem:[%s11132_s23 + $0x108] sm:$0xff]  ;;  %v7935_v3 = vld [vmem:[%s11134_s25 + $0x150] sm:$0xff] }
0x1c8e   :  { %8966 = vmatpush3.msra.mxu0 %v7899_v2  ;;  %v8948_v53 = vpop.f32.mrf.mxu1  ;;  %8973 = vmatprep.mubr.msk.f32.mxu0 %vm9090_vm6, %v9089_v54  ;;  %v7930_v2 = vld [vmem:[%s11134_s25 + $0x128] sm:$0xff] }
0x1c8f   :  { %8967 = vmatprep.subr.mxu0 %v9089_v54  ;;  %8978 = vmatprep.mubr.msk.f32.mxu1 %vm9090_vm6, %v9089_v54  ;;  %v7929_v53 = vld [vmem:[%s11134_s25 + $0x120] sm:$0xff] }
0x1c90   :  { %8968 = vmatpush3.msra.mxu0 %v7898_v7  ;;  %v7932_v7 = vld [vmem:[%s11134_s25 + $0x138] sm:$0xff] }
0x1c91   :  { %8969 = vmatprep.subr.mxu0 %v9089_v54 }
0x1c92   :  { %8970 = vmatpush3.msra.mxu0 %v7897_v26  ;;  %v7926_v26 = vld [vmem:[%s11134_s25 + $0x108] sm:$0xff] }
0x1c93   :  { %8971 = vmatprep.subr.mxu0 %v9089_v54 }
0x1c94   :  { %8972 = vmatpush3.msra.mxu0 %v7896_v31  ;;  %v7931_v31 = vld [vmem:[%s11134_s25 + $0x130] sm:$0xff] }
0x1c95   :  { %5707 = vmatprep.subr.mxu0 %v7917_v1 }
0x1d49   :  { %v5195_v55 = vpop.f32.mrf.mxu0 }
0x1d4a   :  { %v5199_v56 = vadd.f32 %v5195_v55, %v5050_v50  ;;  %v7939_v50 = vld [vmem:[%s11134_s25 + $0x170] sm:$0xff]  ;;  %v7925_v55 = vld [vmem:[%s11134_s25 + $0x100] sm:$0xff] }
0x1d4b   :  { %v8943_v59 = vpop.f32.mrf.mxu0 }
0x1d4c   :  { %v7927_v59 = vld [vmem:[%s11134_s25 + $0x110] sm:$0xff] }
0x1d4d   :  { %v5344_v60 = vpop.f32.mrf.mxu1  ;;  %v5415_v61 = vpop.f32.mrf.mxu0 }
0x1d4e   :  { %v5348_v30 = vadd.f32 %v5344_v60, %v5199_v56  ;;  %8974 = vmatmul.mubr.msk.f32.vlgmr.msra.gmra.mxu0 %vm495_vm1, %v5415_v61  ;;  %v7928_v56 = vld [vmem:[%s11134_s25 + $0x118] sm:$0xff]  ;;  %v7957_v60 = vld [vmem:[%s11134_s25 + $0x1e8] sm:$0xff] }
0x1d4f   :  { %v8964_v62 = vpop.f32.mrf.mxu0  ;;  %v8959_v63 = vpop.f32.mrf.mxu1  ;;  %5747 = vmatprep.mubr.f32.mxu0 %v9089_v54  ;;  %5708 = vmatpush1.msra.mxu0 %v7916_v4 }
0x1d50   :  { %5709 = vmatprep.subr.mxu0 %v7913_v8 }
0x1d51   :  { %5710 = vmatpush1.msra.mxu0 %v7912_v9 }
0x1d52   :  { %5711 = vmatprep.subr.mxu0 %v7909_v19  ;;  %v7955_v19 = vld [vmem:[%s11134_s25 + $0x1d8] sm:$0xff] }
0x1e0e   :  { %v5493_v10 = vpop.f32.mrf.mxu0 }
0x1e0f   :  { %v5497_v58 = vadd.f32 %v5493_v10, %v5348_v30 }
0x1e10   :  { %v8975_v12 = vpop.f32.mrf.mxu0 }
0x1e11   :  { %v5505_v57 = vadd.f32 %v7901_v11, %v5497_v58  ;;  %v7956_v12 = vld [vmem:[%s11134_s25 + $0x1e0] sm:$0xff] }
0x1e13   :  { %v10554_v39 = vmax.f32 %v5505_v57, 0.0  ;;  %v7959_v57 = vld [vmem:[%s11134_s25 + $0x1f8] sm:$0xff] }
0x1e15   :  { %8977 = vmatpush3.msra.mxu1 %v10554_v39 }
0x1e16   :  { %8979 = vmatmul.mubr.msk.f32.vlgmr.msra.gmra.mxu1 %vm409_vm0, %v10042_v13  ;;  %8981 = vmatprep.subr.mxu1 %v9089_v54  ;;  %v7914_v13 = vld [vmem:[%s11134_s25 + $0xd0] sm:$0xff] }
0x1e17   :  { %8982 = vmatpush3.msra.mxu1 %v10554_v39  ;;  %8983 = vmatprep.mubr.msk.f32.mxu1 %vm9090_vm6, %v9089_v54 }
0x1e18   :  { %5778 = vmatprep.subr.mxu1 %v7919_v16  ;;  %v7953_v16 = vld [vmem:[%s11134_s25 + $0x1c8] sm:$0xff] }
0x1e1a   :  { %8984 = vmatmul.mubr.msk.f32.vlgmr.msra.gmra.mxu1 %vm409_vm0, %v10056_v15  ;;  %v7908_v15 = vld [vmem:[%s11134_s25 + $0xa0] sm:$0xff] }
0x1e1b   :  { %5779 = vmatpush1.msra.mxu1 %v7918_v17  ;;  %5818 = vmatprep.mubr.f32.mxu1 %v9089_v54 }
0x1e1c   :  { %5780 = vmatprep.subr.mxu1 %v7915_v18  ;;  %5712 = vmatpush1.msra.mxu0 %v7908_v15  ;;  %v7952_v18 = vld [vmem:[%s11134_s25 + $0x1c0] sm:$0xff]  ;;  %v7949_v15 = vld [vmem:[%s11134_s25 + $0x1a8] sm:$0xff] }
0x1e1d   :  { %5781 = vmatpush1.msra.mxu1 %v7914_v13  ;;  %5713 = vmatprep.subr.mxu0 %v7905_v48  ;;  %v7958_v13 = vld [vmem:[%s11134_s25 + $0x1f0] sm:$0xff]  ;;  %v7948_v48 = vld [vmem:[%s11134_s25 + $0x1a0] sm:$0xff] }
0x1e1e   :  { %5782 = vmatprep.subr.mxu1 %v7911_v45  ;;  %5714 = vmatpush1.msra.mxu0 %v7904_v23  ;;  %v9083_v45 = vld [vmem:[%s11130_s20 + $0x18] sm:$0xff]  ;;  %v7945_v23 = vld [vmem:[%s11134_s25 + $0x188] sm:$0xff] }
0x1e1f   :  { %5783 = vmatpush1.msra.mxu1 %v7910_v20  ;;  %5852 = vmatprep.subr.mxu0 %v5590_v27  ;;  %v7954_v20 = vld [vmem:[%s11134_s25 + $0x1d0] sm:$0xff]  ;;  %v7944_v27 = vld [vmem:[%s11134_s25 + $0x180] sm:$0xff] }
0x1e20   :  { %5784 = vmatprep.subr.mxu1 %v7907_v21  ;;  %v7951_v21 = vld [vmem:[%s11134_s25 + $0x1b8] sm:$0xff] }
0x1e21   :  { %5785 = vmatpush1.msra.mxu1 %v7906_v25  ;;  %v7950_v25 = vld [vmem:[%s11134_s25 + $0x1b0] sm:$0xff] }
0x1e22   :  { %5923 = vmatprep.subr.mxu1 %v5592_v28  ;;  %v7947_v28 = vld [vmem:[%s11134_s25 + $0x198] sm:$0xff] }
0x1ed6   :  { %v5573_v14 = vpop.f32.mrf.mxu1 }
0x1ed8   :  { %v8980_v32 = vpop.f32.mrf.mxu1 }
0x1ed9   :  { %v7976_v32 = vld [vmem:[%s11134_s25 + $0x268] sm:$0xff] }
0x1eda   :  { %v5659_v40 = vpop.f32.mrf.mxu1 }
0x1edb   :  { %7920 = vmatmul.mubr.msk.f32.vlgmr.msra.gmra.mxu0 %vm495_vm1, %v5659_v40  ;;  %7921 = vmatmul.mubr.msk.f32.vlgmr.msra.gmra.mxu1 %vm495_vm1, %v5659_v40 }
0x1edc   :  { %5853 = vmatpush1.msra.mxu0 %v5589_v5  ;;  %5924 = vmatpush1.msra.mxu1 %v5591_v33  ;;  %v8985_v37 = vpop.f32.mrf.mxu1 }
0x1edd   :  { %5854 = vmatprep.subr.mxu0 %v5586_v34  ;;  %5925 = vmatprep.subr.mxu1 %v5588_v22 }
0x1ede   :  { %5855 = vmatpush1.msra.mxu0 %v5585_v35  ;;  %5926 = vmatpush1.msra.mxu1 %v5587_v36 }
0x1edf   :  { %5856 = vmatprep.subr.mxu0 %v5582_v0  ;;  %5927 = vmatprep.subr.mxu1 %v5584_v24  ;;  %v7975_v0 = vld [vmem:[%s11134_s25 + $0x260] sm:$0xff]  ;;  %v7978_v24 = vld [vmem:[%s11134_s25 + $0x278] sm:$0xff] }
0x1ee0   :  { %5857 = vmatpush1.msra.mxu0 %v5581_v38  ;;  %5928 = vmatpush1.msra.mxu1 %v5583_v6  ;;  %v7972_v38 = vld [vmem:[%s11134_s25 + $0x248] sm:$0xff] }
0x1ee1   :  { %5858 = vmatprep.subr.mxu0 %v5578_v41  ;;  %5929 = vmatprep.subr.mxu1 %v5580_v42  ;;  %v7971_v41 = vld [vmem:[%s11134_s25 + $0x240] sm:$0xff]  ;;  %v7977_v42 = vld [vmem:[%s11134_s25 + $0x270] sm:$0xff] }
0x1ee2   :  { %5859 = vmatpush1.msra.mxu0 %v5577_v43  ;;  %5892 = vmatprep.mubr.f32.mxu0 %v9089_v54  ;;  %v7974_v43 = vld [vmem:[%s11134_s25 + $0x258] sm:$0xff] }
0x1ee3   :  { %5930 = vmatpush1.msra.mxu1 %v5579_v44  ;;  %5963 = vmatprep.mubr.f32.mxu1 %v9089_v54  ;;  %v9084_v44 = vld [vmem:[%s11130_s20 + $0x20] sm:$0xff] }
0x1ee4   :  { %7922 = vmatmul.mubr.msk.f32.vlgmr.msra.gmra.mxu0 %vm495_vm1, %v5573_v14  ;;  %7923 = vmatmul.mubr.msk.f32.vlgmr.msra.gmra.mxu1 %vm495_vm1, %v5573_v14  ;;  %v7946_v14 = vld [vmem:[%s11134_s25 + $0x190] sm:$0xff] }
0x1ee5   :  { %8986 = vmatprep.subr.mxu0 %v9089_v54  ;;  %8988 = vmatprep.mubr.msk.f32.mxu0 %vm9090_vm6, %v9089_v54 }
0x1ee6   :  { %8987 = vmatpush3.msra.mxu0 %v10554_v39  ;;  %6124 = vmatprep.mubr.f32.mxu1 %v9089_v54 }
0x1ee7   :  { %6084 = vmatprep.subr.mxu1 %v7938_v46  ;;  %6155 = vmatprep.subr.mxu0 %v7940_v49  ;;  %v7968_v46 = vld [vmem:[%s11134_s25 + $0x228] sm:$0xff]  ;;  %v7967_v49 = vld [vmem:[%s11134_s25 + $0x220] sm:$0xff] }
0x1ee8   :  { %8989 = vmatmul.mubr.msk.f32.vlgmr.msra.gmra.mxu0 %vm409_vm0, %v10105_v29  ;;  %v7934_v29 = vld [vmem:[%s11134_s25 + $0x148] sm:$0xff]  ;;  %6085 = vmatpush1.msra.mxu1 %v7937_v47  ;;  %v7973_v47 = vld [vmem:[%s11134_s25 + $0x250] sm:$0xff] }
0x1ee9   :  { %6195 = vmatprep.mubr.f32.mxu0 %v9089_v54  ;;  %6156 = vmatpush1.msra.mxu0 %v7939_v50  ;;  %v7964_v50 = vld [vmem:[%s11134_s25 + $0x208] sm:$0xff] }
0x1eea   :  { %6086 = vmatprep.subr.mxu1 %v7934_v29  ;;  %6157 = vmatprep.subr.mxu0 %v7936_v52  ;;  %v7970_v29 = vld [vmem:[%s11134_s25 + $0x238] sm:$0xff]  ;;  %v7963_v52 = vld [vmem:[%s11134_s25 + $0x200] sm:$0xff] }
0x1eeb   :  { %6087 = vmatpush1.msra.mxu1 %v7933_v51  ;;  %6158 = vmatpush1.msra.mxu0 %v7935_v3  ;;  %v7969_v51 = vld [vmem:[%s11134_s25 + $0x230] sm:$0xff] }
0x1eec   :  { %6088 = vmatprep.subr.mxu1 %v7930_v2  ;;  %6159 = vmatprep.subr.mxu0 %v7932_v7  ;;  %v7966_v2 = vld [vmem:[%s11134_s25 + $0x218] sm:$0xff]  ;;  %v7965_v3 = vld [vmem:[%s11134_s25 + $0x210] sm:$0xff] }
0x1eed   :  { %6089 = vmatpush1.msra.mxu1 %v7929_v53  ;;  %6160 = vmatpush1.msra.mxu0 %v7931_v31  ;;  %v7995_v53 = vld [vmem:[%s11134_s25 + $0x2e8] sm:$0xff] }
0x1eee   :  { %6090 = vmatprep.subr.mxu1 %v7926_v26  ;;  %6161 = vmatprep.subr.mxu0 %v7928_v56 }
0x1eef   :  { %6091 = vmatpush1.msra.mxu1 %v7925_v55  ;;  %6162 = vmatpush1.msra.mxu0 %v7927_v59 }
0x1ef0   :  { %8991 = vmatprep.subr.mxu1 %v9089_v54  ;;  %6320 = vmatprep.subr.mxu0 %v7957_v60 }
0x1f9b   :  { %v5749_v61 = vpop.f32.mrf.mxu0  ;;  %v5820_v30 = vpop.f32.mrf.mxu1 }
0x1f9d   :  { %v5751_v62 = vpop.f32.mrf.mxu0  ;;  %v10716_v63 = vpop.f32.mrf.mxu1 }
0x1fa4   :  { %v5894_v1 = vpop.f32.mrf.mxu0  ;;  %v5965_v4 = vpop.f32.mrf.mxu1 }
0x1fa5   :  { %v5895_v8 = vadd.f32 %v5894_v1, %v5749_v61  ;;  %v5966_v9 = vadd.f32 %v5965_v4, %v5820_v30  ;;  %v7994_v30 = vld [vmem:[%s11134_s25 + $0x2e0] sm:$0xff]  ;;  %v7991_v1 = vld [vmem:[%s11134_s25 + $0x2c8] sm:$0xff] }
0x1fa6   :  { %v5896_v10 = vpop.f32.mrf.mxu0  ;;  %v10778_v5 = vpop.f32.mrf.mxu1 }
0x1fa7   :  { %v5897_v11 = vadd.f32 %v5896_v10, %v5751_v62  ;;  %v7997_v62 = vld [vmem:[%s11134_s25 + $0x2f8] sm:$0xff] }
0x1fa8   :  { %v6036_v58 = vpop.f32.mrf.mxu0  ;;  %v7993_v10 = vld [vmem:[%s11134_s25 + $0x2d8] sm:$0xff] }
0x1fa9   :  { %7941 = vmatmul.mubr.msk.f32.vlgmr.msra.gmra.mxu1 %vm495_vm1, %v6036_v58  ;;  %7942 = vmatmul.mubr.msk.f32.vlgmr.msra.gmra.mxu0 %vm495_vm1, %v6036_v58  ;;  %v7987_v58 = vld [vmem:[%s11134_s25 + $0x2a8] sm:$0xff] }
0x1faa   :  { %8992 = vmatpush3.msra.mxu1 %v10554_v39  ;;  %v8990_v17 = vpop.f32.mrf.mxu0  ;;  %8993 = vmatprep.mubr.msk.f32.mxu1 %vm9090_vm6, %v9089_v54 }
0x1fab   :  { %6321 = vmatpush1.msra.mxu0 %v7956_v12  ;;  %6391 = vmatprep.subr.mxu1 %v7959_v57  ;;  %v7992_v12 = vld [vmem:[%s11134_s25 + $0x2d0] sm:$0xff]  ;;  %v7986_v57 = vld [vmem:[%s11134_s25 + $0x2a0] sm:$0xff]  ;;  %v7983_v17 = vld [vmem:[%s11134_s25 + $0x288] sm:$0xff] }
0x1fac   :  { %6322 = vmatprep.subr.mxu0 %v7953_v16  ;;  %6360 = vmatprep.mubr.f32.mxu0 %v9089_v54  ;;  %v7989_v16 = vld [vmem:[%s11134_s25 + $0x2b8] sm:$0xff] }
0x1fad   :  { %8994 = vmatmul.mubr.msk.f32.vlgmr.msra.gmra.mxu1 %vm409_vm0, %v9083_v45  ;;  %6323 = vmatpush1.msra.mxu0 %v7952_v18  ;;  %v7988_v18 = vld [vmem:[%s11134_s25 + $0x2b0] sm:$0xff] }
0x1fae   :  { %6392 = vmatpush1.msra.mxu1 %v7958_v13  ;;  %6431 = vmatprep.mubr.f32.mxu1 %v9089_v54  ;;  %v7982_v13 = vld [vmem:[%s11134_s25 + $0x280] sm:$0xff]  ;;  %v7984_v45 = vld [vmem:[%s11134_s25 + $0x290] sm:$0xff] }
0x1faf   :  { %6393 = vmatprep.subr.mxu1 %v7955_v19  ;;  %6324 = vmatprep.subr.mxu0 %v7949_v15  ;;  %v7985_v19 = vld [vmem:[%s11134_s25 + $0x298] sm:$0xff]  ;;  %v8014_v15 = vld [vmem:[%s11134_s25 + $0x368] sm:$0xff] }
0x1fb0   :  { %6394 = vmatpush1.msra.mxu1 %v7954_v20  ;;  %6325 = vmatpush1.msra.mxu0 %v7948_v48 }
0x1fb1   :  { %6395 = vmatprep.subr.mxu1 %v7951_v21  ;;  %6326 = vmatprep.subr.mxu0 %v7945_v23 }
0x1fb2   :  { %6396 = vmatpush1.msra.mxu1 %v7950_v25  ;;  %6327 = vmatpush1.msra.mxu0 %v7944_v27 }
0x1fb3   :  { %6397 = vmatprep.subr.mxu1 %v7947_v28  ;;  %8996 = vmatprep.subr.mxu0 %v9089_v54 }
0x1fb4   :  { %6398 = vmatpush1.msra.mxu1 %v7946_v14 }
0x1fb5   :  { %6556 = vmatprep.subr.mxu1 %v7976_v32  ;;  %v8013_v32 = vld [vmem:[%s11134_s25 + $0x360] sm:$0xff] }
0x2069   :  { %v6126_v33 = vpop.f32.mrf.mxu1  ;;  %v6197_v40 = vpop.f32.mrf.mxu0 }
0x206a   :  { %v6202_v34 = vadd.f32 %v6126_v33, %v5895_v8  ;;  %v6204_v22 = vadd.f32 %v6197_v40, %v5966_v9  ;;  %v7990_v8 = vld [vmem:[%s11134_s25 + $0x2c0] sm:$0xff]  ;;  %v7996_v9 = vld [vmem:[%s11134_s25 + $0x2f0] sm:$0xff]  ;;  %v8016_v33 = vld [vmem:[%s11134_s25 + $0x378] sm:$0xff] }
0x206b   :  { %v6128_v35 = vpop.f32.mrf.mxu1  ;;  %v10840_v7 = vpop.f32.mrf.mxu0  ;;  %v8010_v40 = vld [vmem:[%s11134_s25 + $0x348] sm:$0xff] }
0x206c   :  { %v6203_v36 = vadd.f32 %v6128_v35, %v5897_v11  ;;  %v9085_v11 = vld [vmem:[%s11130_s20 + $0x28] sm:$0xff]  ;;  %v8015_v35 = vld [vmem:[%s11134_s25 + $0x370] sm:$0xff] }
0x206d   :  { %v6272_v37 = vpop.f32.mrf.mxu1 }
0x206e   :  { %7960 = vmatmul.mubr.msk.f32.vlgmr.msra.gmra.mxu0 %vm495_vm1, %v6272_v37  ;;  %7961 = vmatmul.mubr.msk.f32.vlgmr.msra.gmra.mxu1 %vm495_vm1, %v6272_v37  ;;  %v9086_v37 = vld [vmem:[%s11130_s20 + $0x30] sm:$0xff] }
0x206f   :  { %8997 = vmatpush3.msra.mxu0 %v10554_v39  ;;  %v8995_v6 = vpop.f32.mrf.mxu1  ;;  %8998 = vmatprep.mubr.msk.f32.mxu0 %vm9090_vm6, %v9089_v54 }
0x2070   :  { %6557 = vmatpush1.msra.mxu1 %v7975_v0  ;;  %6627 = vmatprep.subr.mxu0 %v7978_v24  ;;  %v8006_v0 = vld [vmem:[%s11134_s25 + $0x328] sm:$0xff]  ;;  %v8011_v24 = vld [vmem:[%s11134_s25 + $0x350] sm:$0xff]  ;;  %v8008_v6 = vld [vmem:[%s11134_s25 + $0x338] sm:$0xff] }
0x2071   :  { %6558 = vmatprep.subr.mxu1 %v7972_v38  ;;  %6596 = vmatprep.mubr.f32.mxu1 %v9089_v54  ;;  %v8005_v38 = vld [vmem:[%s11134_s25 + $0x320] sm:$0xff] }
0x2072   :  { %8999 = vmatmul.mubr.msk.f32.vlgmr.msra.gmra.mxu0 %vm409_vm0, %v9084_v44  ;;  %6559 = vmatpush1.msra.mxu1 %v7971_v41  ;;  %v8002_v41 = vld [vmem:[%s11134_s25 + $0x308] sm:$0xff]  ;;  %v8004_v44 = vld [vmem:[%s11134_s25 + $0x318] sm:$0xff] }
0x2073   :  { %6628 = vmatpush1.msra.mxu0 %v7977_v42  ;;  %6667 = vmatprep.mubr.f32.mxu0 %v9089_v54  ;;  %v8007_v42 = vld [vmem:[%s11134_s25 + $0x330] sm:$0xff] }
0x2074   :  { %6629 = vmatprep.subr.mxu0 %v7974_v43  ;;  %6560 = vmatprep.subr.mxu1 %v7968_v46  ;;  %v8001_v43 = vld [vmem:[%s11134_s25 + $0x300] sm:$0xff]  ;;  %v8003_v46 = vld [vmem:[%s11134_s25 + $0x310] sm:$0xff] }
0x2075   :  { %6630 = vmatpush1.msra.mxu0 %v7973_v47  ;;  %6561 = vmatpush1.msra.mxu1 %v7967_v49  ;;  %v8033_v47 = vld [vmem:[%s11134_s25 + $0x3e8] sm:$0xff] }
0x2076   :  { %6631 = vmatprep.subr.mxu0 %v7970_v29  ;;  %6562 = vmatprep.subr.mxu1 %v7964_v50 }
0x2077   :  { %6632 = vmatpush1.msra.mxu0 %v7969_v51  ;;  %6563 = vmatpush1.msra.mxu1 %v7963_v52 }
0x2078   :  { %6633 = vmatprep.subr.mxu0 %v7966_v2  ;;  %9001 = vmatprep.subr.mxu1 %v9089_v54 }
0x2079   :  { %6634 = vmatpush1.msra.mxu0 %v7965_v3 }
0x207a   :  { %6792 = vmatprep.subr.mxu0 %v7995_v53 }
0x212e   :  { %v6362_v26 = vpop.f32.mrf.mxu0  ;;  %v6433_v31 = vpop.f32.mrf.mxu1 }
0x212f   :  { %v6438_v55 = vadd.f32 %v6362_v26, %v6202_v34  ;;  %v6440_v56 = vadd.f32 %v6433_v31, %v6204_v22  ;;  %v8009_v22 = vld [vmem:[%s11134_s25 + $0x340] sm:$0xff]  ;;  %v8035_v31 = vld [vmem:[%s11134_s25 + $0x3f8] sm:$0xff] }
0x2130   :  { %v6364_v59 = vpop.f32.mrf.mxu0  ;;  %v10902_v20 = vpop.f32.mrf.mxu1  ;;  %v8032_v26 = vld [vmem:[%s11134_s25 + $0x3e0] sm:$0xff] }
0x2131   :  { %v6439_v60 = vadd.f32 %v6364_v59, %v6203_v36  ;;  %v8012_v36 = vld [vmem:[%s11134_s25 + $0x358] sm:$0xff]  ;;  %v8028_v59 = vld [vmem:[%s11134_s25 + $0x3c0] sm:$0xff] }
0x2132   :  { %v6508_v61 = vpop.f32.mrf.mxu0 }
0x2133   :  { %7979 = vmatmul.mubr.msk.f32.vlgmr.msra.gmra.mxu1 %vm495_vm1, %v6508_v61  ;;  %7980 = vmatmul.mubr.msk.f32.vlgmr.msra.gmra.mxu0 %vm495_vm1, %v6508_v61  ;;  %v8031_v61 = vld [vmem:[%s11134_s25 + $0x3d8] sm:$0xff] }
0x2134   :  { %9002 = vmatpush3.msra.mxu1 %v10554_v39  ;;  %v9000_v4 = vpop.f32.mrf.mxu0  ;;  %9003 = vmatprep.mubr.msk.f32.mxu1 %vm9090_vm6, %v9089_v54 }
0x2135   :  { %6793 = vmatpush1.msra.mxu0 %v7994_v30  ;;  %6863 = vmatprep.subr.mxu1 %v7997_v62  ;;  %v9087_v30 = vld [vmem:[%s11130_s20 + $0x38] sm:$0xff]  ;;  %v8025_v62 = vld [vmem:[%s11134_s25 + $0x3a8] sm:$0xff]  ;;  %v8024_v4 = vld [vmem:[%s11134_s25 + $0x3a0] sm:$0xff] }
0x2136   :  { %6794 = vmatprep.subr.mxu0 %v7991_v1  ;;  %6832 = vmatprep.mubr.f32.mxu0 %v9089_v54  ;;  %v8030_v1 = vld [vmem:[%s11134_s25 + $0x3d0] sm:$0xff] }
0x2137   :  { %9004 = vmatmul.mubr.msk.f32.vlgmr.msra.gmra.mxu1 %vm409_vm0, %v9085_v11  ;;  %6795 = vmatpush1.msra.mxu0 %v7990_v8  ;;  %v8027_v8 = vld [vmem:[%s11134_s25 + $0x3b8] sm:$0xff]  ;;  %v8020_v11 = vld [vmem:[%s11134_s25 + $0x380] sm:$0xff] }
0x2138   :  { %6864 = vmatpush1.msra.mxu1 %v7996_v9  ;;  %6903 = vmatprep.mubr.f32.mxu1 %v9089_v54  ;;  %v8021_v9 = vld [vmem:[%s11134_s25 + $0x388] sm:$0xff] }
0x2139   :  { %6865 = vmatprep.subr.mxu1 %v7993_v10  ;;  %6796 = vmatprep.subr.mxu0 %v7987_v58  ;;  %v8026_v10 = vld [vmem:[%s11134_s25 + $0x3b0] sm:$0xff]  ;;  %v8023_v58 = vld [vmem:[%s11134_s25 + $0x398] sm:$0xff] }
0x213a   :  { %6866 = vmatpush1.msra.mxu1 %v7992_v12  ;;  %6797 = vmatpush1.msra.mxu0 %v7986_v57  ;;  %v8022_v12 = vld [vmem:[%s11134_s25 + $0x390] sm:$0xff]  ;;  %v8052_v57 = vld [vmem:[%s11134_s25 + $0x468] sm:$0xff] }
0x213b   :  { %6867 = vmatprep.subr.mxu1 %v7989_v16  ;;  %6798 = vmatprep.subr.mxu0 %v7983_v17 }
0x213c   :  { %6868 = vmatpush1.msra.mxu1 %v7988_v18  ;;  %6799 = vmatpush1.msra.mxu0 %v7982_v13 }
0x213d   :  { %6869 = vmatprep.subr.mxu1 %v7985_v19  ;;  %9006 = vmatprep.subr.mxu0 %v9089_v54 }
0x213e   :  { %6870 = vmatpush1.msra.mxu1 %v7984_v45 }
0x213f   :  { %7028 = vmatprep.subr.mxu1 %v8014_v15 }
0x21f3   :  { %v6598_v48 = vpop.f32.mrf.mxu1  ;;  %v6669_v21 = vpop.f32.mrf.mxu0 }
0x21f4   :  { %v6674_v23 = vadd.f32 %v6598_v48, %v6438_v55  ;;  %v6676_v25 = vadd.f32 %v6669_v21, %v6440_v56  ;;  %v8029_v55 = vld [vmem:[%s11134_s25 + $0x3c8] sm:$0xff]  ;;  %v8054_v21 = vld [vmem:[%s11134_s25 + $0x478] sm:$0xff] }
0x21f5   :  { %v6600_v27 = vpop.f32.mrf.mxu1  ;;  %v10964_v49 = vpop.f32.mrf.mxu0 }
0x21f6   :  { %v6675_v28 = vadd.f32 %v6600_v27, %v6439_v60  ;;  %v8034_v60 = vld [vmem:[%s11134_s25 + $0x3f0] sm:$0xff] }
0x21f7   :  { %v6744_v14 = vpop.f32.mrf.mxu1 }
0x21f8   :  { %7998 = vmatmul.mubr.msk.f32.vlgmr.msra.gmra.mxu0 %vm495_vm1, %v6744_v14  ;;  %7999 = vmatmul.mubr.msk.f32.vlgmr.msra.gmra.mxu1 %vm495_vm1, %v6744_v14  ;;  %v8050_v14 = vld [vmem:[%s11134_s25 + $0x458] sm:$0xff] }
0x21f9   :  { %9007 = vmatpush3.msra.mxu0 %v10554_v39  ;;  %v9005_v34 = vpop.f32.mrf.mxu1  ;;  %9008 = vmatprep.mubr.msk.f32.mxu0 %vm9090_vm6, %v9089_v54 }
0x21fa   :  { %7029 = vmatpush1.msra.mxu1 %v8013_v32  ;;  %7099 = vmatprep.subr.mxu0 %v8016_v33  ;;  %v8047_v32 = vld [vmem:[%s11134_s25 + $0x440] sm:$0xff]  ;;  %v8049_v33 = vld [vmem:[%s11134_s25 + $0x450] sm:$0xff]  ;;  %v8046_v34 = vld [vmem:[%s11134_s25 + $0x438] sm:$0xff] }
0x21fb   :  { %7030 = vmatprep.subr.mxu1 %v8010_v40  ;;  %7068 = vmatprep.mubr.f32.mxu1 %v9089_v54  ;;  %v8044_v40 = vld [vmem:[%s11134_s25 + $0x428] sm:$0xff] }
0x21fc   :  { %9009 = vmatmul.mubr.msk.f32.vlgmr.msra.gmra.mxu0 %vm409_vm0, %v9086_v37  ;;  %7031 = vmatpush1.msra.mxu1 %v8009_v22  ;;  %v8045_v22 = vld [vmem:[%s11134_s25 + $0x430] sm:$0xff]  ;;  %v8039_v37 = vld [vmem:[%s11134_s25 + $0x400] sm:$0xff] }
0x21fd   :  { %7100 = vmatpush1.msra.mxu0 %v8015_v35  ;;  %7139 = vmatprep.mubr.f32.mxu0 %v9089_v54  ;;  %v8040_v35 = vld [vmem:[%s11134_s25 + $0x408] sm:$0xff] }
0x21fe   :  { %7101 = vmatprep.subr.mxu0 %v8012_v36  ;;  %7032 = vmatprep.subr.mxu1 %v8006_v0  ;;  %v8042_v36 = vld [vmem:[%s11134_s25 + $0x418] sm:$0xff]  ;;  %v8041_v0 = vld [vmem:[%s11134_s25 + $0x410] sm:$0xff] }
0x21ff   :  { %7102 = vmatpush1.msra.mxu0 %v8011_v24  ;;  %7033 = vmatpush1.msra.mxu1 %v8005_v38 }
0x2200   :  { %7103 = vmatprep.subr.mxu0 %v8008_v6  ;;  %7034 = vmatprep.subr.mxu1 %v8002_v41 }
0x2201   :  { %7104 = vmatpush1.msra.mxu0 %v8007_v42  ;;  %7035 = vmatpush1.msra.mxu1 %v8001_v43 }
0x2202   :  { %7105 = vmatprep.subr.mxu0 %v8004_v44  ;;  %9011 = vmatprep.subr.mxu1 %v9089_v54 }
0x2203   :  { %7106 = vmatpush1.msra.mxu0 %v8003_v46  ;;  %v7624_v46 = vlaneseq }
0x2204   :  { %7264 = vmatprep.subr.mxu0 %v8033_v47  ;;  %v5968_v47 = vadd.f32 %v10778_v5, %v10716_v63 }
0x22b8   :  { %v6834_v29 = vpop.f32.mrf.mxu0  ;;  %v6905_v50 = vpop.f32.mrf.mxu1 }
0x22b9   :  { %v6910_v51 = vadd.f32 %v6834_v29, %v6674_v23  ;;  %v6912_v52 = vadd.f32 %v6905_v50, %v6676_v25  ;;  %v8051_v23 = vld [vmem:[%s11134_s25 + $0x460] sm:$0xff]  ;;  %v8048_v25 = vld [vmem:[%s11134_s25 + $0x448] sm:$0xff]  ;;  %v6205_v29 = vadd.f32 %v10840_v7, %v5968_v47  ;;  %v7625_v50 = vshrl.u32 %v7624_v46, 7 }
0x22ba   :  { %v6836_v2 = vpop.f32.mrf.mxu0  ;;  %v11026_v16 = vpop.f32.mrf.mxu1 }
0x22bb   :  { %v6911_v3 = vadd.f32 %v6836_v2, %v6675_v28  ;;  %v8053_v28 = vld [vmem:[%s11134_s25 + $0x470] sm:$0xff] }
0x22bc   :  { %v6980_v53 = vpop.f32.mrf.mxu0 }
0x22bd   :  { %8017 = vmatmul.mubr.msk.f32.vlgmr.msra.gmra.mxu1 %vm495_vm1, %v6980_v53  ;;  %8018 = vmatmul.mubr.msk.f32.vlgmr.msra.gmra.mxu0 %vm495_vm1, %v6980_v53  ;;  %v7634_v53 = vsub.s32 2, %v7625_v50 }
0x22be   :  { %9012 = vmatpush3.msra.mxu1 %v10554_v39  ;;  %v9010_v56 = vpop.f32.mrf.mxu0  ;;  %9013 = vmatprep.mubr.msk.f32.mxu1 %vm9090_vm6, %v9089_v54 }
0x22bf   :  { %7265 = vmatpush1.msra.mxu0 %v8032_v26  ;;  %7335 = vmatprep.subr.mxu1 %v8035_v31  ;;  %v7622_v31 = vld [vmem:[%s11136_s26] sm:$0xf]  ;;  %v7630_v56 = vsub.s32 1, %v7625_v50 }
0x22c0   :  { %7266 = vmatprep.subr.mxu0 %v8029_v55  ;;  %7304 = vmatprep.mubr.f32.mxu0 %v9089_v54 }
0x22c1   :  { %9014 = vmatmul.mubr.msk.f32.vlgmr.msra.gmra.mxu1 %vm409_vm0, %v9087_v30  ;;  %7267 = vmatpush1.msra.mxu0 %v8028_v59  ;;  %v7638_v59 = vsub.s32 3, %v7625_v50 }
0x22c2   :  { %7336 = vmatpush1.msra.mxu1 %v8034_v60  ;;  %7375 = vmatprep.mubr.f32.mxu1 %v9089_v54  ;;  %v7635_v60 = vrot.slane %v7622_v31, %v7634_v53 }
0x22c3   :  { %7337 = vmatprep.subr.mxu1 %v8031_v61  ;;  %7268 = vmatprep.subr.mxu0 %v8025_v62 }
0x22c4   :  { %7338 = vmatpush1.msra.mxu1 %v8030_v1  ;;  %7269 = vmatpush1.msra.mxu0 %v8024_v4  ;;  %v7631_v1 = vrot.slane %v7622_v31, %v7630_v56  ;;  %v7639_v4 = vrot.slane %v7622_v31, %v7638_v59 }
0x22c5   :  { %7339 = vmatprep.subr.mxu1 %v8027_v8  ;;  %7270 = vmatprep.subr.mxu0 %v8021_v9 }
0x22c6   :  { %7340 = vmatpush1.msra.mxu1 %v8026_v10  ;;  %7271 = vmatpush1.msra.mxu0 %v8020_v11 }
0x22c7   :  { %7341 = vmatprep.subr.mxu1 %v8023_v58  ;;  %9016 = vmatprep.subr.mxu0 %v9089_v54 }
0x22c8   :  { %7342 = vmatpush1.msra.mxu1 %v8022_v12 }
0x22c9   :  { %7500 = vmatprep.subr.mxu1 %v8052_v57 }
0x237d   :  { %v7070_v17 = vpop.f32.mrf.mxu1  ;;  %v7141_v18 = vpop.f32.mrf.mxu0 }
0x237e   :  { %v7146_v13 = vadd.f32 %v7070_v17, %v6910_v51  ;;  %v11028_v19 = vadd.f32 %v7141_v18, %v6912_v52  ;;  %v6441_v51 = vadd.f32 %v10902_v20, %v6205_v29 }
0x237f   :  { %v7072_v45 = vpop.f32.mrf.mxu1  ;;  %v7143_v24 = vpop.f32.mrf.mxu0 }
0x2380   :  { %v7147_v15 = vadd.f32 %v7072_v45, %v6911_v3  ;;  %v6677_v2 = vadd.f32 %v10964_v49, %v6441_v51  ;;  %v7626_v3 = vsub.s32 0, %v7625_v50 }
0x2381   :  { %v7216_v48 = vpop.f32.mrf.mxu1 }
0x2382   :  { %8036 = vmatmul.mubr.msk.f32.vlgmr.msra.gmra.mxu0 %vm495_vm1, %v7216_v48  ;;  %8037 = vmatmul.mubr.msk.f32.vlgmr.msra.gmra.mxu1 %vm495_vm1, %v7216_v48  ;;  %v6913_v26 = vadd.f32 %v11026_v16, %v6677_v2  ;;  %v7627_v7 = vrot.slane %v7622_v31, %v7626_v3 }
0x2383   :  { %9017 = vmatpush3.msra.mxu0 %v10554_v39  ;;  %v9015_v27 = vpop.f32.mrf.mxu1  ;;  %9018 = vmatprep.mubr.msk.f32.mxu0 %vm9090_vm6, %v9089_v54  ;;  %v9088_v39 = vld [vmem:[%s11130_s20 + $0x40] sm:$0xff] }
0x2384   :  { %7571 = vmatprep.subr.mxu0 %v8054_v21  ;;  %7501 = vmatpush1.msra.mxu1 %v8051_v23  ;;  %v7149_v63 = vadd.f32 %v7143_v24, %v6913_v26 }
0x2385   :  { %7502 = vmatprep.subr.mxu1 %v8048_v25  ;;  %7540 = vmatprep.mubr.f32.mxu1 %v9089_v54 }
0x2386   :  { %9019 = vmatmul.mubr.msk.f32.vlgmr.msra.gmra.mxu0 %vm409_vm0, %v9088_v39  ;;  %7503 = vmatpush1.msra.mxu1 %v8047_v32 }
0x2387   :  { %7572 = vmatpush1.msra.mxu0 %v8053_v28  ;;  %7611 = vmatprep.mubr.f32.mxu0 %v9089_v54  ;;  %v8043_v54 = vld [vmem:[%s11134_s25 + $0x420] sm:$0xff] }
0x2388   :  { %7573 = vmatprep.subr.mxu0 %v8050_v14  ;;  %7504 = vmatprep.subr.mxu1 %v8044_v40 }
0x2389   :  { %7574 = vmatpush1.msra.mxu0 %v8049_v33  ;;  %7505 = vmatpush1.msra.mxu1 %v8043_v54 }
0x238a   :  { %7575 = vmatprep.subr.mxu0 %v8046_v34  ;;  %7506 = vmatprep.subr.mxu1 %v8040_v35 }
0x238b   :  { %7576 = vmatpush1.msra.mxu0 %v8045_v22  ;;  %7507 = vmatpush1.msra.mxu1 %v8039_v37 }
0x238c   :  { %7577 = vmatprep.subr.mxu0 %v8042_v36 }
0x238d   :  { %7578 = vmatpush1.msra.mxu0 %v8041_v0 }
0x2442   :  { %v7306_v38 = vpop.f32.mrf.mxu0  ;;  %v7377_v52 = vpop.f32.mrf.mxu1 }
0x2443   :  { %v7382_v6 = vadd.f32 %v7306_v38, %v7146_v13  ;;  %v7384_v5 = vadd.f32 %v7377_v52, %v11028_v19 }
0x2444   :  { %v7308_v41 = vpop.f32.mrf.mxu0  ;;  %v7379_v55 = vpop.f32.mrf.mxu1 }
0x2445   :  { %v7383_v42 = vadd.f32 %v7308_v41, %v7147_v15  ;;  %v7385_v20 = vadd.f32 %v7379_v55, %v7149_v63 }
0x2446   :  { %v7452_v43 = vpop.f32.mrf.mxu0 }
0x2447   :  { %8055 = vmatmul.mubr.msk.f32.vlgmr.msra.gmra.mxu1 %vm495_vm1, %v7452_v43  ;;  %8056 = vmatmul.mubr.msk.f32.vlgmr.msra.gmra.mxu0 %vm495_vm1, %v7452_v43 }
0x2448   :  { %v9020_v44 = vpop.f32.mrf.mxu0 }
0x2507   :  { %v7542_v61 = vpop.f32.mrf.mxu1  ;;  %v7613_v30 = vpop.f32.mrf.mxu0 }
0x2508   :  { %v7618_v49 = vadd.f32 %v7542_v61, %v7382_v6  ;;  %v7620_v62 = vadd.f32 %v7613_v30, %v7384_v5 }
0x2509   :  { %v7544_v8 = vpop.f32.mrf.mxu1  ;;  %v7615_v9 = vpop.f32.mrf.mxu0 }
0x250a   :  { %v7644_v10 = vadd.f32 %v7627_v7, %v7618_v49  ;;  %v7646_v11 = vadd.f32 %v7635_v60, %v7620_v62  ;;  %v7619_v58 = vadd.f32 %v7544_v8, %v7383_v42  ;;  %v7621_v12 = vadd.f32 %v7615_v9, %v7385_v20 }
0x250c   :  { %7648 = vst [vmem:[%s11137_s27] sm:$0xff] %v7644_v10  ;;  %7650 = vst [vmem:[%s11137_s27 + $0x10] sm:$0xff] %v7646_v11  ;;  %v7645_v57 = vadd.f32 %v7631_v1, %v7619_v58  ;;  %v7647_v16 = vadd.f32 %v7639_v4, %v7621_v12 }
0x250e   :  { %7649 = vst [vmem:[%s11137_s27 + $0x8] sm:$0xff] %v7645_v57  ;;  %7651 = vst [vmem:[%s11137_s27 + $0x18] sm:$0xff] %v7647_v16 }

</bundles_post_ra>
